<compile_context>
chip_gen: v6e
topology: v6e:2x2x1
jax: 0.10.0
libtpu: 0.0.40
codegen_flags: <defaults>
</compile_context>

<pallas_src>
import jax
import jax.numpy as jnp
from jax.experimental import pallas as pl
from jax.experimental.pallas import tpu as pltpu

_BN_EPS = 1e-5


def _mlp3_kernel(x_ref, w1_ref, b1_ref, w2_ref, b2_ref, w3_ref, b3_ref, o_ref):
    # In-kernel cast of the f32 input tile to bf16 (MXU operand dtype).
    x = x_ref[...].astype(jnp.bfloat16)

    # Layer 1: (TM, 2F) @ (2F, 512) + (1, 512) -> relu   (BN folded into W/b)
    h = jnp.dot(x, w1_ref[...], preferred_element_type=jnp.float32)
    h = jnp.maximum(h + b1_ref[...], 0.0)

    # Layer 2: (TM, 512) @ (512, 512) + (1, 512) -> relu
    h = jnp.dot(h.astype(jnp.bfloat16), w2_ref[...],
                preferred_element_type=jnp.float32)
    h = jnp.maximum(h + b2_ref[...], 0.0)

    # Layer 3: (TM, 512) @ (512, F) + (1, F) -> relu
    h = jnp.dot(h.astype(jnp.bfloat16), w3_ref[...],
                preferred_element_type=jnp.float32)
    h = jnp.maximum(h + b3_ref[...], 0.0)

    o_ref[...] = h.astype(o_ref.dtype)


def _fold_bn(w, b, gamma, beta, mean, var):
    """Fold inference-mode BatchNorm into a (out,in) conv-1x1 weight/bias.

    Returns W_eff with shape (in, out) (ready for x @ W_eff) and b_eff (1, out).
    """
    scale = gamma * jax.lax.rsqrt(var + _BN_EPS)          # (out,)
    w_eff = (w * scale[:, None]).T                        # (in, out)
    b_eff = (b - mean) * scale + beta                     # (out,)
    return w_eff, b_eff[None, :]


def _pick_tile_m(m):
    """Adaptive batch tile: large enough to amortize per-step overhead, small
    enough to keep >=2 grid steps (feeds both v7x TCs) and bounded VMEM."""
    half = pl.cdiv(m, 2)
    tile = ((half + 255) // 256) * 256      # round up to a multiple of 256
    return max(256, min(2048, tile))


def mlp3_forward(x, params, *, tile_m=None):
    """x: (N, P, 2F) float32.  Returns (N, P, F) float32."""
    N, P, c_in = x.shape

    w1, b1 = _fold_bn(params["conv1_w"], params["conv1_b"],
                      params["bn1_gamma"], params["bn1_beta"],
                      params["bn1_mean"], params["bn1_var"])
    w2, b2 = _fold_bn(params["conv2_w"], params["conv2_b"],
                      params["bn2_gamma"], params["bn2_beta"],
                      params["bn2_mean"], params["bn2_var"])
    w3, b3 = _fold_bn(params["conv3_w"], params["conv3_b"],
                      params["bn3_gamma"], params["bn3_beta"],
                      params["bn3_mean"], params["bn3_var"])
    f_out = w3.shape[1]

    # Flatten (N, P, C) -> (M, C).  No padding / extra HBM pass: the ragged
    # tail (if any) is handled by Pallas partial boundary blocks.
    m = N * P
    x2 = x.reshape(m, c_in)

    if tile_m is None:
        tile_m = _pick_tile_m(m)
    grid_m = pl.cdiv(m, tile_m)

    # bf16 weights (MXU operands, half the resident bytes); f32 biases.
    w1b = w1.astype(jnp.bfloat16)
    w2b = w2.astype(jnp.bfloat16)
    w3b = w3.astype(jnp.bfloat16)
    b1 = b1.astype(jnp.float32)
    b2 = b2.astype(jnp.float32)
    b3 = b3.astype(jnp.float32)

    def resident(shape):
        return pl.BlockSpec(shape, lambda i: (0,) * len(shape))

    out = pl.pallas_call(
        _mlp3_kernel,
        out_shape=jax.ShapeDtypeStruct((m, f_out), jnp.float32),
        grid_spec=pltpu.PrefetchScalarGridSpec(
            num_scalar_prefetch=0,
            grid=(grid_m,),
            in_specs=[
                pl.BlockSpec((tile_m, c_in), lambda i: (i, 0)),
                resident(w1b.shape), resident(b1.shape),
                resident(w2b.shape), resident(b2.shape),
                resident(w3b.shape), resident(b3.shape),
            ],
            out_specs=pl.BlockSpec((tile_m, f_out), lambda i: (i, 0)),
        ),
        compiler_params=pltpu.CompilerParams(
            dimension_semantics=("parallel",),
            vmem_limit_bytes=32 * 1024 * 1024),
    )(x2, w1b, b1, w2b, b2, w3b, b3)

    return out.reshape(N, P, f_out)


def init_params(feat_len, key):
    """Synthetic parameters matching the PyTorch module's shapes.

    conv weights stored (out, in) (kernel-size-1 squeezed); BN params per-out.
    """
    dims = [(2 * feat_len, 512), (512, 512), (512, feat_len)]
    params = {}
    keys = jax.random.split(key, 3 * 6)
    for li, (fan_in, fan_out) in enumerate(dims, start=1):
        k = keys[(li - 1) * 6:(li - 1) * 6 + 6]
        bound = 1.0 / jnp.sqrt(jnp.float32(fan_in))
        params[f"conv{li}_w"] = jax.random.uniform(
            k[0], (fan_out, fan_in), jnp.float32, minval=-bound, maxval=bound)
        params[f"conv{li}_b"] = jax.random.uniform(
            k[1], (fan_out,), jnp.float32, minval=-bound, maxval=bound)
        params[f"bn{li}_gamma"] = jax.random.uniform(
            k[2], (fan_out,), jnp.float32, minval=0.5, maxval=1.5)
        params[f"bn{li}_beta"] = jax.random.uniform(
            k[3], (fan_out,), jnp.float32, minval=-0.2, maxval=0.2)
        params[f"bn{li}_mean"] = jax.random.uniform(
            k[4], (fan_out,), jnp.float32, minval=-0.2, maxval=0.2)
        params[f"bn{li}_var"] = jax.random.uniform(
            k[5], (fat_out := fan_out,), jnp.float32, minval=0.5, maxval=1.5)
    return params


def _reference(x, params):
    """Unfused f32 reference: conv1x1 -> BN (inference) -> relu, three times."""
    def layer(h, li):
        w = params[f"conv{li}_w"]
        b = params[f"conv{li}_b"]
        y = jnp.einsum("npc,oc->npo", h, w) + b
        inv = jax.lax.rsqrt(params[f"bn{li}_var"] + _BN_EPS)
        y = (y - params[f"bn{li}_mean"]) * params[f"bn{li}_gamma"] * inv \
            + params[f"bn{li}_beta"]
        return jnp.maximum(y, 0.0)

    h = layer(x, 1)
    h = layer(h, 2)
    return layer(h, 3)


if __name__ == "__main__":
    # Small shapes consistent with the module: feat_len F, input (B*P, P, 2F).
    FEAT = 128
    B, P = 2, 16
    N = B * P  # "batch" axis of the module is B x P

    key = jax.random.PRNGKey(0)
    kx, kp = jax.random.split(key)
    params = init_params(FEAT, kp)
    x = jax.random.normal(kx, (N, P, 2 * FEAT), jnp.float32)

    out = jax.block_until_ready(mlp3_forward(x, params))
    ref = _reference(x, params)

    assert out.shape == (N, P, FEAT), out.shape
    max_err = float(jnp.max(jnp.abs(out - ref)))
    # bf16 matmul inputs with f32 accumulation: allow a small tolerance.
    assert max_err < 5e-2, max_err

    print("KERNEL_OK")
</pallas_src>

<mosaic_0001>
module attributes {stable_mosaic.version = 11 : i64} {
  func.func @_mlp3_kernel(%arg0: i32, %arg1: memref<256x256xf32, #tpu.memory_space<vmem>>, %arg2: memref<256x512xbf16, #tpu.memory_space<vmem>>, %arg3: memref<1x512xf32, #tpu.memory_space<vmem>>, %arg4: memref<512x512xbf16, #tpu.memory_space<vmem>>, %arg5: memref<1x512xf32, #tpu.memory_space<vmem>>, %arg6: memref<512x128xbf16, #tpu.memory_space<vmem>>, %arg7: memref<1x128xf32, #tpu.memory_space<vmem>>, %arg8: memref<256x128xf32, #tpu.memory_space<vmem>>) attributes {dimension_semantics = [#tpu.dimension_semantics<parallel>], iteration_bounds = array<i64: 2>, scalar_prefetch = 0 : i64, scratch_operands = 0 : i64, tpu.core_type = #tpu.core_type<tc>, window_params = [{transform_indices = @transform_0, window_bounds = array<i64: 256, 256>}, {pipeline_mode = #tpu.pipeline_mode<synchronous>, transform_indices = @transform_1, window_bounds = array<i64: 256, 512>}, {pipeline_mode = #tpu.pipeline_mode<synchronous>, transform_indices = @transform_2, window_bounds = array<i64: 1, 512>}, {pipeline_mode = #tpu.pipeline_mode<synchronous>, transform_indices = @transform_3, window_bounds = array<i64: 512, 512>}, {pipeline_mode = #tpu.pipeline_mode<synchronous>, transform_indices = @transform_4, window_bounds = array<i64: 1, 512>}, {pipeline_mode = #tpu.pipeline_mode<synchronous>, transform_indices = @transform_5, window_bounds = array<i64: 512, 128>}, {pipeline_mode = #tpu.pipeline_mode<synchronous>, transform_indices = @transform_6, window_bounds = array<i64: 1, 128>}, {transform_indices = @transform_7, window_bounds = array<i64: 256, 128>}]} {
    %c0 = arith.constant 0 : index
    %c0_0 = arith.constant 0 : index
    %0 = vector.load %arg1[%c0, %c0_0] : memref<256x256xf32, #tpu.memory_space<vmem>>, vector<256x256xf32>
    %1 = arith.truncf %0 : vector<256x256xf32> to vector<256x256xbf16>
    %c0_1 = arith.constant 0 : index
    %c0_2 = arith.constant 0 : index
    %2 = vector.load %arg2[%c0_1, %c0_2] : memref<256x512xbf16, #tpu.memory_space<vmem>>, vector<256x512xbf16>
    %cst = arith.constant dense<0.000000e+00> : vector<256x512xf32>
    %3 = tpu.matmul %1, %2, %cst {dimension_numbers = #tpu.dot_dimension_numbers<[1], [0], [0], [1], [0, 0, 1, 1], [], []>} : vector<256x256xbf16>, vector<256x512xbf16>, vector<256x512xf32> -> vector<256x512xf32>
    %c0_3 = arith.constant 0 : index
    %c0_4 = arith.constant 0 : index
    %4 = vector.load %arg3[%c0_3, %c0_4] : memref<1x512xf32, #tpu.memory_space<vmem>>, vector<1x512xf32>
    %5 = vector.broadcast %4 : vector<1x512xf32> to vector<256x512xf32>
    %6 = arith.addf %3, %5 : vector<256x512xf32>
    %cst_5 = arith.constant 0.000000e+00 : f32
    %7 = vector.broadcast %cst_5 : f32 to vector<256x512xf32>
    %8 = arith.maximumf %6, %7 : vector<256x512xf32>
    %9 = arith.truncf %8 : vector<256x512xf32> to vector<256x512xbf16>
    %c0_6 = arith.constant 0 : index
    %c0_7 = arith.constant 0 : index
    %10 = vector.load %arg4[%c0_6, %c0_7] : memref<512x512xbf16, #tpu.memory_space<vmem>>, vector<512x512xbf16>
    %cst_8 = arith.constant dense<0.000000e+00> : vector<256x512xf32>
    %11 = tpu.matmul %9, %10, %cst_8 {dimension_numbers = #tpu.dot_dimension_numbers<[1], [0], [0], [1], [0, 0, 1, 1], [], []>} : vector<256x512xbf16>, vector<512x512xbf16>, vector<256x512xf32> -> vector<256x512xf32>
    %c0_9 = arith.constant 0 : index
    %c0_10 = arith.constant 0 : index
    %12 = vector.load %arg5[%c0_9, %c0_10] : memref<1x512xf32, #tpu.memory_space<vmem>>, vector<1x512xf32>
    %13 = vector.broadcast %12 : vector<1x512xf32> to vector<256x512xf32>
    %14 = arith.addf %11, %13 : vector<256x512xf32>
    %cst_11 = arith.constant 0.000000e+00 : f32
    %15 = vector.broadcast %cst_11 : f32 to vector<256x512xf32>
    %16 = arith.maximumf %14, %15 : vector<256x512xf32>
    %17 = arith.truncf %16 : vector<256x512xf32> to vector<256x512xbf16>
    %c0_12 = arith.constant 0 : index
    %c0_13 = arith.constant 0 : index
    %18 = vector.load %arg6[%c0_12, %c0_13] : memref<512x128xbf16, #tpu.memory_space<vmem>>, vector<512x128xbf16>
    %cst_14 = arith.constant dense<0.000000e+00> : vector<256x128xf32>
    %19 = tpu.matmul %17, %18, %cst_14 {dimension_numbers = #tpu.dot_dimension_numbers<[1], [0], [0], [1], [0, 0, 1, 1], [], []>} : vector<256x512xbf16>, vector<512x128xbf16>, vector<256x128xf32> -> vector<256x128xf32>
    %c0_15 = arith.constant 0 : index
    %c0_16 = arith.constant 0 : index
    %20 = vector.load %arg7[%c0_15, %c0_16] : memref<1x128xf32, #tpu.memory_space<vmem>>, vector<1x128xf32>
    %21 = vector.broadcast %20 : vector<1x128xf32> to vector<256x128xf32>
    %22 = arith.addf %19, %21 : vector<256x128xf32>
    %cst_17 = arith.constant 0.000000e+00 : f32
    %23 = vector.broadcast %cst_17 : f32 to vector<256x128xf32>
    %24 = arith.maximumf %22, %23 : vector<256x128xf32>
    %c0_18 = arith.constant 0 : index
    %c0_19 = arith.constant 0 : index
    %25 = vector.load %arg8[%c0_18, %c0_19] : memref<256x128xf32, #tpu.memory_space<vmem>>, vector<256x128xf32>
    tpu.vector_store %arg8[%c0_18, %c0_19], %24 {strides = array<i32>} : memref<256x128xf32, #tpu.memory_space<vmem>>, vector<256x128xf32>,
    return
  }
  func.func @transform_0(%arg0: i32) -> (i32, i32) {
    %c0_i32 = arith.constant 0 : i32
    %c0_i32_0 = arith.constant 0 : i32
    return %arg0, %c0_i32 : i32, i32
  }
  func.func @transform_1(%arg0: i32) -> (i32, i32) {
    %c0_i32 = arith.constant 0 : i32
    %c0_i32_0 = arith.constant 0 : i32
    %c0_i32_1 = arith.constant 0 : i32
    return %c0_i32, %c0_i32_0 : i32, i32
  }
  func.func @transform_2(%arg0: i32) -> (i32, i32) {
    %c0_i32 = arith.constant 0 : i32
    %c0_i32_0 = arith.constant 0 : i32
    %c0_i32_1 = arith.constant 0 : i32
    return %c0_i32, %c0_i32_0 : i32, i32
  }
  func.func @transform_3(%arg0: i32) -> (i32, i32) {
    %c0_i32 = arith.constant 0 : i32
    %c0_i32_0 = arith.constant 0 : i32
    %c0_i32_1 = arith.constant 0 : i32
    return %c0_i32, %c0_i32_0 : i32, i32
  }
  func.func @transform_4(%arg0: i32) -> (i32, i32) {
    %c0_i32 = arith.constant 0 : i32
    %c0_i32_0 = arith.constant 0 : i32
    %c0_i32_1 = arith.constant 0 : i32
    return %c0_i32, %c0_i32_0 : i32, i32
  }
  func.func @transform_5(%arg0: i32) -> (i32, i32) {
    %c0_i32 = arith.constant 0 : i32
    %c0_i32_0 = arith.constant 0 : i32
    %c0_i32_1 = arith.constant 0 : i32
    return %c0_i32, %c0_i32_0 : i32, i32
  }
  func.func @transform_6(%arg0: i32) -> (i32, i32) {
    %c0_i32 = arith.constant 0 : i32
    %c0_i32_0 = arith.constant 0 : i32
    %c0_i32_1 = arith.constant 0 : i32
    return %c0_i32, %c0_i32_0 : i32, i32
  }
  func.func @transform_7(%arg0: i32) -> (i32, i32) {
    %c0_i32 = arith.constant 0 : i32
    %c0_i32_0 = arith.constant 0 : i32
    return %arg0, %c0_i32 : i32, i32
  }
}

</mosaic_0001>

<bundles_post_ra>
// kernel: tpu_custom_call.1
= control target key start
LH: loop header
LB: loop body
LE: loop exit
PB: predicated region body
PF: predicated region fallthrough
CT: control target
= control target key end

     0   :  { %s6530_s0 = inlined_call_operand.hbm [shape: f32[512,256], index: 0, kind: input, shape index: {}]   ;;  %s6531_s1 = inlined_call_operand.hbm [shape: bf16[256,512], index: 1, kind: input, shape index: {}]   ;;  %s6532_s2 = inlined_call_operand.hbm [shape: f32[1,512], index: 2, kind: input, shape index: {}]   ;;  %s6533_s3 = inlined_call_operand.hbm [shape: bf16[512,512], index: 3, kind: input, shape index: {}]   ;;  %s6534_s4 = inlined_call_operand.vmem [shape: f32[1,512], index: 4, kind: input, shape index: {}]   ;;  %s6535_s5 = inlined_call_operand.hbm [shape: bf16[512,128], index: 5, kind: input, shape index: {}]   ;;  %s6536_s6 = inlined_call_operand.vmem [shape: f32[1,128], index: 6, kind: input, shape index: {}]   ;;  %s6537_s7 = inlined_call_operand.hbm [shape: f32[512,128], index: 7, kind: output, shape index: {}]  }
   0x1   :  { %6574 = sst [smem:[#allocation38_spill]] %s6531_s1 }
   0x2   :  { %12 = vsyncpa [#allocation3], 0 }
   0x3   :  { %14 = vsyncpa [#allocation3 + $0x1], 0 }
   0x4   :  { %15 = vsyncpa [#allocation6], 0 }
   0x5   :  { %16 = vsyncpa [#allocation9], 0 }
   0x6   :  { %17 = vsyncpa [#allocation4], 0 }
   0x7   :  { %19 = vsyncpa [#allocation4 + $0x1], 0  ;;  %s5111_s24 = smov 0   ;;  %s5113_s25 = smov 0  }
   0x8   :  { %s5115_s26 = smov 0   ;;  %s5117_s27 = smov 0  }
   0x9 LB: > { %s5132_s28 = sadd.s32 4294967295, %s5057_s27   ;;  %s3965_s29 = sadd.s32 4294967294, %s5057_s27   ;;  %s5057_s27 = sphi %s5117_s27, %s6672_s27   ;;  %s5053_s26 = sphi %s5115_s26, %s6671_s26   ;;  %s5049_s25 = sphi %s5113_s25, %s6670_s25   ;;  %s5045_s24 = sphi %s5111_s24, %s6669_s24  }
   0xa   : > { %p45_p0 = scmp.ne.s32.totalorder %s5049_s25, %s5045_s24  ;;  %p6538_p1 = scmp.eq.s32.totalorder %s5132_s28, 0 }
   0xb   : > { %p201_p3 = scmp.eq.s32.totalorder %s3965_s29, 1  ;;  %p3966_p5 = scmp.ge.s32.totalorder %s5057_s27, 1 }
   0xc   : > { %p5141_p4 = por %p6538_p1, %p45_p0  ;;  %p208_p7 = scmp.lt.s32.totalorder %s5057_s27, 3 }
   0xd   : > { %p5146_p6 = por %p201_p3, %p45_p0  ;;  %s5059_s10 = smov [#allocation5]  }
   0xe   : > { %s6575_s30 = scalar_select %p5141_p4, 1, 0 }
   0xf   : > { %s6576_s8 = scalar_select %p5146_p6, 1, 0 }
  0x10   : > { %p5151_p8 = pnand %p3966_p5, %p208_p7  ;;  %s220_s11 = sshll.u32 %s5059_s10, 4  ;;  %s221_s11 = int_to_ptr.vmem [resolvable:$true] %s220_s11 }
  0x11   : > { %s5060_s13 = smov [#allocation8]   ;;  %s5061_s15 = smov [#allocation7]  }
  0x12   : > { %s6577_s9 = scalar_select %p5151_p8, 1, 0 }
  0x13   : > { %p4460_p9 = pneg %p5151_p8  ;;  %s244_s14 = sshll.u32 %s5060_s13, 4  ;;  %s245_s14 = int_to_ptr.vmem [resolvable:$true] %s244_s14 }
  0x14   : > { %s234_s16 = sshll.u32 %s5061_s15, 4  ;;  %s4864_s17 = scalar_lea.vmem %s221_s11, 8192  ;;  %s235_s16 = int_to_ptr.vmem [resolvable:$true] %s234_s16 }
  0x15   : > { %p5160_p11 = pnand %p4460_p9, %p6538_p1  ;;  %p4865_p13 = scmp.ne.s32.totalorder %s221_s11, %s4864_s17 }
  0x16   : > { %p4872_p5 = scmp.lt.s32.totalorder %s221_s11, %s221_s11  ;;  %p4873_p7 = scmp.lt.s32.totalorder %s4864_s17, %s4864_s17 }
  0x17   : > { %p4855_p12 = pneg %p5160_p11 }
  0x18   : > { %p4874_p9 = por %p4873_p7, %p4872_p5 }
  0x19   : > { %p4867_p0 = pnand %p4865_p13, %p4855_p12 }
  0x1b   : > { %p4868_p3 = pneg %p4867_p0 }
  0x1d   : > { %p4875_p10 = pnand %p4874_p9, %p4868_p3 }
  0x1f   : > { %4878 = shalt.err (!%p4875_p10)
}
  0x20   : > { %s6539_s18 = smov 256   ;;  %s6540_s19 = smov 16  }
  0x21   : > { %s6579_s1 = sld [smem:[#allocation38_spill]]  ;;  %s4890_s22 = scalar_lea.vmem %s245_s14, 16384 }
  0x22   : > { %p4891_p13 = scmp.ne.s32.totalorder %s245_s14, %s4890_s22  ;;  %p4898_p3 = scmp.lt.s32.totalorder %s245_s14, %s245_s14 }
  0x23   : > { %p4899_p10 = scmp.lt.s32.totalorder %s4890_s22, %s4890_s22 }
  0x24   : > { %p4893_p0 = pnand %p4891_p13, %p4855_p12 }
  0x25   : > { %p4900_p7 = por %p4899_p10, %p4898_p3 }
  0x26   : > { %p4894_p5 = pneg %p4893_p0 }
  0x27   : > { %4463 = dma.hbm_to_vmem [thread:$0]  (!%p5160_p11), %s6579_s1, 8192, %s221_s11, [#allocation6], %s6539_s18, %s6539_s18, %s6540_s19  }
  0x28   : > { %p4901_p9 = pnand %p4900_p7, %p4894_p5 }
  0x2a   : > { %4904 = shalt.err (!%p4901_p9)
}
  0x2b   : > { %4469 = dma.hbm_to_vmem [thread:$0]  (!%p5160_p11), %s6533_s3, 16384, %s245_s14, [#allocation9], %s6539_s18, %s6539_s18, %s6540_s19  }
  0x2c   : > { %s4916_s10 = scalar_lea.vmem %s235_s16, 64  ;;  %p4924_p3 = scmp.lt.s32.totalorder %s235_s16, %s235_s16 }
  0x2d   : > { %p4917_p1 = scmp.ne.s32.totalorder %s235_s16, %s4916_s10  ;;  %p4925_p5 = scmp.lt.s32.totalorder %s4916_s10, %s4916_s10 }
  0x2f   : > { %p4919_p13 = pnand %p4917_p1, %p4855_p12  ;;  %p4926_p10 = por %p4925_p5, %p4924_p3 }
  0x31   : > { %p4920_p0 = pneg %p4919_p13 }
  0x33   : > { %p4927_p7 = pnand %p4926_p10, %p4920_p0 }
  0x35   : > { %4930 = shalt.err (!%p4927_p7)
}
  0x36   : > { %4466 = dma.hbm_to_vmem [thread:$0]  (!%p5160_p11), %s6532_s2, 64, %s235_s16, [#allocation6]  }
  0x37   : > { %s5064_s14 = smov [#allocation10]  }
  0x38   : > { %s260_s15 = sshll.u32 %s5064_s14, 4  ;;  %s261_s15 = int_to_ptr.vmem [resolvable:$true] %s260_s15 }
  0x39   : > { %s4942_s17 = scalar_lea.vmem %s261_s15, 4096  ;;  %p4950_p2 = scmp.lt.s32.totalorder %s261_s15, %s261_s15 }
  0x3a   : > { %p4943_p9 = scmp.ne.s32.totalorder %s261_s15, %s4942_s17  ;;  %p4951_p3 = scmp.lt.s32.totalorder %s4942_s17, %s4942_s17 }
  0x3c   : > { %p4945_p1 = pnand %p4943_p9, %p4855_p12  ;;  %p4952_p0 = por %p4951_p3, %p4950_p2 }
  0x3e   : > { %p4946_p13 = pneg %p4945_p1 }
  0x40   : > { %p4953_p5 = pnand %p4952_p0, %p4946_p13 }
  0x42   : > { %4956 = shalt.err (!%p4953_p5)
}
  0x43   : > { %s5065_s20 = smov 64   ;;  %s5066_s16 = smov 4  }
  0x44   : > { %4472 = dma.hbm_to_vmem [thread:$0]  (!%p5160_p11), %s6535_s5, 4096, %s261_s15, [#allocation9], %s5065_s20, %s5065_s20, %s5066_s16  }
  0x45   : > { %s5205_s23 = sadd.s32 1, %s5057_s27   ;;  %s32_s10 = sadd.s32 1, %s5053_s26 }
  0x46   : > { %s29_s29 = ssub.s32 %s5057_s27, %s5205_s23  ;;  %p39_p12 = scmp.ne.s32.totalorder %s5053_s26, %s5049_s25 }
  0x47   : > { %p30_p2 = scmp.eq.s32.totalorder %s29_s29, 0  ;;  %p40_p10 = scmp.eq.s32.totalorder %s5057_s27, 0 }
  0x48   : > { %p6580_p9 = scmp.eq.s32.totalorder %s5132_s28, 1  ;;  %p4485_p13 = scmp.lt.s32.totalorder %s5057_s27, 2 }
  0x49   : > { %s5214_s11 = scalar_select %p30_p2, %s5053_s26, %s32_s10  }
  0x4a   : > { %p41_p7 = por %p40_p10, %p39_p12  ;;  %p5218_p1 = por %p6580_p9, %p39_p12 }
  0x4b   : > { %s277_s12 = sand.u32 1, %s5053_s26   ;;  %s4214_s15 = sshll.u32 %s5057_s27, 13 }
  0x4c   : > { %s6581_s13 = scalar_select %p5218_p1, 1, 0 }
  0x4d   : > { %s3972_s14 = sshll.u32 %s277_s12, 9  ;;  %s5228_s16 = scalar_lea.hbm %s6530_s0, %s4214_s15 }
  0x4e   : > { %s281_s21 = scalar_lea.vmem [#allocation2], %s3972_s14  ;;  %p5232_p11 = pnand %p4485_p13, %p41_p7 }
  0x4f   : > { %s289_s22 = sshll.u32 %s281_s21, 4  ;;  %s5236_s10 = scalar_lea.sflag [#allocation3], %s277_s12  ;;  %s5230_s22 = int_to_ptr.vmem [resolvable:$true] %s289_s22 }
  0x50   : > { %s4957_s18 = scalar_lea.hbm %s5228_s16, 8192  ;;  %p4959_p0 = pneg %p5232_p11 }
  0x51   : > { %p4958_p3 = scmp.ne.s32.totalorder %s5228_s16, %s4957_s18  ;;  %s4962_s14 = scalar_lea.hbm %s6530_s0, 16384 }
  0x52   : > { %p4963_p12 = scmp.lt.s32.totalorder %s5228_s16, %s6530_s0  ;;  %p4964_p10 = scmp.lt.s32.totalorder %s4962_s14, %s4957_s18 }
  0x53   : > { %p4960_p5 = pnand %p4959_p0, %p4958_p3 }
  0x54   : > { %p4965_p7 = por %p4964_p10, %p4963_p12 }
  0x55   : > { %p4961_p2 = pneg %p4960_p5 }
  0x57   : > { %p4966_p9 = pnand %p4965_p7, %p4961_p2 }
  0x59   : > { %4969 = shalt.err (!%p4966_p9)
}
  0x5a   : > { %s4970_s12 = scalar_lea.vmem %s5230_s22, 8192  ;;  %s5067_s19 = smov [#allocation2]  }
  0x5b   : > { %p4971_p13 = scmp.ne.s32.totalorder %s5230_s22, %s4970_s12  ;;  %s4975_s1 = sshll.u32 %s5067_s19, 4  ;;  %s4976_s1 = int_to_ptr.vmem [resolvable:$false] %s4975_s1 }
  0x5c   : > { %s4977_s15 = scalar_lea.vmem %s4976_s1, 16384  ;;  %p4978_p5 = scmp.lt.s32.totalorder %s5230_s22, %s4976_s1 }
  0x5d   : > { %p4973_p6 = pnand %p4971_p13, %p4959_p0  ;;  %p4979_p1 = scmp.lt.s32.totalorder %s4977_s15, %s4970_s12 }
  0x5f   : > { %p4974_p3 = pneg %p4973_p6  ;;  %p4980_p4 = por %p4979_p1, %p4978_p5 }
  0x61   : > { %p4981_p8 = pnand %p4980_p4, %p4974_p3 }
  0x63   : > { %4984 = shalt.err (!%p4981_p8)
}
  0x64   : > { %s6583_s18 = smov 16   ;;  %s6584_s17 = smov 256  }
  0x65   : > { %4476 = dma.hbm_to_vmem [thread:$0]  (!%p5232_p11), %s5228_s16, 8192, %s5230_s22, %s5236_s10, %s6584_s17, %s6584_s17, %s6583_s18  }
  0x66   : > { %p6585_p6 = scmp.ne.s32.totalorder %s6577_s9, 0 }
  0x68   : > { %301 = sbr.rel (%p6585_p6) target bundleno = 1066 (0x42a), region = 48 }
  0x6d   : > { %s5263_s19 = sand.u32 1, %s5049_s25   ;;  %p6586_p4 = scmp.ne.s32.totalorder %s6575_s30, 0 }
  0x6e   : > { %s3977_s1 = sshll.u32 %s5263_s19, 9  ;;  %s304_s14 = scalar_lea.sflag [#allocation3], %s5263_s19 }
  0x6f   : > { %s5267_s20 = scalar_lea.vmem [#allocation2], %s3977_s1 }
  0x70   : > { %5028 = dma.done.wait (%p6586_p4), %s304_s14, 8192  }
  0x71   : > { %5030 = vsyncadd (%p6586_p4), %s304_s14, 4294959104  ;;  %p6587_p8 = scmp.eq.s32.totalorder %s5132_s28, 0 }
  0x73   : > { %5032 = dma.done.wait (%p6587_p8), [#allocation6], 8256   ;;  %p6588_p1 = pmov %p6587_p8 }
  0x75   : > { %5034 = vsyncadd (%p6588_p1), [#allocation6], 4294959040  ;;  %p6589_p11 = pmov %p6588_p1 }
  0x76   : > { %p6590_p0 = pmov %p6588_p1 }
  0x77   : > { %5036 = dma.done.wait (%p6589_p11), [#allocation9], 20480  }
  0x78   : > { %5038 = vsyncadd (%p6590_p0), [#allocation9], 4294946816  ;;  %v4533_v0 = vld [vmem:[#allocation5 + $0xe4] ss:$16 sps:$4 sm:$0xff]   ;;  %v4535_v1 = vld [vmem:[#allocation5 + $0xec] ss:$16 sps:$4 sm:$0xff]  }
  0x79   : > { %859 = vmatprep.subr.bf16.mxu0 %v4533_v0  ;;  %v4537_v2 = vld [vmem:[#allocation5 + $0xe0] ss:$16 sps:$4 sm:$0xff]   ;;  %v4538_v3 = vld [vmem:[#allocation5 + $0xe8] ss:$16 sps:$4 sm:$0xff]   ;;  %1052 = vmatprep.subr.bf16.mxu1 %v4535_v1  ;;  %v4539_v4 = vld [vmem:[#allocation5 + $0xc4] ss:$16 sps:$4 sm:$0xff]  }
  0x7a   : > { %860 = vmatpush1.bf16.msra.mxu0 %v4537_v2  ;;  %1053 = vmatpush1.bf16.msra.mxu1 %v4538_v3  ;;  %v4541_v5 = vld [vmem:[#allocation5 + $0xcc] ss:$16 sps:$4 sm:$0xff]   ;;  %v4543_v6 = vld [vmem:[#allocation5 + $0xc0] ss:$16 sps:$4 sm:$0xff]   ;;  %v4544_v7 = vld [vmem:[#allocation5 + $0xc8] ss:$16 sps:$4 sm:$0xff]  }
  0x7b   : > { %861 = vmatprep.subr.bf16.mxu0 %v4539_v4  ;;  %1054 = vmatprep.subr.bf16.mxu1 %v4541_v5  ;;  %v4545_v8 = vld [vmem:[#allocation5 + $0xa4] ss:$16 sps:$4 sm:$0xff]   ;;  %v4547_v9 = vld [vmem:[#allocation5 + $0xac] ss:$16 sps:$4 sm:$0xff]   ;;  %v4549_v10 = vld [vmem:[#allocation5 + $0xa0] ss:$16 sps:$4 sm:$0xff]  }
  0x7c   : > { %v4550_v11 = vld [vmem:[#allocation5 + $0xa8] ss:$16 sps:$4 sm:$0xff]   ;;  %v4551_v12 = vld [vmem:[#allocation5 + $0x84] ss:$16 sps:$4 sm:$0xff]   ;;  %v4553_v13 = vld [vmem:[#allocation5 + $0x8c] ss:$16 sps:$4 sm:$0xff]  }
  0x7d   : > { %v4555_v14 = vld [vmem:[#allocation5 + $0x80] ss:$16 sps:$4 sm:$0xff]   ;;  %v4556_v15 = vld [vmem:[#allocation5 + $0x88] ss:$16 sps:$4 sm:$0xff]   ;;  %v4557_v16 = vld [vmem:[#allocation5 + $0x64] ss:$16 sps:$4 sm:$0xff]  }
  0x7e   : > { %862 = vmatpush1.bf16.msra.mxu0 %v4543_v6  ;;  %1055 = vmatpush1.bf16.msra.mxu1 %v4544_v7  ;;  %v4559_v17 = vld [vmem:[#allocation5 + $0x6c] ss:$16 sps:$4 sm:$0xff]   ;;  %v4561_v18 = vld [vmem:[#allocation5 + $0x60] ss:$16 sps:$4 sm:$0xff]   ;;  %v4562_v19 = vld [vmem:[#allocation5 + $0x68] ss:$16 sps:$4 sm:$0xff]  }
  0x7f   : > { %863 = vmatprep.subr.bf16.mxu0 %v4545_v8  ;;  %1056 = vmatprep.subr.bf16.mxu1 %v4547_v9  ;;  %v4563_v20 = vld [vmem:[#allocation5 + $0x44] ss:$16 sps:$4 sm:$0xff]   ;;  %v4565_v21 = vld [vmem:[#allocation5 + $0x4c] ss:$16 sps:$4 sm:$0xff]   ;;  %v4567_v22 = vld [vmem:[#allocation5 + $0x40] ss:$16 sps:$4 sm:$0xff]  }
  0x80   : > { %v4568_v23 = vld [vmem:[#allocation5 + $0x48] ss:$16 sps:$4 sm:$0xff]   ;;  %v4569_v24 = vld [vmem:[#allocation5 + $0x24] ss:$16 sps:$4 sm:$0xff]   ;;  %v4571_v25 = vld [vmem:[#allocation5 + $0x2c] ss:$16 sps:$4 sm:$0xff]  }
  0x81   : > { %v4573_v26 = vld [vmem:[#allocation5 + $0x20] ss:$16 sps:$4 sm:$0xff]   ;;  %v4574_v27 = vld [vmem:[#allocation5 + $0x28] ss:$16 sps:$4 sm:$0xff]   ;;  %v4575_v28 = vld [vmem:[#allocation5 + $0x4] ss:$16 sps:$4 sm:$0xff]  }
  0x82   : > { %864 = vmatpush1.bf16.msra.mxu0 %v4549_v10  ;;  %1057 = vmatpush1.bf16.msra.mxu1 %v4550_v11  ;;  %v4577_v29 = vld [vmem:[#allocation5 + $0xc] ss:$16 sps:$4 sm:$0xff]   ;;  %v4579_v30 = vld [vmem:[#allocation5] ss:$16 sps:$4 sm:$0xff]   ;;  %v4580_v31 = vld [vmem:[#allocation5 + $0x8] ss:$16 sps:$4 sm:$0xff]  }
  0x83   : > { %865 = vmatprep.subr.bf16.mxu0 %v4551_v12  ;;  %1058 = vmatprep.subr.bf16.mxu1 %v4553_v13  ;;  %v4581_v32 = vld [vmem:[#allocation5 + $0x1e4] ss:$16 sps:$4 sm:$0xff]   ;;  %v4583_v33 = vld [vmem:[#allocation5 + $0x1ec] ss:$16 sps:$4 sm:$0xff]   ;;  %v4585_v34 = vld [vmem:[#allocation5 + $0x1e0] ss:$16 sps:$4 sm:$0xff]  }
  0x84   : > { %v4586_v35 = vld [vmem:[#allocation5 + $0x1e8] ss:$16 sps:$4 sm:$0xff]   ;;  %v4587_v36 = vld [vmem:[#allocation5 + $0x1c4] ss:$16 sps:$4 sm:$0xff]   ;;  %v4589_v37 = vld [vmem:[#allocation5 + $0x1cc] ss:$16 sps:$4 sm:$0xff]  }
  0x85   : > { %v4591_v38 = vld [vmem:[#allocation5 + $0x1c0] ss:$16 sps:$4 sm:$0xff]   ;;  %v4592_v39 = vld [vmem:[#allocation5 + $0x1c8] ss:$16 sps:$4 sm:$0xff]   ;;  %v4593_v40 = vld [vmem:[#allocation5 + $0x1a4] ss:$16 sps:$4 sm:$0xff]  }
  0x86   : > { %866 = vmatpush1.bf16.msra.mxu0 %v4555_v14  ;;  %1059 = vmatpush1.bf16.msra.mxu1 %v4556_v15  ;;  %v4595_v41 = vld [vmem:[#allocation5 + $0x1ac] ss:$16 sps:$4 sm:$0xff]   ;;  %v4597_v42 = vld [vmem:[#allocation5 + $0x1a0] ss:$16 sps:$4 sm:$0xff]   ;;  %v4598_v43 = vld [vmem:[#allocation5 + $0x1a8] ss:$16 sps:$4 sm:$0xff]  }
  0x87   : > { %867 = vmatprep.subr.bf16.mxu0 %v4557_v16  ;;  %1060 = vmatprep.subr.bf16.mxu1 %v4559_v17  ;;  %v4599_v44 = vld [vmem:[#allocation5 + $0x184] ss:$16 sps:$4 sm:$0xff]   ;;  %v4601_v45 = vld [vmem:[#allocation5 + $0x18c] ss:$16 sps:$4 sm:$0xff]   ;;  %v4603_v48 = vld [vmem:[#allocation5 + $0x180] ss:$16 sps:$4 sm:$0xff]  }
  0x88   : > { %v358_v46 = vld [vmem:[%s5267_s20 + $0x8] sm:$0xff]  ;;  %v360_v47 = vld [vmem:[%s5267_s20 + $0x18] sm:$0xff]  ;;  %v4605_v51 = vld [vmem:[#allocation5 + $0x164] ss:$16 sps:$4 sm:$0xff]   ;;  %s3982_s29 = sshll.u32 %s5263_s19, 8  ;;  %s4215_s21 = sshll.u32 %s5132_s28, 12 }
  0x89   : > { %v4604_v49 = vld [vmem:[#allocation5 + $0x188] ss:$16 sps:$4 sm:$0xff]   ;;  %v422_v50 = vpack.c.bf16 %v360_v47, %v358_v46  ;;  %v4607_v52 = vld [vmem:[#allocation5 + $0x16c] ss:$16 sps:$4 sm:$0xff]   ;;  %v4609_v53 = vld [vmem:[#allocation5 + $0x160] ss:$16 sps:$4 sm:$0xff]   ;;  %s6484_s17 = scalar_lea.hbm %s6537_s7, %s4215_s21 }
  0x8a   : > { %868 = vmatpush1.bf16.msra.mxu0 %v4561_v18  ;;  %1061 = vmatpush1.bf16.msra.mxu1 %v4562_v19  ;;  %v4610_v54 = vld [vmem:[#allocation5 + $0x168] ss:$16 sps:$4 sm:$0xff]   ;;  %v4611_v55 = vld [vmem:[#allocation5 + $0x144] ss:$16 sps:$4 sm:$0xff]   ;;  %v4613_v56 = vld [vmem:[#allocation5 + $0x14c] ss:$16 sps:$4 sm:$0xff]  }
  0x8b   : > { %869 = vmatprep.subr.bf16.mxu0 %v4563_v20  ;;  %1062 = vmatprep.subr.bf16.mxu1 %v4565_v21  ;;  %v4615_v57 = vld [vmem:[#allocation5 + $0x140] ss:$16 sps:$4 sm:$0xff]   ;;  %v4616_v58 = vld [vmem:[#allocation5 + $0x148] ss:$16 sps:$4 sm:$0xff]   ;;  %v4617_v59 = vld [vmem:[#allocation5 + $0x124] ss:$16 sps:$4 sm:$0xff]  }
  0x8c   : > { %891 = vmatprep.mubr.bf16.mxu0 %v422_v50  ;;  %1084 = vmatprep.mubr.bf16.mxu1 %v422_v50  ;;  %v4619_v60 = vld [vmem:[#allocation5 + $0x12c] ss:$16 sps:$4 sm:$0xff]   ;;  %v4621_v61 = vld [vmem:[#allocation5 + $0x120] ss:$16 sps:$4 sm:$0xff]   ;;  %v4622_v62 = vld [vmem:[#allocation5 + $0x128] ss:$16 sps:$4 sm:$0xff]  }
  0x8d   : > { %v4623_v63 = vld [vmem:[#allocation5 + $0x104] ss:$16 sps:$4 sm:$0xff]   ;;  %v4625_v0 = vld [vmem:[#allocation5 + $0x10c] ss:$16 sps:$4 sm:$0xff]   ;;  %v4627_v1 = vld [vmem:[#allocation5 + $0x100] ss:$16 sps:$4 sm:$0xff]  }
  0x8e   : > { %870 = vmatpush1.bf16.msra.mxu0 %v4567_v22  ;;  %1063 = vmatpush1.bf16.msra.mxu1 %v4568_v23  ;;  %v4628_v2 = vld [vmem:[#allocation5 + $0x108] ss:$16 sps:$4 sm:$0xff]   ;;  %v357_v3 = vld [vmem:[%s5267_s20] sm:$0xff]  ;;  %v359_v4 = vld [vmem:[%s5267_s20 + $0x10] sm:$0xff]  ;;  %s6345_s10 = scalar_lea.vmem [#allocation11], %s3982_s29  ;;  %s3841_s1 = scalar_lea.sflag [#allocation4], %s5263_s19 }
  0x8f   : > { %871 = vmatprep.subr.bf16.mxu0 %v4569_v24  ;;  %1064 = vmatprep.subr.bf16.mxu1 %v4571_v25  ;;  %v362_v5 = vld [vmem:[%s5267_s20 + $0x28] sm:$0xff]  ;;  %v364_v6 = vld [vmem:[%s5267_s20 + $0x38] sm:$0xff]  ;;  %v421_v9 = vpack.c.bf16 %v359_v4, %v357_v3  ;;  %v4629_v11 = vld [vmem:[#allocation8 + $0xe0] ss:$16 sps:$4 sm:$0xff]   ;;  %s3854_s12 = sshll.u32 %s6345_s10, 4  ;;  %p6666_p12 = scmp.ne.s32.totalorder %s6581_s13, 0  ;;  %s6486_s12 = int_to_ptr.vmem [resolvable:$true] %s3854_s12 }
  0x90   : > { %v4631_v7 = vld [vmem:[#allocation8 + $0xe4] ss:$16 sps:$4 sm:$0xff]   ;;  %v424_v10 = vpack.c.bf16 %v364_v6, %v362_v5  ;;  %v4632_v12 = vld [vmem:[#allocation8 + $0x2e0] ss:$16 sps:$4 sm:$0xff]   ;;  %s4985_s14 = scalar_lea.vmem %s6486_s12, 4096  ;;  %s5068_s28 = smov [#allocation11]  }
  0x91   : > { %v4634_v8 = vld [vmem:[#allocation8 + $0x2e4] ss:$16 sps:$4 sm:$0xff]   ;;  %v361_v15 = vld [vmem:[%s5267_s20 + $0x20] sm:$0xff]  ;;  %v363_v16 = vld [vmem:[%s5267_s20 + $0x30] sm:$0xff]  ;;  %p4986_p2 = scmp.ne.s32.totalorder %s6486_s12, %s4985_s14 }
  0x92   : > { %872 = vmatpush1.bf16.msra.mxu0 %v4573_v26  ;;  %1065 = vmatpush1.bf16.msra.mxu1 %v4574_v27  ;;  %v4637_v13 = vld [vmem:[#allocation8 + $0xc4] ss:$16 sps:$4 sm:$0xff]   ;;  %v4635_v19 = vld [vmem:[#allocation8 + $0xc0] ss:$16 sps:$4 sm:$0xff]   ;;  %v423_v23 = vpack.c.bf16 %v363_v16, %v361_v15 }
  0x93   : > { %873 = vmatprep.subr.bf16.mxu0 %v4575_v28  ;;  %1066 = vmatprep.subr.bf16.mxu1 %v4577_v29  ;;  %v4640_v14 = vld [vmem:[#allocation8 + $0x2c4] ss:$16 sps:$4 sm:$0xff]   ;;  %v4638_v20 = vld [vmem:[#allocation8 + $0x2c0] ss:$16 sps:$4 sm:$0xff]   ;;  %p4987_p10 = pnand %p4986_p2, %p6666_p12 }
  0x94   : > { %v366_v17 = vld [vmem:[%s5267_s20 + $0x48] sm:$0xff]  ;;  %v368_v18 = vld [vmem:[%s5267_s20 + $0x58] sm:$0xff]  ;;  %v4641_v25 = vld [vmem:[#allocation8 + $0xa0] ss:$16 sps:$4 sm:$0xff]  }
  0x95   : > { %v4643_v21 = vld [vmem:[#allocation8 + $0xa4] ss:$16 sps:$4 sm:$0xff]   ;;  %v426_v24 = vpack.c.bf16 %v368_v18, %v366_v17  ;;  %v4644_v26 = vld [vmem:[#allocation8 + $0x2a0] ss:$16 sps:$4 sm:$0xff]   ;;  %p4988_p7 = pneg %p4987_p10 }
  0x96   : > { %874 = vmatpush1.bf16.msra.mxu0 %v4579_v30  ;;  %1067 = vmatpush1.bf16.msra.mxu1 %v4580_v31  ;;  %v4646_v22 = vld [vmem:[#allocation8 + $0x2a4] ss:$16 sps:$4 sm:$0xff]   ;;  %v365_v29 = vld [vmem:[%s5267_s20 + $0x40] sm:$0xff]  ;;  %v367_v30 = vld [vmem:[%s5267_s20 + $0x50] sm:$0xff] }
  0x97   : > { %875 = vmatprep.subr.bf16.mxu0 %v4581_v32  ;;  %1068 = vmatprep.subr.bf16.mxu1 %v4583_v33  ;;  %v4649_v27 = vld [vmem:[#allocation8 + $0x84] ss:$16 sps:$4 sm:$0xff]   ;;  %v4647_v33 = vld [vmem:[#allocation8 + $0x80] ss:$16 sps:$4 sm:$0xff]  }
  0x98   : > { %v4652_v28 = vld [vmem:[#allocation8 + $0x284] ss:$16 sps:$4 sm:$0xff]   ;;  %v4659_v47 = vld [vmem:[#allocation8 + $0x40] ss:$16 sps:$4 sm:$0xff]  }
  0x99   : > { %v370_v31 = vld [vmem:[%s5267_s20 + $0x68] sm:$0xff]  ;;  %v372_v32 = vld [vmem:[%s5267_s20 + $0x78] sm:$0xff]  ;;  %v4677_v3 = vld [vmem:[#allocation8 + $0x1e0] ss:$16 sps:$4 sm:$0xff]  }
  0x9a   : > { %876 = vmatpush2.bf16.msra.mxu0 %v4585_v34  ;;  %1069 = vmatpush2.bf16.msra.mxu1 %v4586_v35  ;;  %v4650_v34 = vld [vmem:[#allocation8 + $0x280] ss:$16 sps:$4 sm:$0xff]   ;;  %v4655_v35 = vld [vmem:[#allocation8 + $0x64] ss:$16 sps:$4 sm:$0xff]  }
  0x9b   : > { %877 = vmatprep.subr.bf16.mxu0 %v4587_v36  ;;  %1070 = vmatprep.subr.bf16.mxu1 %v4589_v37  ;;  %v4658_v36 = vld [vmem:[#allocation8 + $0x264] ss:$16 sps:$4 sm:$0xff]   ;;  %v425_v37 = vpack.c.bf16 %v367_v30, %v365_v29  ;;  %v4680_v4 = vld [vmem:[#allocation8 + $0x3e0] ss:$16 sps:$4 sm:$0xff]  }
  0x9c   : > { %v376_v46 = vld [vmem:[%s5267_s20 + $0x98] sm:$0xff]  ;;  %v377_v5 = vld [vmem:[%s5267_s20 + $0xa0] sm:$0xff]  ;;  %v379_v6 = vld [vmem:[%s5267_s20 + $0xb0] sm:$0xff] }
  0x9d   : > { %v4670_v50 = vld [vmem:[#allocation8 + $0x224] ss:$16 sps:$4 sm:$0xff]   ;;  %v431_v15 = vpack.c.bf16 %v379_v6, %v377_v5  ;;  %v4689_v16 = vld [vmem:[#allocation8 + $0x1a0] ss:$16 sps:$4 sm:$0xff]  }
  0x9e   : > { %878 = vmatpush2.bf16.msra.mxu0 %v4591_v38  ;;  %1071 = vmatpush2.bf16.msra.mxu1 %v4592_v39  ;;  %v428_v38 = vpack.c.bf16 %v372_v32, %v370_v31  ;;  %v4653_v39 = vld [vmem:[#allocation8 + $0x60] ss:$16 sps:$4 sm:$0xff]  }
  0x9f   : > { %879 = vmatprep.subr.bf16.mxu0 %v4593_v40  ;;  %1072 = vmatprep.subr.bf16.mxu1 %v4595_v41  ;;  %v4656_v40 = vld [vmem:[#allocation8 + $0x260] ss:$16 sps:$4 sm:$0xff]  }
  0xa0   : > { %v369_v41 = vld [vmem:[%s5267_s20 + $0x60] sm:$0xff]  ;;  %v403_v6 = vld [vmem:[%s5267_s20 + $0x170] sm:$0xff] }
  0xa1   : > { %v4692_v17 = vld [vmem:[#allocation8 + $0x3a0] ss:$16 sps:$4 sm:$0xff]  }
  0xa2   : > { %880 = vmatpush2.bf16.msra.mxu0 %v4597_v42  ;;  %1073 = vmatpush2.bf16.msra.mxu1 %v4598_v43  ;;  %v371_v42 = vld [vmem:[%s5267_s20 + $0x70] sm:$0xff]  ;;  %v4661_v43 = vld [vmem:[#allocation8 + $0x44] ss:$16 sps:$4 sm:$0xff]   ;;  %v401_v5 = vld [vmem:[%s5267_s20 + $0x160] sm:$0xff] }
  0xa3   : > { %881 = vmatprep.subr.bf16.mxu0 %v4599_v44  ;;  %1074 = vmatprep.subr.bf16.mxu1 %v4601_v45  ;;  %v4664_v44 = vld [vmem:[#allocation8 + $0x244] ss:$16 sps:$4 sm:$0xff]   ;;  %v4701_v30 = vld [vmem:[#allocation8 + $0x160] ss:$16 sps:$4 sm:$0xff]  }
  0xa4   : > { %v374_v45 = vld [vmem:[%s5267_s20 + $0x88] sm:$0xff]  ;;  %v4704_v31 = vld [vmem:[#allocation8 + $0x360] ss:$16 sps:$4 sm:$0xff]  }
  0xa6   : > { %882 = vmatpush2.bf16.msra.mxu0 %v4603_v48  ;;  %1075 = vmatpush2.bf16.msra.mxu1 %v4604_v49  ;;  %v4662_v48 = vld [vmem:[#allocation8 + $0x240] ss:$16 sps:$4 sm:$0xff]   ;;  %v4667_v49 = vld [vmem:[#allocation8 + $0x24] ss:$16 sps:$4 sm:$0xff]  }
  0xa7   : > { %883 = vmatprep.subr.bf16.mxu0 %v4605_v51  ;;  %1076 = vmatprep.subr.bf16.mxu1 %v4607_v52  ;;  %v427_v51 = vpack.c.bf16 %v371_v42, %v369_v41  ;;  %v430_v52 = vpack.c.bf16 %v376_v46, %v374_v45  ;;  %v4715_v41 = vld [vmem:[#allocation8 + $0x124] ss:$16 sps:$4 sm:$0xff]   ;;  %v4716_v45 = vld [vmem:[#allocation8 + $0x320] ss:$16 sps:$4 sm:$0xff]  }
  0xa8   : > { %v4718_v42 = vld [vmem:[#allocation8 + $0x324] ss:$16 sps:$4 sm:$0xff]  }
  0xaa   : > { %884 = vmatpush2.bf16.msra.mxu0 %v4609_v53  ;;  %1077 = vmatpush2.bf16.msra.mxu1 %v4610_v54  ;;  %v4665_v53 = vld [vmem:[#allocation8 + $0x20] ss:$16 sps:$4 sm:$0xff]  }
  0xab   : > { %885 = vmatprep.subr.bf16.mxu0 %v4611_v55  ;;  %1078 = vmatprep.subr.bf16.mxu1 %v4613_v56  ;;  %v4668_v54 = vld [vmem:[#allocation8 + $0x220] ss:$16 sps:$4 sm:$0xff]  }
  0xac   : > { %v373_v55 = vld [vmem:[%s5267_s20 + $0x80] sm:$0xff]  ;;  %v375_v56 = vld [vmem:[%s5267_s20 + $0x90] sm:$0xff] }
  0xae   : > { %886 = vmatpush2.bf16.msra.mxu0 %v4615_v57  ;;  %1079 = vmatpush2.bf16.msra.mxu1 %v4616_v58  ;;  %v4673_v57 = vld [vmem:[#allocation8 + $0x4] ss:$16 sps:$4 sm:$0xff]  }
  0xaf   : > { %887 = vmatprep.subr.bf16.mxu0 %v4617_v59  ;;  %1080 = vmatprep.subr.bf16.mxu1 %v4619_v60  ;;  %v4676_v58 = vld [vmem:[#allocation8 + $0x204] ss:$16 sps:$4 sm:$0xff]  }
  0xb0   : > { %v378_v59 = vld [vmem:[%s5267_s20 + $0xa8] sm:$0xff]  ;;  %v380_v60 = vld [vmem:[%s5267_s20 + $0xb8] sm:$0xff] }
  0xb2   : > { %888 = vmatpush2.bf16.msra.mxu0 %v4621_v61  ;;  %1081 = vmatpush2.bf16.msra.mxu1 %v4622_v62  ;;  %v4671_v61 = vld [vmem:[#allocation8] ss:$16 sps:$4 sm:$0xff]  }
  0xb3   : > { %889 = vmatprep.subr.bf16.mxu0 %v4623_v63  ;;  %1082 = vmatprep.subr.bf16.mxu1 %v4625_v0  ;;  %v4674_v62 = vld [vmem:[#allocation8 + $0x200] ss:$16 sps:$4 sm:$0xff]   ;;  %v4679_v63 = vld [vmem:[#allocation8 + $0x1e4] ss:$16 sps:$4 sm:$0xff]  }
  0xb4   : > { %v4682_v0 = vld [vmem:[#allocation8 + $0x3e4] ss:$16 sps:$4 sm:$0xff]  }
  0xb6   : > { %890 = vmatpush2.bf16.msra.mxu0 %v4627_v1  ;;  %1083 = vmatpush2.bf16.msra.mxu1 %v4628_v2  ;;  %v429_v1 = vpack.c.bf16 %v375_v56, %v373_v55  ;;  %v432_v2 = vpack.c.bf16 %v380_v60, %v378_v59  ;;  %v398_v55 = vld [vmem:[%s5267_s20 + $0x148] sm:$0xff]  ;;  %v400_v56 = vld [vmem:[%s5267_s20 + $0x158] sm:$0xff]  ;;  %v397_v59 = vld [vmem:[%s5267_s20 + $0x140] sm:$0xff] }
  0xb7   : > { %2227 = vmatprep.subr.bf16.mxu0 %v4631_v7  ;;  %2420 = vmatprep.subr.bf16.mxu1 %v4634_v8  ;;  %v4685_v7 = vld [vmem:[#allocation8 + $0x1c4] ss:$16 sps:$4 sm:$0xff]   ;;  %v399_v60 = vld [vmem:[%s5267_s20 + $0x150] sm:$0xff] }
  0xb8   : > { %v4688_v8 = vld [vmem:[#allocation8 + $0x3c4] ss:$16 sps:$4 sm:$0xff]  }
  0xb9   : > { %892 = vmatmul.mubr.bf16.vlgmr.msra.gmra.mxu0 %v421_v9  ;;  %1085 = vmatmul.mubr.bf16.vlgmr.msra.gmra.mxu1 %v421_v9  ;;  %v382_v9 = vld [vmem:[%s5267_s20 + $0xc8] sm:$0xff] }
  0xba   : > { %901 = vmatprep.mubr.bf16.mxu0 %v424_v10  ;;  %1094 = vmatprep.mubr.bf16.mxu1 %v424_v10  ;;  %v384_v10 = vld [vmem:[%s5267_s20 + $0xd8] sm:$0xff] }
  0xbb   : > { %2228 = vmatpush1.bf16.msra.mxu0 %v4629_v11  ;;  %2421 = vmatpush1.bf16.msra.mxu1 %v4632_v12  ;;  %v4683_v11 = vld [vmem:[#allocation8 + $0x1c0] ss:$16 sps:$4 sm:$0xff]   ;;  %v434_v18 = vpack.c.bf16 %v384_v10, %v382_v9  ;;  %v4727_v9 = vld [vmem:[#allocation8 + $0xec] ss:$16 sps:$4 sm:$0xff]  }
  0xbc   : > { %2229 = vmatprep.subr.bf16.mxu0 %v4637_v13  ;;  %2422 = vmatprep.subr.bf16.mxu1 %v4640_v14  ;;  %v4686_v12 = vld [vmem:[#allocation8 + $0x3c0] ss:$16 sps:$4 sm:$0xff]   ;;  %v4691_v13 = vld [vmem:[#allocation8 + $0x1a4] ss:$16 sps:$4 sm:$0xff]   ;;  %v4730_v10 = vld [vmem:[#allocation8 + $0x2ec] ss:$16 sps:$4 sm:$0xff]  }
  0xbd   : > { %v4694_v14 = vld [vmem:[#allocation8 + $0x3a4] ss:$16 sps:$4 sm:$0xff]  }
  0xbf   : > { %2230 = vmatpush1.bf16.msra.mxu0 %v4635_v19  ;;  %2423 = vmatpush1.bf16.msra.mxu1 %v4638_v20  ;;  %v4697_v19 = vld [vmem:[#allocation8 + $0x184] ss:$16 sps:$4 sm:$0xff]  }
  0xc0   : > { %2231 = vmatprep.subr.bf16.mxu0 %v4643_v21  ;;  %2424 = vmatprep.subr.bf16.mxu1 %v4646_v22  ;;  %v4700_v20 = vld [vmem:[#allocation8 + $0x384] ss:$16 sps:$4 sm:$0xff]   ;;  %v381_v21 = vld [vmem:[%s5267_s20 + $0xc0] sm:$0xff]  ;;  %v383_v22 = vld [vmem:[%s5267_s20 + $0xd0] sm:$0xff] }
  0xc1   : > { %902 = vmatmul.mubr.bf16.gmra.mxu0 %v423_v23  ;;  %1095 = vmatmul.mubr.bf16.gmra.mxu1 %v423_v23  ;;  %v386_v23 = vld [vmem:[%s5267_s20 + $0xe8] sm:$0xff]  ;;  %v433_v29 = vpack.c.bf16 %v383_v22, %v381_v21  ;;  %v416_v22 = vld [vmem:[%s5267_s20 + $0x1d8] sm:$0xff] }
  0xc2   : > { %911 = vmatprep.mubr.bf16.mxu0 %v426_v24  ;;  %1104 = vmatprep.mubr.bf16.mxu1 %v426_v24  ;;  %v388_v24 = vld [vmem:[%s5267_s20 + $0xf8] sm:$0xff]  ;;  %v414_v21 = vld [vmem:[%s5267_s20 + $0x1c8] sm:$0xff] }
  0xc3   : > { %2232 = vmatpush1.bf16.msra.mxu0 %v4641_v25  ;;  %2425 = vmatpush1.bf16.msra.mxu1 %v4644_v26  ;;  %v4695_v25 = vld [vmem:[#allocation8 + $0x180] ss:$16 sps:$4 sm:$0xff]   ;;  %v436_v32 = vpack.c.bf16 %v388_v24, %v386_v23  ;;  %v450_v24 = vpack.c.bf16 %v416_v22, %v414_v21 }
  0xc4   : > { %2233 = vmatprep.subr.bf16.mxu0 %v4649_v27  ;;  %2426 = vmatprep.subr.bf16.mxu1 %v4652_v28  ;;  %v4698_v26 = vld [vmem:[#allocation8 + $0x380] ss:$16 sps:$4 sm:$0xff]   ;;  %v4703_v27 = vld [vmem:[#allocation8 + $0x164] ss:$16 sps:$4 sm:$0xff]  }
  0xc5   : > { %v4706_v28 = vld [vmem:[#allocation8 + $0x364] ss:$16 sps:$4 sm:$0xff]  }
  0xc7   : > { %2234 = vmatpush1.bf16.msra.mxu0 %v4647_v33  ;;  %2427 = vmatpush1.bf16.msra.mxu1 %v4650_v34  ;;  %v4709_v33 = vld [vmem:[#allocation8 + $0x144] ss:$16 sps:$4 sm:$0xff]  }
  0xc8   : > { %2235 = vmatprep.subr.bf16.mxu0 %v4655_v35  ;;  %2428 = vmatprep.subr.bf16.mxu1 %v4658_v36  ;;  %v4712_v34 = vld [vmem:[#allocation8 + $0x344] ss:$16 sps:$4 sm:$0xff]   ;;  %v385_v35 = vld [vmem:[%s5267_s20 + $0xe0] sm:$0xff]  ;;  %v387_v36 = vld [vmem:[%s5267_s20 + $0xf0] sm:$0xff] }
  0xc9   : > { %912 = vmatmul.mubr.bf16.gmra.mxu0 %v425_v37  ;;  %1105 = vmatmul.mubr.bf16.gmra.mxu1 %v425_v37  ;;  %v390_v37 = vld [vmem:[%s5267_s20 + $0x108] sm:$0xff] }
  0xca   : > { %921 = vmatprep.mubr.bf16.mxu0 %v428_v38  ;;  %1114 = vmatprep.mubr.bf16.mxu1 %v428_v38  ;;  %v392_v38 = vld [vmem:[%s5267_s20 + $0x118] sm:$0xff] }
  0xcb   : > { %2236 = vmatpush1.bf16.msra.mxu0 %v4653_v39  ;;  %2429 = vmatpush1.bf16.msra.mxu1 %v4656_v40  ;;  %v4707_v39 = vld [vmem:[#allocation8 + $0x140] ss:$16 sps:$4 sm:$0xff]   ;;  %v438_v46 = vpack.c.bf16 %v392_v38, %v390_v37 }
  0xcc   : > { %2237 = vmatprep.subr.bf16.mxu0 %v4661_v43  ;;  %2430 = vmatprep.subr.bf16.mxu1 %v4664_v44  ;;  %v4710_v40 = vld [vmem:[#allocation8 + $0x340] ss:$16 sps:$4 sm:$0xff]   ;;  %v435_v43 = vpack.c.bf16 %v387_v36, %v385_v35 }
  0xcd   : > { %v4713_v44 = vld [vmem:[#allocation8 + $0x120] ss:$16 sps:$4 sm:$0xff]  }
  0xcf   : > { %2238 = vmatpush1.bf16.msra.mxu0 %v4659_v47  ;;  %2431 = vmatpush1.bf16.msra.mxu1 %v4662_v48  ;;  %v389_v47 = vld [vmem:[%s5267_s20 + $0x100] sm:$0xff]  ;;  %v391_v48 = vld [vmem:[%s5267_s20 + $0x110] sm:$0xff] }
  0xd0   : > { %2239 = vmatprep.subr.bf16.mxu0 %v4667_v49  ;;  %2432 = vmatprep.subr.bf16.mxu1 %v4670_v50  ;;  %v394_v49 = vld [vmem:[%s5267_s20 + $0x128] sm:$0xff]  ;;  %v396_v50 = vld [vmem:[%s5267_s20 + $0x138] sm:$0xff] }
  0xd1   : > { %922 = vmatmul.mubr.bf16.gmra.mxu0 %v427_v51  ;;  %1115 = vmatmul.mubr.bf16.gmra.mxu1 %v427_v51  ;;  %v437_v51 = vpack.c.bf16 %v391_v48, %v389_v47 }
  0xd2   : > { %931 = vmatprep.mubr.bf16.mxu0 %v430_v52  ;;  %1124 = vmatprep.mubr.bf16.mxu1 %v430_v52  ;;  %v440_v52 = vpack.c.bf16 %v396_v50, %v394_v49 }
  0xd3   : > { %2240 = vmatpush1.bf16.msra.mxu0 %v4665_v53  ;;  %2433 = vmatpush1.bf16.msra.mxu1 %v4668_v54  ;;  %v393_v53 = vld [vmem:[%s5267_s20 + $0x120] sm:$0xff]  ;;  %v395_v54 = vld [vmem:[%s5267_s20 + $0x130] sm:$0xff] }
  0xd4   : > { %2241 = vmatprep.subr.bf16.mxu0 %v4673_v57  ;;  %2434 = vmatprep.subr.bf16.mxu1 %v4676_v58  ;;  %v439_v57 = vpack.c.bf16 %v395_v54, %v393_v53  ;;  %v442_v58 = vpack.c.bf16 %v400_v56, %v398_v55 }
  0xd7   : > { %2242 = vmatpush1.bf16.msra.mxu0 %v4671_v61  ;;  %2435 = vmatpush1.bf16.msra.mxu1 %v4674_v62  ;;  %v402_v61 = vld [vmem:[%s5267_s20 + $0x168] sm:$0xff]  ;;  %v404_v62 = vld [vmem:[%s5267_s20 + $0x178] sm:$0xff] }
  0xd8   : > { %2243 = vmatprep.subr.bf16.mxu0 %v4679_v63  ;;  %2436 = vmatprep.subr.bf16.mxu1 %v4682_v0  ;;  %v4721_v63 = vld [vmem:[#allocation8 + $0x104] ss:$16 sps:$4 sm:$0xff]  }
  0xd9   : > { %932 = vmatmul.mubr.bf16.gmra.mxu0 %v429_v1  ;;  %1125 = vmatmul.mubr.bf16.gmra.mxu1 %v429_v1  ;;  %v4724_v0 = vld [vmem:[#allocation8 + $0x304] ss:$16 sps:$4 sm:$0xff]   ;;  %v4719_v1 = vld [vmem:[#allocation8 + $0x100] ss:$16 sps:$4 sm:$0xff]  }
  0xda   : > { %941 = vmatprep.mubr.bf16.mxu0 %v432_v2  ;;  %1134 = vmatprep.mubr.bf16.mxu1 %v432_v2  ;;  %v4722_v2 = vld [vmem:[#allocation8 + $0x300] ss:$16 sps:$4 sm:$0xff]  }
  0xdb   : > { %2244 = vmatpush2.bf16.msra.mxu0 %v4677_v3  ;;  %2437 = vmatpush2.bf16.msra.mxu1 %v4680_v4  ;;  %v441_v3 = vpack.c.bf16 %v399_v60, %v397_v59  ;;  %v444_v4 = vpack.c.bf16 %v404_v62, %v402_v61 }
  0xdc   : > { %2245 = vmatprep.subr.bf16.mxu0 %v4685_v7  ;;  %2438 = vmatprep.subr.bf16.mxu1 %v4688_v8  ;;  %v406_v7 = vld [vmem:[%s5267_s20 + $0x188] sm:$0xff]  ;;  %v408_v8 = vld [vmem:[%s5267_s20 + $0x198] sm:$0xff] }
  0xdf   : > { %2246 = vmatpush2.bf16.msra.mxu0 %v4683_v11  ;;  %2439 = vmatpush2.bf16.msra.mxu1 %v4686_v12  ;;  %v443_v11 = vpack.c.bf16 %v403_v6, %v401_v5  ;;  %v446_v12 = vpack.c.bf16 %v408_v8, %v406_v7 }
  0xe0   : > { %2247 = vmatprep.subr.bf16.mxu0 %v4691_v13  ;;  %2440 = vmatprep.subr.bf16.mxu1 %v4694_v14  ;;  %v405_v13 = vld [vmem:[%s5267_s20 + $0x180] sm:$0xff]  ;;  %v407_v14 = vld [vmem:[%s5267_s20 + $0x190] sm:$0xff] }
  0xe1   : > { %942 = vmatmul.mubr.bf16.gmra.mxu0 %v431_v15  ;;  %1135 = vmatmul.mubr.bf16.gmra.mxu1 %v431_v15  ;;  %v410_v15 = vld [vmem:[%s5267_s20 + $0x1a8] sm:$0xff] }
  0xe2   : > { %951 = vmatprep.mubr.bf16.mxu0 %v434_v18  ;;  %1144 = vmatprep.mubr.bf16.mxu1 %v434_v18 }
  0xe3   : > { %2248 = vmatpush2.bf16.msra.mxu0 %v4689_v16  ;;  %2441 = vmatpush2.bf16.msra.mxu1 %v4692_v17  ;;  %v412_v16 = vld [vmem:[%s5267_s20 + $0x1b8] sm:$0xff]  ;;  %v445_v17 = vpack.c.bf16 %v407_v14, %v405_v13 }
  0xe4   : > { %2249 = vmatprep.subr.bf16.mxu0 %v4697_v19  ;;  %2442 = vmatprep.subr.bf16.mxu1 %v4700_v20  ;;  %v448_v18 = vpack.c.bf16 %v412_v16, %v410_v15  ;;  %v409_v19 = vld [vmem:[%s5267_s20 + $0x1a0] sm:$0xff]  ;;  %v411_v20 = vld [vmem:[%s5267_s20 + $0x1b0] sm:$0xff] }
  0xe5   : > { %v447_v23 = vpack.c.bf16 %v411_v20, %v409_v19  ;;  %v4736_v19 = vld [vmem:[#allocation8 + $0x2cc] ss:$16 sps:$4 sm:$0xff]  }
  0xe7   : > { %2250 = vmatpush2.bf16.msra.mxu0 %v4695_v25  ;;  %2443 = vmatpush2.bf16.msra.mxu1 %v4698_v26  ;;  %v413_v25 = vld [vmem:[%s5267_s20 + $0x1c0] sm:$0xff]  ;;  %v415_v26 = vld [vmem:[%s5267_s20 + $0x1d0] sm:$0xff] }
  0xe8   : > { %2251 = vmatprep.subr.bf16.mxu0 %v4703_v27  ;;  %2444 = vmatprep.subr.bf16.mxu1 %v4706_v28  ;;  %v418_v27 = vld [vmem:[%s5267_s20 + $0x1e8] sm:$0xff]  ;;  %v420_v28 = vld [vmem:[%s5267_s20 + $0x1f8] sm:$0xff] }
  0xe9   : > { %952 = vmatmul.mubr.bf16.gmra.mxu0 %v433_v29  ;;  %1145 = vmatmul.mubr.bf16.gmra.mxu1 %v433_v29  ;;  %v449_v29 = vpack.c.bf16 %v415_v26, %v413_v25 }
  0xea   : > { %961 = vmatprep.mubr.bf16.mxu0 %v436_v32  ;;  %1154 = vmatprep.mubr.bf16.mxu1 %v436_v32  ;;  %v419_v32 = vld [vmem:[%s5267_s20 + $0x1f0] sm:$0xff] }
  0xeb   : > { %2252 = vmatpush2.bf16.msra.mxu0 %v4701_v30  ;;  %2445 = vmatpush2.bf16.msra.mxu1 %v4704_v31  ;;  %v452_v30 = vpack.c.bf16 %v420_v28, %v418_v27  ;;  %v417_v31 = vld [vmem:[%s5267_s20 + $0x1e0] sm:$0xff]  ;;  %s4989_s20 = sshll.u32 %s5068_s28, 4  ;;  %s4990_s20 = int_to_ptr.vmem [resolvable:$false] %s4989_s20 }
  0xec   : > { %2253 = vmatprep.subr.bf16.mxu0 %v4709_v33  ;;  %2446 = vmatprep.subr.bf16.mxu1 %v4712_v34  ;;  %v451_v33 = vpack.c.bf16 %v419_v32, %v417_v31  ;;  %v519_v34 = vlaneseq  ;;  %s4991_s30 = scalar_lea.vmem %s4990_s20, 8192  ;;  %p4992_p9 = scmp.lt.s32.totalorder %s6486_s12, %s4990_s20 }
  0xed   : > { %p4993_p13 = scmp.lt.s32.totalorder %s4991_s30, %s4985_s14 }
  0xee   : > { %v5345_v35 = vshrl.u32 %v519_v34, 7  ;;  %v4734_v34 = vld [vmem:[#allocation8 + $0x2c8] ss:$16 sps:$4 sm:$0xff]  }
  0xef   : > { %2254 = vmatpush2.bf16.msra.mxu0 %v4707_v39  ;;  %2447 = vmatpush2.bf16.msra.mxu1 %v4710_v40  ;;  %v517_v40 = vld [vmem:[#allocation7] sm:$0xf]  ;;  %p4994_p3 = por %p4993_p13, %p4992_p9 }
  0xf0   : > { %2255 = vmatprep.subr.bf16.mxu0 %v4715_v41  ;;  %2448 = vmatprep.subr.bf16.mxu1 %v4718_v42  ;;  %6591 = vst [vmem:[#allocation16_spill] sm:$0xff] %v5345_v35  ;;  %v6547_v36 = vsub.s32 1, %v5345_v35  ;;  %v6545_v37 = vsub.s32 3, %v5345_v35  ;;  %v6546_v38 = vsub.s32 0, %v5345_v35  ;;  %v6544_v39 = vsub.s32 2, %v5345_v35 }
  0xf1   : > { %962 = vmatmul.mubr.bf16.gmra.mxu0 %v435_v43  ;;  %1155 = vmatmul.mubr.bf16.gmra.mxu1 %v435_v43  ;;  %p4995_p5 = pnand %p4994_p3, %p4988_p7 }
  0xf2   : > { %971 = vmatprep.mubr.bf16.mxu0 %v438_v46  ;;  %1164 = vmatprep.mubr.bf16.mxu1 %v438_v46  ;;  %v5353_v43 = vrot.slane %v517_v40, %v6547_v36  ;;  %v5365_v46 = vrot.slane %v517_v40, %v6544_v39 }
  0xf3   : > { %2256 = vmatpush2.bf16.msra.mxu0 %v4713_v44  ;;  %2449 = vmatpush2.bf16.msra.mxu1 %v4716_v45  ;;  %v5357_v44 = vrot.slane %v517_v40, %v6545_v37  ;;  %v5361_v45 = vrot.slane %v517_v40, %v6546_v38  ;;  %v4739_v40 = vld [vmem:[#allocation8 + $0xac] ss:$16 sps:$4 sm:$0xff]  }
  0xf4   : > { %2257 = vmatprep.subr.bf16.mxu0 %v4721_v63  ;;  %2450 = vmatprep.subr.bf16.mxu1 %v4724_v0 }
  0xf7   : > { %2258 = vmatpush2.bf16.msra.mxu0 %v4719_v1  ;;  %2451 = vmatpush2.bf16.msra.mxu1 %v4722_v2 }
  0xf8   : > { %2613 = vmatprep.subr.bf16.mxu0 %v4727_v9  ;;  %2806 = vmatprep.subr.bf16.mxu1 %v4730_v10 }
  0xf9   : > { %972 = vmatmul.mubr.bf16.gmra.mxu0 %v437_v51  ;;  %1165 = vmatmul.mubr.bf16.gmra.mxu1 %v437_v51 }
  0xfa   : > { %981 = vmatprep.mubr.bf16.mxu0 %v440_v52  ;;  %1174 = vmatprep.mubr.bf16.mxu1 %v440_v52 }
 0x101   : > { %982 = vmatmul.mubr.bf16.gmra.mxu0 %v439_v57  ;;  %1175 = vmatmul.mubr.bf16.gmra.mxu1 %v439_v57 }
 0x102   : > { %991 = vmatprep.mubr.bf16.mxu0 %v442_v58  ;;  %1184 = vmatprep.mubr.bf16.mxu1 %v442_v58 }
 0x109   : > { %992 = vmatmul.mubr.bf16.gmra.mxu0 %v441_v3  ;;  %1185 = vmatmul.mubr.bf16.gmra.mxu1 %v441_v3 }
 0x10a   : > { %1001 = vmatprep.mubr.bf16.mxu0 %v444_v4  ;;  %1194 = vmatprep.mubr.bf16.mxu1 %v444_v4 }
 0x111   : > { %1002 = vmatmul.mubr.bf16.gmra.mxu0 %v443_v11  ;;  %1195 = vmatmul.mubr.bf16.gmra.mxu1 %v443_v11  ;;  %v4725_v11 = vld [vmem:[#allocation8 + $0xe8] ss:$16 sps:$4 sm:$0xff]  }
 0x112   : > { %1011 = vmatprep.mubr.bf16.mxu0 %v446_v12  ;;  %1204 = vmatprep.mubr.bf16.mxu1 %v446_v12  ;;  %v4728_v12 = vld [vmem:[#allocation8 + $0x2e8] ss:$16 sps:$4 sm:$0xff]  }
 0x119   : > { %1012 = vmatmul.mubr.bf16.gmra.mxu0 %v445_v17  ;;  %1205 = vmatmul.mubr.bf16.gmra.mxu1 %v445_v17 }
 0x11a   : > { %1021 = vmatprep.mubr.bf16.mxu0 %v448_v18  ;;  %1214 = vmatprep.mubr.bf16.mxu1 %v448_v18  ;;  %v4733_v18 = vld [vmem:[#allocation8 + $0xcc] ss:$16 sps:$4 sm:$0xff]  }
 0x121   : > { %1022 = vmatmul.mubr.bf16.gmra.mxu0 %v447_v23  ;;  %1215 = vmatmul.mubr.bf16.gmra.mxu1 %v447_v23 }
 0x122   : > { %1031 = vmatprep.mubr.bf16.mxu0 %v450_v24  ;;  %1224 = vmatprep.mubr.bf16.mxu1 %v450_v24 }
 0x129   : > { %1032 = vmatmul.mubr.bf16.gmra.mxu0 %v449_v29  ;;  %1225 = vmatmul.mubr.bf16.gmra.mxu1 %v449_v29  ;;  %v4731_v29 = vld [vmem:[#allocation8 + $0xc8] ss:$16 sps:$4 sm:$0xff]  }
 0x12a   : > { %1041 = vmatprep.mubr.bf16.mxu0 %v452_v30  ;;  %1234 = vmatprep.mubr.bf16.mxu1 %v452_v30 }
 0x131   : > { %1042 = vmatmul.mubr.bf16.gmra.mxu0 %v451_v33  ;;  %1235 = vmatmul.mubr.bf16.gmra.mxu1 %v451_v33 }
 0x179   : > { %v893_v41 = vpop.f32.mrf.mxu0  ;;  %v1086_v42 = vpop.f32.mrf.mxu1 }
 0x17a   : > { %v894_v55 = vadd.f32 %v893_v41, %v5361_v45  ;;  %v1087_v56 = vadd.f32 %v1086_v42, %v5365_v46 }
 0x17b   : > { %v895_v47 = vpop.f32.mrf.mxu0  ;;  %v1088_v48 = vpop.f32.mrf.mxu1 }
 0x17c   : > { %v896_v51 = vadd.f32 %v895_v47, %v5353_v43  ;;  %v1089_v52 = vadd.f32 %v1088_v48, %v5357_v44  ;;  %v1245_v5 = vmax.f32 %v894_v55, 0.0  ;;  %v1247_v6 = vmax.f32 %v1087_v56, 0.0  ;;  %v4737_v55 = vld [vmem:[#allocation8 + $0xa8] ss:$16 sps:$4 sm:$0xff]   ;;  %v4742_v56 = vld [vmem:[#allocation8 + $0x2ac] ss:$16 sps:$4 sm:$0xff]  }
 0x17d   : > { %v897_v49 = vpop.f32.mrf.mxu0  ;;  %v1090_v50 = vpop.f32.mrf.mxu1 }
 0x17e   : > { %v898_v53 = vadd.f32 %v897_v49, %v5361_v45  ;;  %v1091_v54 = vadd.f32 %v1090_v50, %v5365_v46  ;;  %v1246_v1 = vmax.f32 %v896_v51, 0.0  ;;  %v1248_v2 = vmax.f32 %v1089_v52, 0.0 }
 0x17f   : > { %v899_v57 = vpop.f32.mrf.mxu0  ;;  %v1092_v58 = vpop.f32.mrf.mxu1 }
 0x180   : > { %v900_v59 = vadd.f32 %v899_v57, %v5353_v43  ;;  %v1093_v60 = vadd.f32 %v1092_v58, %v5357_v44  ;;  %v1249_v61 = vmax.f32 %v898_v53, 0.0  ;;  %v1251_v62 = vmax.f32 %v1091_v54, 0.0 }
 0x181   : > { %v903_v63 = vpop.f32.mrf.mxu0  ;;  %v1096_v0 = vpop.f32.mrf.mxu1 }
 0x182   : > { %v1250_v3 = vmax.f32 %v900_v59, 0.0  ;;  %v1252_v4 = vmax.f32 %v1093_v60, 0.0  ;;  %v5379_v13 = vpack.c.bf16 %v1249_v61, %v1245_v5  ;;  %v5381_v14 = vpack.c.bf16 %v1251_v62, %v1247_v6  ;;  %v4740_v62 = vld [vmem:[#allocation8 + $0x2a8] ss:$16 sps:$4 sm:$0xff]  }
 0x183   : > { %v905_v7 = vpop.f32.mrf.mxu0  ;;  %v1098_v8 = vpop.f32.mrf.mxu1  ;;  %v904_v23 = vadd.f32 %v903_v63, %v5361_v45  ;;  %v1097_v24 = vadd.f32 %v1096_v0, %v5365_v46  ;;  %v4745_v63 = vld [vmem:[#allocation8 + $0x8c] ss:$16 sps:$4 sm:$0xff]  }
 0x184   : > { %v5375_v9 = vpack.c.bf16 %v1250_v3, %v1246_v1  ;;  %v5377_v10 = vpack.c.bf16 %v1252_v4, %v1248_v2  ;;  %v906_v15 = vadd.f32 %v905_v7, %v5353_v43  ;;  %v1099_v20 = vadd.f32 %v1098_v8, %v5357_v44  ;;  %v4748_v3 = vld [vmem:[#allocation8 + $0x28c] ss:$16 sps:$4 sm:$0xff]  }
 0x185   : > { %v907_v16 = vpop.f32.mrf.mxu0  ;;  %v1100_v17 = vpop.f32.mrf.mxu1  ;;  %v1253_v49 = vmax.f32 %v904_v23, 0.0  ;;  %v1255_v50 = vmax.f32 %v1097_v24, 0.0 }
 0x186   : > { %v908_v21 = vadd.f32 %v907_v16, %v5361_v45  ;;  %v1101_v22 = vadd.f32 %v1100_v17, %v5365_v46  ;;  %2259 = vmatprep.mubr.bf16.mxu0 %v5375_v9  ;;  %2452 = vmatprep.mubr.bf16.mxu1 %v5377_v10  ;;  %v1254_v41 = vmax.f32 %v906_v15, 0.0  ;;  %v1256_v42 = vmax.f32 %v1099_v20, 0.0  ;;  %v4751_v20 = vld [vmem:[#allocation8 + $0x6c] ss:$16 sps:$4 sm:$0xff]  }
 0x187   : > { %v909_v25 = vpop.f32.mrf.mxu0  ;;  %v1102_v26 = vpop.f32.mrf.mxu1  ;;  %2260 = vmatmul.mubr.bf16.vlgmr.msra.gmra.mxu0 %v5379_v13  ;;  %2453 = vmatmul.mubr.bf16.vlgmr.msra.gmra.mxu1 %v5381_v14 }
 0x188   : > { %v910_v27 = vadd.f32 %v909_v25, %v5353_v43  ;;  %v1103_v28 = vadd.f32 %v1102_v26, %v5357_v44  ;;  %2614 = vmatpush1.bf16.msra.mxu0 %v4725_v11  ;;  %2807 = vmatpush1.bf16.msra.mxu1 %v4728_v12  ;;  %v1257_v30 = vmax.f32 %v908_v21, 0.0  ;;  %v1259_v31 = vmax.f32 %v1101_v22, 0.0  ;;  %v4743_v12 = vld [vmem:[#allocation8 + $0x88] ss:$16 sps:$4 sm:$0xff]  }
 0x189   : > { %v913_v32 = vpop.f32.mrf.mxu0  ;;  %v1106_v33 = vpop.f32.mrf.mxu1  ;;  %2615 = vmatprep.subr.bf16.mxu0 %v4733_v18  ;;  %2808 = vmatprep.subr.bf16.mxu1 %v4736_v19  ;;  %v4746_v19 = vld [vmem:[#allocation8 + $0x288] ss:$16 sps:$4 sm:$0xff]  }
 0x18a   : > { %v1258_v47 = vmax.f32 %v910_v27, 0.0  ;;  %v1260_v48 = vmax.f32 %v1103_v28, 0.0  ;;  %v5399_v57 = vpack.c.bf16 %v1257_v30, %v1253_v49  ;;  %v5401_v58 = vpack.c.bf16 %v1259_v31, %v1255_v50  ;;  %v4749_v31 = vld [vmem:[#allocation8 + $0x68] ss:$16 sps:$4 sm:$0xff]  }
 0x18b   : > { %v915_v51 = vpop.f32.mrf.mxu0  ;;  %v1108_v52 = vpop.f32.mrf.mxu1  ;;  %v914_v4 = vadd.f32 %v913_v32, %v5361_v45  ;;  %v1107_v5 = vadd.f32 %v1106_v33, %v5365_v46  ;;  %v4754_v32 = vld [vmem:[#allocation8 + $0x26c] ss:$16 sps:$4 sm:$0xff]  }
 0x18c   : > { %v5395_v53 = vpack.c.bf16 %v1258_v47, %v1254_v41  ;;  %v5397_v54 = vpack.c.bf16 %v1260_v48, %v1256_v42  ;;  %2616 = vmatpush1.bf16.msra.mxu0 %v4731_v29  ;;  %v916_v59 = vadd.f32 %v915_v51, %v5353_v43  ;;  %2809 = vmatpush1.bf16.msra.mxu1 %v4734_v34  ;;  %v4752_v47 = vld [vmem:[#allocation8 + $0x268] ss:$16 sps:$4 sm:$0xff]   ;;  %v4757_v48 = vld [vmem:[#allocation8 + $0x4c] ss:$16 sps:$4 sm:$0xff]  }
 0x18d   : > { %v917_v60 = vpop.f32.mrf.mxu0  ;;  %v1110_v61 = vpop.f32.mrf.mxu1  ;;  %2617 = vmatprep.subr.bf16.mxu0 %v4739_v40  ;;  %v1109_v0 = vadd.f32 %v1108_v52, %v5357_v44  ;;  %2810 = vmatprep.subr.bf16.mxu1 %v4742_v56  ;;  %v1261_v25 = vmax.f32 %v914_v4, 0.0  ;;  %v1263_v26 = vmax.f32 %v1107_v5, 0.0  ;;  %v4760_v52 = vld [vmem:[#allocation8 + $0x24c] ss:$16 sps:$4 sm:$0xff]   ;;  %v4758_v4 = vld [vmem:[#allocation8 + $0x248] ss:$16 sps:$4 sm:$0xff]  }
 0x18e   : > { %v918_v1 = vadd.f32 %v917_v60, %v5361_v45  ;;  %v1111_v2 = vadd.f32 %v1110_v61, %v5365_v46  ;;  %2269 = vmatprep.mubr.bf16.mxu0 %v5395_v53  ;;  %2462 = vmatprep.mubr.bf16.mxu1 %v5397_v54  ;;  %v1262_v21 = vmax.f32 %v916_v59, 0.0  ;;  %v4763_v5 = vld [vmem:[#allocation8 + $0x2c] ss:$16 sps:$4 sm:$0xff]  }
 0x18f   : > { %v919_v6 = vpop.f32.mrf.mxu0  ;;  %v1112_v7 = vpop.f32.mrf.mxu1  ;;  %2270 = vmatmul.mubr.bf16.gmra.mxu0 %v5399_v57  ;;  %2463 = vmatmul.mubr.bf16.gmra.mxu1 %v5401_v58  ;;  %v1264_v22 = vmax.f32 %v1109_v0, 0.0 }
 0x190   : > { %v920_v8 = vadd.f32 %v919_v6, %v5353_v43  ;;  %v1113_v11 = vadd.f32 %v1112_v7, %v5357_v44  ;;  %2618 = vmatpush1.bf16.msra.mxu0 %v4737_v55  ;;  %v1265_v15 = vmax.f32 %v918_v1, 0.0  ;;  %v1267_v16 = vmax.f32 %v1111_v2, 0.0  ;;  %2811 = vmatpush1.bf16.msra.mxu1 %v4740_v62 }
 0x191   : > { %v923_v17 = vpop.f32.mrf.mxu0  ;;  %v1116_v18 = vpop.f32.mrf.mxu1  ;;  %2619 = vmatprep.subr.bf16.mxu0 %v4745_v63  ;;  %2812 = vmatprep.subr.bf16.mxu1 %v4748_v3  ;;  %v4755_v63 = vld [vmem:[#allocation8 + $0x48] ss:$16 sps:$4 sm:$0xff]  }
 0x192   : > { %v1266_v23 = vmax.f32 %v920_v8, 0.0  ;;  %v1268_v24 = vmax.f32 %v1113_v11, 0.0  ;;  %v5419_v33 = vpack.c.bf16 %v1265_v15, %v1261_v25  ;;  %v5421_v34 = vpack.c.bf16 %v1267_v16, %v1263_v26 }
 0x193   : > { %v925_v27 = vpop.f32.mrf.mxu0  ;;  %v1118_v28 = vpop.f32.mrf.mxu1  ;;  %v924_v55 = vadd.f32 %v923_v17, %v5361_v45  ;;  %v1117_v56 = vadd.f32 %v1116_v18, %v5365_v46 }
 0x194   : > { %v5415_v29 = vpack.c.bf16 %v1266_v23, %v1262_v21  ;;  %v5417_v30 = vpack.c.bf16 %v1268_v24, %v1264_v22  ;;  %2620 = vmatpush1.bf16.msra.mxu0 %v4743_v12  ;;  %v926_v40 = vadd.f32 %v925_v27, %v5353_v43  ;;  %2813 = vmatpush1.bf16.msra.mxu1 %v4746_v19  ;;  %v4766_v21 = vld [vmem:[#allocation8 + $0x22c] ss:$16 sps:$4 sm:$0xff]   ;;  %v4764_v27 = vld [vmem:[#allocation8 + $0x228] ss:$16 sps:$4 sm:$0xff]  }
 0x195   : > { %v927_v41 = vpop.f32.mrf.mxu0  ;;  %v1120_v42 = vpop.f32.mrf.mxu1  ;;  %2621 = vmatprep.subr.bf16.mxu0 %v4751_v20  ;;  %v1119_v49 = vadd.f32 %v1118_v28, %v5357_v44  ;;  %2814 = vmatprep.subr.bf16.mxu1 %v4754_v32  ;;  %v1269_v12 = vmax.f32 %v924_v55, 0.0  ;;  %v1271_v15 = vmax.f32 %v1117_v56, 0.0  ;;  %v4761_v20 = vld [vmem:[#allocation8 + $0x28] ss:$16 sps:$4 sm:$0xff]   ;;  %v4769_v28 = vld [vmem:[#allocation8 + $0xc] ss:$16 sps:$4 sm:$0xff]  }
 0x196   : > { %v928_v50 = vadd.f32 %v927_v41, %v5361_v45  ;;  %v1121_v51 = vadd.f32 %v1120_v42, %v5365_v46  ;;  %2279 = vmatprep.mubr.bf16.mxu0 %v5415_v29  ;;  %2472 = vmatprep.mubr.bf16.mxu1 %v5417_v30  ;;  %v1270_v6 = vmax.f32 %v926_v40, 0.0  ;;  %v4772_v41 = vld [vmem:[#allocation8 + $0x20c] ss:$16 sps:$4 sm:$0xff]  }
 0x197   : > { %v929_v59 = vpop.f32.mrf.mxu0  ;;  %v1122_v60 = vpop.f32.mrf.mxu1  ;;  %2280 = vmatmul.mubr.bf16.gmra.mxu0 %v5419_v33  ;;  %2473 = vmatmul.mubr.bf16.gmra.mxu1 %v5421_v34  ;;  %v1272_v7 = vmax.f32 %v1119_v49, 0.0 }
 0x198   : > { %v930_v61 = vadd.f32 %v929_v59, %v5353_v43  ;;  %v1123_v62 = vadd.f32 %v1122_v60, %v5357_v44  ;;  %2622 = vmatpush1.bf16.msra.mxu0 %v4749_v31  ;;  %v1273_v0 = vmax.f32 %v928_v50, 0.0  ;;  %v1275_v1 = vmax.f32 %v1121_v51, 0.0  ;;  %2815 = vmatpush1.bf16.msra.mxu1 %v4752_v47 }
 0x199   : > { %v933_v2 = vpop.f32.mrf.mxu0  ;;  %v1126_v3 = vpop.f32.mrf.mxu1  ;;  %2623 = vmatprep.subr.bf16.mxu0 %v4757_v48  ;;  %2816 = vmatprep.subr.bf16.mxu1 %v4760_v52  ;;  %v4767_v52 = vld [vmem:[#allocation8 + $0x8] ss:$16 sps:$4 sm:$0xff]  }
 0x19a   : > { %v1274_v8 = vmax.f32 %v930_v61, 0.0  ;;  %v1276_v11 = vmax.f32 %v1123_v62, 0.0  ;;  %v5439_v22 = vpack.c.bf16 %v1273_v0, %v1269_v12  ;;  %v5441_v23 = vpack.c.bf16 %v1275_v1, %v1271_v15  ;;  %v4770_v61 = vld [vmem:[#allocation8 + $0x208] ss:$16 sps:$4 sm:$0xff]   ;;  %v4775_v62 = vld [vmem:[#allocation8 + $0x1ec] ss:$16 sps:$4 sm:$0xff]  }
 0x19b   : > { %v935_v16 = vpop.f32.mrf.mxu0  ;;  %v1128_v17 = vpop.f32.mrf.mxu1  ;;  %v934_v42 = vadd.f32 %v933_v2, %v5361_v45  ;;  %v1127_v47 = vadd.f32 %v1126_v3, %v5365_v46  ;;  %v4778_v12 = vld [vmem:[#allocation8 + $0x3ec] ss:$16 sps:$4 sm:$0xff]  }
 0x19c   : > { %v5435_v18 = vpack.c.bf16 %v1274_v8, %v1270_v6  ;;  %v5437_v19 = vpack.c.bf16 %v1276_v11, %v1272_v7  ;;  %2624 = vmatpush1.bf16.msra.mxu0 %v4755_v63  ;;  %v936_v24 = vadd.f32 %v935_v16, %v5353_v43  ;;  %2817 = vmatpush1.bf16.msra.mxu1 %v4758_v4  ;;  %v4773_v11 = vld [vmem:[#allocation8 + $0x1e8] ss:$16 sps:$4 sm:$0xff]  }
 0x19d   : > { %v937_v25 = vpop.f32.mrf.mxu0  ;;  %v1130_v26 = vpop.f32.mrf.mxu1  ;;  %2625 = vmatprep.subr.bf16.mxu0 %v4763_v5  ;;  %v1129_v31 = vadd.f32 %v1128_v17, %v5357_v44  ;;  %2818 = vmatprep.subr.bf16.mxu1 %v4766_v21  ;;  %v1277_v3 = vmax.f32 %v934_v42, 0.0  ;;  %v1279_v4 = vmax.f32 %v1127_v47, 0.0 }
 0x19e   : > { %v938_v32 = vadd.f32 %v937_v25, %v5361_v45  ;;  %v1131_v40 = vadd.f32 %v1130_v26, %v5365_v46  ;;  %2289 = vmatprep.mubr.bf16.mxu0 %v5435_v18  ;;  %2482 = vmatprep.mubr.bf16.mxu1 %v5437_v19  ;;  %v1278_v63 = vmax.f32 %v936_v24, 0.0  ;;  %v4776_v24 = vld [vmem:[#allocation8 + $0x3e8] ss:$16 sps:$4 sm:$0xff]   ;;  %v4781_v25 = vld [vmem:[#allocation8 + $0x1cc] ss:$16 sps:$4 sm:$0xff]  }
 0x19f   : > { %v939_v48 = vpop.f32.mrf.mxu0  ;;  %v1132_v49 = vpop.f32.mrf.mxu1  ;;  %2290 = vmatmul.mubr.bf16.gmra.mxu0 %v5439_v22  ;;  %2483 = vmatmul.mubr.bf16.gmra.mxu1 %v5441_v23  ;;  %v1280_v0 = vmax.f32 %v1129_v31, 0.0  ;;  %v4784_v31 = vld [vmem:[#allocation8 + $0x3cc] ss:$16 sps:$4 sm:$0xff]  }
 0x1a0   : > { %v940_v50 = vadd.f32 %v939_v48, %v5353_v43  ;;  %v1133_v51 = vadd.f32 %v1132_v49, %v5357_v44  ;;  %2626 = vmatpush1.bf16.msra.mxu0 %v4761_v20  ;;  %v1281_v55 = vmax.f32 %v938_v32, 0.0  ;;  %v1283_v56 = vmax.f32 %v1131_v40, 0.0  ;;  %2819 = vmatpush1.bf16.msra.mxu1 %v4764_v27  ;;  %v4779_v49 = vld [vmem:[#allocation8 + $0x1c8] ss:$16 sps:$4 sm:$0xff]  }
 0x1a1   : > { %v943_v59 = vpop.f32.mrf.mxu0  ;;  %v1136_v60 = vpop.f32.mrf.mxu1  ;;  %2627 = vmatprep.subr.bf16.mxu0 %v4769_v28  ;;  %2820 = vmatprep.subr.bf16.mxu1 %v4772_v41 }
 0x1a2   : > { %v1282_v1 = vmax.f32 %v940_v50, 0.0  ;;  %v1284_v2 = vmax.f32 %v1133_v51, 0.0  ;;  %v5459_v15 = vpack.c.bf16 %v1281_v55, %v1277_v3  ;;  %v5461_v16 = vpack.c.bf16 %v1283_v56, %v1279_v4  ;;  %v4782_v56 = vld [vmem:[#allocation8 + $0x3c8] ss:$16 sps:$4 sm:$0xff]  }
 0x1a3   : > { %v945_v5 = vpop.f32.mrf.mxu0  ;;  %v1138_v6 = vpop.f32.mrf.mxu1  ;;  %v944_v32 = vadd.f32 %v943_v59, %v5361_v45  ;;  %v1137_v40 = vadd.f32 %v1136_v60, %v5365_v46  ;;  %v4787_v59 = vld [vmem:[#allocation8 + $0x1ac] ss:$16 sps:$4 sm:$0xff]  }
 0x1a4   : > { %v5455_v7 = vpack.c.bf16 %v1282_v1, %v1278_v63  ;;  %v5457_v8 = vpack.c.bf16 %v1284_v2, %v1280_v0  ;;  %2628 = vmatpush1.bf16.msra.mxu0 %v4767_v52  ;;  %v946_v17 = vadd.f32 %v945_v5, %v5353_v43  ;;  %2821 = vmatpush1.bf16.msra.mxu1 %v4770_v61 }
 0x1a5   : > { %v947_v20 = vpop.f32.mrf.mxu0  ;;  %v1140_v21 = vpop.f32.mrf.mxu1  ;;  %2629 = vmatprep.subr.bf16.mxu0 %v4775_v62  ;;  %v1139_v26 = vadd.f32 %v1138_v6, %v5357_v44  ;;  %2822 = vmatprep.subr.bf16.mxu1 %v4778_v12  ;;  %v1285_v0 = vmax.f32 %v944_v32, 0.0  ;;  %v1287_v1 = vmax.f32 %v1137_v40, 0.0  ;;  %v4785_v6 = vld [vmem:[#allocation8 + $0x1a8] ss:$16 sps:$4 sm:$0xff]   ;;  %v4796_v32 = vld [vmem:[#allocation8 + $0x38c] ss:$16 sps:$4 sm:$0xff]  }
 0x1a6   : > { %v948_v27 = vadd.f32 %v947_v20, %v5361_v45  ;;  %v1141_v28 = vadd.f32 %v1140_v21, %v5365_v46  ;;  %2299 = vmatprep.mubr.bf16.mxu0 %v5455_v7  ;;  %2492 = vmatprep.mubr.bf16.mxu1 %v5457_v8  ;;  %v1286_v60 = vmax.f32 %v946_v17, 0.0 }
 0x1a7   : > { %v949_v41 = vpop.f32.mrf.mxu0  ;;  %v1142_v42 = vpop.f32.mrf.mxu1  ;;  %2300 = vmatmul.mubr.bf16.gmra.mxu0 %v5459_v15  ;;  %2493 = vmatmul.mubr.bf16.gmra.mxu1 %v5461_v16  ;;  %v1288_v61 = vmax.f32 %v1139_v26, 0.0  ;;  %v4793_v26 = vld [vmem:[#allocation8 + $0x18c] ss:$16 sps:$4 sm:$0xff]  }
 0x1a8   : > { %v950_v47 = vadd.f32 %v949_v41, %v5353_v43  ;;  %v1143_v48 = vadd.f32 %v1142_v42, %v5357_v44  ;;  %2630 = vmatpush2.bf16.msra.mxu0 %v4773_v11  ;;  %v1289_v50 = vmax.f32 %v948_v27, 0.0  ;;  %v1291_v51 = vmax.f32 %v1141_v28, 0.0  ;;  %2823 = vmatpush2.bf16.msra.mxu1 %v4776_v24  ;;  %v4790_v11 = vld [vmem:[#allocation8 + $0x3ac] ss:$16 sps:$4 sm:$0xff]  }
 0x1a9   : > { %v953_v52 = vpop.f32.mrf.mxu0  ;;  %v1146_v55 = vpop.f32.mrf.mxu1  ;;  %2631 = vmatprep.subr.bf16.mxu0 %v4781_v25  ;;  %2824 = vmatprep.subr.bf16.mxu1 %v4784_v31  ;;  %v4788_v25 = vld [vmem:[#allocation8 + $0x3a8] ss:$16 sps:$4 sm:$0xff]  }
 0x1aa   : > { %v1290_v62 = vmax.f32 %v950_v47, 0.0  ;;  %v1292_v63 = vmax.f32 %v1143_v48, 0.0  ;;  %v5479_v12 = vpack.c.bf16 %v1289_v50, %v1285_v0  ;;  %v5481_v20 = vpack.c.bf16 %v1291_v51, %v1287_v1  ;;  %v4791_v50 = vld [vmem:[#allocation8 + $0x188] ss:$16 sps:$4 sm:$0xff]  }
 0x1ab   : > { %v955_v2 = vpop.f32.mrf.mxu0  ;;  %v1148_v3 = vpop.f32.mrf.mxu1  ;;  %v954_v40 = vadd.f32 %v953_v52, %v5361_v45  ;;  %v1147_v41 = vadd.f32 %v1146_v55, %v5365_v46  ;;  %v4794_v52 = vld [vmem:[#allocation8 + $0x388] ss:$16 sps:$4 sm:$0xff]   ;;  %v4799_v55 = vld [vmem:[#allocation8 + $0x16c] ss:$16 sps:$4 sm:$0xff]  }
 0x1ac   : > { %v5475_v4 = vpack.c.bf16 %v1290_v62, %v1286_v60  ;;  %v5477_v5 = vpack.c.bf16 %v1292_v63, %v1288_v61  ;;  %2632 = vmatpush2.bf16.msra.mxu0 %v4779_v49  ;;  %v956_v17 = vadd.f32 %v955_v2, %v5353_v43  ;;  %2825 = vmatpush2.bf16.msra.mxu1 %v4782_v56 }
 0x1ad   : > { %v957_v21 = vpop.f32.mrf.mxu0  ;;  %v1150_v24 = vpop.f32.mrf.mxu1  ;;  %2633 = vmatprep.subr.bf16.mxu0 %v4787_v59  ;;  %v1149_v27 = vadd.f32 %v1148_v3, %v5357_v44  ;;  %2826 = vmatprep.subr.bf16.mxu1 %v4790_v11  ;;  %v1293_v1 = vmax.f32 %v954_v40, 0.0  ;;  %v1295_v2 = vmax.f32 %v1147_v41, 0.0  ;;  %v4805_v40 = vld [vmem:[#allocation8 + $0x14c] ss:$16 sps:$4 sm:$0xff]  }
 0x1ae   : > { %v958_v28 = vadd.f32 %v957_v21, %v5361_v45  ;;  %v1151_v31 = vadd.f32 %v1150_v24, %v5365_v46  ;;  %2309 = vmatprep.mubr.bf16.mxu0 %v5475_v4  ;;  %2502 = vmatprep.mubr.bf16.mxu1 %v5477_v5  ;;  %v1294_v61 = vmax.f32 %v956_v17, 0.0  ;;  %v4797_v24 = vld [vmem:[#allocation8 + $0x168] ss:$16 sps:$4 sm:$0xff]  }
 0x1af   : > { %v959_v42 = vpop.f32.mrf.mxu0  ;;  %v1152_v47 = vpop.f32.mrf.mxu1  ;;  %2310 = vmatmul.mubr.bf16.gmra.mxu0 %v5479_v12  ;;  %2503 = vmatmul.mubr.bf16.gmra.mxu1 %v5481_v20  ;;  %v1296_v62 = vmax.f32 %v1149_v27, 0.0 }
 0x1b0   : > { %v960_v48 = vadd.f32 %v959_v42, %v5353_v43  ;;  %v1153_v49 = vadd.f32 %v1152_v47, %v5357_v44  ;;  %2634 = vmatpush2.bf16.msra.mxu0 %v4785_v6  ;;  %v1297_v51 = vmax.f32 %v958_v28, 0.0  ;;  %v1299_v56 = vmax.f32 %v1151_v31, 0.0  ;;  %2827 = vmatpush2.bf16.msra.mxu1 %v4788_v25  ;;  %v4802_v28 = vld [vmem:[#allocation8 + $0x36c] ss:$16 sps:$4 sm:$0xff]  }
 0x1b1   : > { %v963_v59 = vpop.f32.mrf.mxu0  ;;  %v1156_v60 = vpop.f32.mrf.mxu1  ;;  %2635 = vmatprep.subr.bf16.mxu0 %v4793_v26  ;;  %2828 = vmatprep.subr.bf16.mxu1 %v4796_v32  ;;  %v4800_v32 = vld [vmem:[#allocation8 + $0x368] ss:$16 sps:$4 sm:$0xff]  }
 0x1b2   : > { %v1298_v63 = vmax.f32 %v960_v48, 0.0  ;;  %v1300_v0 = vmax.f32 %v1153_v49, 0.0  ;;  %v5499_v25 = vpack.c.bf16 %v1297_v51, %v1293_v1  ;;  %v5501_v26 = vpack.c.bf16 %v1299_v56, %v1295_v2  ;;  %v4808_v48 = vld [vmem:[#allocation8 + $0x34c] ss:$16 sps:$4 sm:$0xff]  }
 0x1b3   : > { %v965_v3 = vpop.f32.mrf.mxu0  ;;  %v1158_v21 = vpop.f32.mrf.mxu1  ;;  %v964_v49 = vadd.f32 %v963_v59, %v5361_v45  ;;  %v4806_v59 = vld [vmem:[#allocation8 + $0x348] ss:$16 sps:$4 sm:$0xff]  }
 0x1b4   : > { %v5495_v6 = vpack.c.bf16 %v1298_v63, %v1294_v61  ;;  %v5497_v11 = vpack.c.bf16 %v1300_v0, %v1296_v62  ;;  %2636 = vmatpush2.bf16.msra.mxu0 %v4791_v50  ;;  %v966_v17 = vadd.f32 %v965_v3, %v5353_v43  ;;  %2829 = vmatpush2.bf16.msra.mxu1 %v4794_v52  ;;  %v4803_v61 = vld [vmem:[#allocation8 + $0x148] ss:$16 sps:$4 sm:$0xff]  }
 0x1b5   : > { %v967_v27 = vpop.f32.mrf.mxu0  ;;  %v1160_v31 = vpop.f32.mrf.mxu1  ;;  %2637 = vmatprep.subr.bf16.mxu0 %v4799_v55  ;;  %v1159_v41 = vadd.f32 %v1158_v21, %v5357_v44  ;;  %v1157_v50 = vadd.f32 %v1156_v60, %v5365_v46  ;;  %2830 = vmatprep.subr.bf16.mxu1 %v4802_v28  ;;  %v4811_v60 = vld [vmem:[#allocation8 + $0x12c] ss:$16 sps:$4 sm:$0xff]  }
 0x1b6   : > { %v968_v42 = vadd.f32 %v967_v27, %v5361_v45  ;;  %v1161_v47 = vadd.f32 %v1160_v31, %v5365_v46  ;;  %2319 = vmatprep.mubr.bf16.mxu0 %v5495_v6  ;;  %2512 = vmatprep.mubr.bf16.mxu1 %v5497_v11  ;;  %v1302_v2 = vmax.f32 %v966_v17, 0.0  ;;  %v1301_v31 = vmax.f32 %v964_v49, 0.0  ;;  %v4817_v49 = vld [vmem:[#allocation8 + $0x10c] ss:$16 sps:$4 sm:$0xff]  }
 0x1b7   : > { %v969_v51 = vpop.f32.mrf.mxu0  ;;  %v1162_v56 = vpop.f32.mrf.mxu1  ;;  %2320 = vmatmul.mubr.bf16.gmra.mxu0 %v5499_v25  ;;  %2513 = vmatmul.mubr.bf16.gmra.mxu1 %v5501_v26  ;;  %v1304_v3 = vmax.f32 %v1159_v41, 0.0 }
 0x1b8   : > { %v970_v52 = vadd.f32 %v969_v51, %v5353_v43  ;;  %v1163_v55 = vadd.f32 %v1162_v56, %v5357_v44  ;;  %2638 = vmatpush2.bf16.msra.mxu0 %v4797_v24  ;;  %v1305_v62 = vmax.f32 %v968_v42, 0.0  ;;  %v1307_v63 = vmax.f32 %v1161_v47, 0.0  ;;  %2831 = vmatpush2.bf16.msra.mxu1 %v4800_v32  ;;  %v4809_v42 = vld [vmem:[#allocation8 + $0x128] ss:$16 sps:$4 sm:$0xff]   ;;  %v4814_v47 = vld [vmem:[#allocation8 + $0x32c] ss:$16 sps:$4 sm:$0xff]  }
 0x1b9   : > { %v973_v0 = vpop.f32.mrf.mxu0  ;;  %v1166_v1 = vpop.f32.mrf.mxu1  ;;  %2639 = vmatprep.subr.bf16.mxu0 %v4805_v40  ;;  %2832 = vmatprep.subr.bf16.mxu1 %v4808_v48  ;;  %v1303_v51 = vmax.f32 %v1157_v50, 0.0  ;;  %v4812_v48 = vld [vmem:[#allocation8 + $0x328] ss:$16 sps:$4 sm:$0xff]  }
 0x1ba   : > { %v1306_v21 = vmax.f32 %v970_v52, 0.0  ;;  %v1308_v27 = vmax.f32 %v1163_v55, 0.0  ;;  %v5519_v32 = vpack.c.bf16 %v1305_v62, %v1301_v31  ;;  %v4820_v62 = vld [vmem:[#allocation8 + $0x30c] ss:$16 sps:$4 sm:$0xff]  }
 0x1bb   : > { %v975_v39 = vpop.f32.mrf.mxu0  ;;  %v1168_v56 = vpop.f32.mrf.mxu1  ;;  %v5521_v40 = vpack.c.bf16 %v1307_v63, %v1303_v51  ;;  %v974_v63 = vadd.f32 %v973_v0, %v5361_v45  ;;  %v4818_v0 = vld [vmem:[#allocation8 + $0x308] ss:$16 sps:$4 sm:$0xff]  }
 0x1bc   : > { %v5515_v24 = vpack.c.bf16 %v1306_v21, %v1302_v2  ;;  %v5517_v28 = vpack.c.bf16 %v1308_v27, %v1304_v3  ;;  %2640 = vmatpush2.bf16.msra.mxu0 %v4803_v61  ;;  %v976_v17 = vadd.f32 %v975_v39, %v5353_v43  ;;  %2833 = vmatpush2.bf16.msra.mxu1 %v4806_v59  ;;  %v4815_v21 = vld [vmem:[#allocation8 + $0x108] ss:$16 sps:$4 sm:$0xff]  }
 0x1bd   : > { %v977_v41 = vpop.f32.mrf.mxu0  ;;  %v1170_v52 = vpop.f32.mrf.mxu1  ;;  %2641 = vmatprep.subr.bf16.mxu0 %v4811_v60  ;;  %v1169_v50 = vadd.f32 %v1168_v56, %v5357_v44  ;;  %v1167_v39 = vadd.f32 %v1166_v1, %v5365_v46  ;;  %2834 = vmatprep.subr.bf16.mxu1 %v4814_v47  ;;  %v1309_v38 = vmax.f32 %v974_v63, 0.0 }
 0x1be   : > { %v978_v55 = vadd.f32 %v977_v41, %v5361_v45  ;;  %v1171_v61 = vadd.f32 %v1170_v52, %v5365_v46  ;;  %2329 = vmatprep.mubr.bf16.mxu0 %v5515_v24  ;;  %2522 = vmatprep.mubr.bf16.mxu1 %v5517_v28  ;;  %v1310_v1 = vmax.f32 %v976_v17, 0.0 }
 0x1bf   : > { %v979_v2 = vpop.f32.mrf.mxu0  ;;  %v1172_v59 = vpop.f32.mrf.mxu1  ;;  %2330 = vmatmul.mubr.bf16.gmra.mxu0 %v5519_v32  ;;  %2523 = vmatmul.mubr.bf16.gmra.mxu1 %v5521_v40  ;;  %v1312_v41 = vmax.f32 %v1169_v50, 0.0  ;;  %v1311_v36 = vmax.f32 %v1167_v39, 0.0 }
 0x1c0   : > { %v980_v60 = vadd.f32 %v979_v2, %v5353_v43  ;;  %v1173_v3 = vadd.f32 %v1172_v59, %v5357_v44  ;;  %2642 = vmatpush2.bf16.msra.mxu0 %v4809_v42  ;;  %v1313_v27 = vmax.f32 %v978_v55, 0.0  ;;  %v1315_v31 = vmax.f32 %v1171_v61, 0.0  ;;  %2835 = vmatpush2.bf16.msra.mxu1 %v4812_v48 }
 0x1c1   : > { %v983_v51 = vpop.f32.mrf.mxu0  ;;  %v1176_v56 = vpop.f32.mrf.mxu1  ;;  %2643 = vmatprep.subr.bf16.mxu0 %v4817_v49  ;;  %2836 = vmatprep.subr.bf16.mxu1 %v4820_v62 }
 0x1c2   : > { %v1314_v52 = vmax.f32 %v980_v60, 0.0  ;;  %v1316_v37 = vmax.f32 %v1173_v3, 0.0  ;;  %v5539_v47 = vpack.c.bf16 %v1313_v27, %v1309_v38  ;;  %v5541_v55 = vpack.c.bf16 %v1315_v31, %v1311_v36 }
 0x1c3   : > { %v985_v2 = vpop.f32.mrf.mxu0  ;;  %v1178_v35 = vpop.f32.mrf.mxu1  ;;  %v1177_v36 = vadd.f32 %v1176_v56, %v5365_v46 }
 0x1c4   : > { %v5535_v59 = vpack.c.bf16 %v1314_v52, %v1310_v1  ;;  %v5537_v42 = vpack.c.bf16 %v1316_v37, %v1312_v41  ;;  %2644 = vmatpush2.bf16.msra.mxu0 %v4815_v21  ;;  %6592 = vst [vmem:[#allocation17_spill] sm:$0xff] %v5539_v47  ;;  %6593 = vst [vmem:[#allocation18_spill] sm:$0xff] %v5541_v55  ;;  %v986_v48 = vadd.f32 %v985_v2, %v5353_v43 }
 0x1c5   : > { %v987_v17 = vpop.f32.mrf.mxu0  ;;  %v1180_v49 = vpop.f32.mrf.mxu1  ;;  %2837 = vmatpush2.bf16.msra.mxu1 %v4818_v0  ;;  %v1179_v50 = vadd.f32 %v1178_v35, %v5357_v44  ;;  %v984_v37 = vadd.f32 %v983_v51, %v5361_v45  ;;  %v1319_v56 = vmax.f32 %v1177_v36, 0.0 }
 0x1c6   : > { %v988_v61 = vadd.f32 %v987_v17, %v5361_v45  ;;  %v1181_v62 = vadd.f32 %v1180_v49, %v5365_v46  ;;  %2339 = vmatprep.mubr.bf16.mxu0 %v5535_v59  ;;  %2532 = vmatprep.mubr.bf16.mxu1 %v5537_v42  ;;  %v1318_v31 = vmax.f32 %v986_v48, 0.0 }
 0x1c7   : > { %v989_v38 = vpop.f32.mrf.mxu0  ;;  %v1182_v63 = vpop.f32.mrf.mxu1  ;;  %2340 = vmatmul.mubr.bf16.gmra.mxu0 %v5539_v47  ;;  %2533 = vmatmul.mubr.bf16.gmra.mxu1 %v5541_v55  ;;  %v1320_v0 = vmax.f32 %v1179_v50, 0.0  ;;  %v1317_v41 = vmax.f32 %v984_v37, 0.0 }
 0x1c8   : > { %v990_v35 = vadd.f32 %v989_v38, %v5353_v43  ;;  %v1183_v39 = vadd.f32 %v1182_v63, %v5357_v44  ;;  %v1321_v60 = vmax.f32 %v988_v61, 0.0  ;;  %v1323_v3 = vmax.f32 %v1181_v62, 0.0 }
 0x1c9   : > { %v993_v21 = vpop.f32.mrf.mxu0  ;;  %v1186_v27 = vpop.f32.mrf.mxu1 }
 0x1ca   : > { %v1322_v1 = vmax.f32 %v990_v35, 0.0  ;;  %v1324_v51 = vmax.f32 %v1183_v39, 0.0  ;;  %v5559_v55 = vpack.c.bf16 %v1321_v60, %v1317_v41  ;;  %v5561_v38 = vpack.c.bf16 %v1323_v3, %v1319_v56 }
 0x1cb   : > { %v995_v52 = vpop.f32.mrf.mxu0  ;;  %v1188_v2 = vpop.f32.mrf.mxu1  ;;  %v994_v36 = vadd.f32 %v993_v21, %v5361_v45  ;;  %v1187_v35 = vadd.f32 %v1186_v27, %v5365_v46 }
 0x1cc   : > { %v5555_v17 = vpack.c.bf16 %v1322_v1, %v1318_v31  ;;  %v5557_v49 = vpack.c.bf16 %v1324_v51, %v1320_v0  ;;  %6596 = vst [vmem:[#allocation21_spill] sm:$0xff] %v5559_v55  ;;  %6597 = vst [vmem:[#allocation22_spill] sm:$0xff] %v5561_v38  ;;  %v996_v61 = vadd.f32 %v995_v52, %v5353_v43 }
 0x1cd   : > { %v997_v62 = vpop.f32.mrf.mxu0  ;;  %v1190_v63 = vpop.f32.mrf.mxu1  ;;  %v1189_v48 = vadd.f32 %v1188_v2, %v5357_v44  ;;  %v1327_v27 = vmax.f32 %v1187_v35, 0.0 }
 0x1ce   : > { %6594 = vst [vmem:[#allocation19_spill] sm:$0xff] %v5555_v17  ;;  %6595 = vst [vmem:[#allocation20_spill] sm:$0xff] %v5557_v49  ;;  %v998_v50 = vadd.f32 %v997_v62, %v5361_v45  ;;  %v1191_v37 = vadd.f32 %v1190_v63, %v5365_v46  ;;  %2349 = vmatprep.mubr.bf16.mxu0 %v5555_v17  ;;  %2542 = vmatprep.mubr.bf16.mxu1 %v5557_v49  ;;  %v1326_v56 = vmax.f32 %v996_v61, 0.0 }
 0x1cf   : > { %v999_v39 = vpop.f32.mrf.mxu0  ;;  %v1192_v60 = vpop.f32.mrf.mxu1  ;;  %2350 = vmatmul.mubr.bf16.gmra.mxu0 %v5559_v55  ;;  %2543 = vmatmul.mubr.bf16.gmra.mxu1 %v5561_v38  ;;  %v1328_v52 = vmax.f32 %v1189_v48, 0.0  ;;  %v1325_v62 = vmax.f32 %v994_v36, 0.0 }
 0x1d0   : > { %v1000_v3 = vadd.f32 %v999_v39, %v5353_v43  ;;  %v1193_v31 = vadd.f32 %v1192_v60, %v5357_v44  ;;  %v1329_v0 = vmax.f32 %v998_v50, 0.0  ;;  %v1331_v1 = vmax.f32 %v1191_v37, 0.0 }
 0x1d1   : > { %v1003_v51 = vpop.f32.mrf.mxu0  ;;  %v1196_v41 = vpop.f32.mrf.mxu1 }
 0x1d2   : > { %v1330_v2 = vmax.f32 %v1000_v3, 0.0  ;;  %v1332_v21 = vmax.f32 %v1193_v31, 0.0  ;;  %v5579_v38 = vpack.c.bf16 %v1329_v0, %v1325_v62  ;;  %v5581_v39 = vpack.c.bf16 %v1331_v1, %v1327_v27 }
 0x1d3   : > { %v1005_v63 = vpop.f32.mrf.mxu0  ;;  %v1198_v49 = vpop.f32.mrf.mxu1  ;;  %v1004_v35 = vadd.f32 %v1003_v51, %v5361_v45  ;;  %v1197_v3 = vadd.f32 %v1196_v41, %v5365_v46  ;;  %v4823_v41 = vld [vmem:[#allocation10 + $0xf8] sm:$0xff]  }
 0x1d4   : > { %v5575_v17 = vpack.c.bf16 %v1330_v2, %v1326_v56  ;;  %v5577_v55 = vpack.c.bf16 %v1332_v21, %v1328_v52  ;;  %6600 = vst [vmem:[#allocation25_spill] sm:$0xff] %v5579_v38  ;;  %6601 = vst [vmem:[#allocation26_spill] sm:$0xff] %v5581_v39  ;;  %v1006_v50 = vadd.f32 %v1005_v63, %v5353_v43  ;;  %4328 = vmatprep.subr.bf16.mxu1 %v4823_v41 }
 0x1d5   : > { %v1007_v37 = vpop.f32.mrf.mxu0  ;;  %v1200_v60 = vpop.f32.mrf.mxu1  ;;  %v1199_v61 = vadd.f32 %v1198_v49, %v5357_v44 }
 0x1d6   : > { %6598 = vst [vmem:[#allocation23_spill] sm:$0xff] %v5575_v17  ;;  %6599 = vst [vmem:[#allocation24_spill] sm:$0xff] %v5577_v55  ;;  %v1008_v48 = vadd.f32 %v1007_v37, %v5361_v45  ;;  %v1201_v36 = vadd.f32 %v1200_v60, %v5365_v46  ;;  %2359 = vmatprep.mubr.bf16.mxu0 %v5575_v17  ;;  %2552 = vmatprep.mubr.bf16.mxu1 %v5577_v55  ;;  %v1334_v62 = vmax.f32 %v1006_v50, 0.0  ;;  %v4821_v37 = vld [vmem:[#allocation10 + $0x78] sm:$0xff]  }
 0x1d7   : > { %v1009_v31 = vpop.f32.mrf.mxu0  ;;  %v1202_v0 = vpop.f32.mrf.mxu1  ;;  %2360 = vmatmul.mubr.bf16.gmra.mxu0 %v5579_v38  ;;  %2553 = vmatmul.mubr.bf16.gmra.mxu1 %v5581_v39  ;;  %v1336_v27 = vmax.f32 %v1199_v61, 0.0  ;;  %v1333_v60 = vmax.f32 %v1004_v35, 0.0  ;;  %v1335_v55 = vmax.f32 %v1197_v3, 0.0 }
 0x1d8   : > { %v1010_v49 = vadd.f32 %v1009_v31, %v5353_v43  ;;  %v1203_v1 = vadd.f32 %v1202_v0, %v5357_v44  ;;  %v1337_v56 = vmax.f32 %v1008_v48, 0.0  ;;  %v1339_v52 = vmax.f32 %v1201_v36, 0.0  ;;  %4216 = vmatprep.subr.bf16.mxu0 %v4821_v37 }
 0x1d9   : > { %v1013_v2 = vpop.f32.mrf.mxu0  ;;  %v1206_v21 = vpop.f32.mrf.mxu1 }
 0x1da   : > { %v1338_v63 = vmax.f32 %v1010_v49, 0.0  ;;  %v1340_v51 = vmax.f32 %v1203_v1, 0.0  ;;  %v5599_v31 = vpack.c.bf16 %v1337_v56, %v1333_v60  ;;  %v5601_v48 = vpack.c.bf16 %v1339_v52, %v1335_v55 }
 0x1db   : > { %v1015_v17 = vpop.f32.mrf.mxu0  ;;  %v1208_v38 = vpop.f32.mrf.mxu1  ;;  %v1014_v49 = vadd.f32 %v1013_v2, %v5361_v45  ;;  %v1207_v55 = vadd.f32 %v1206_v21, %v5365_v46 }
 0x1dc   : > { %v5595_v47 = vpack.c.bf16 %v1338_v63, %v1334_v62  ;;  %v5597_v39 = vpack.c.bf16 %v1340_v51, %v1336_v27  ;;  %6603 = vst [vmem:[#allocation28_spill] sm:$0xff] %v5599_v31  ;;  %6604 = vst [vmem:[#allocation29_spill] sm:$0xff] %v5601_v48  ;;  %v1016_v50 = vadd.f32 %v1015_v17, %v5353_v43 }
 0x1dd   : > { %v1017_v61 = vpop.f32.mrf.mxu0  ;;  %v1210_v36 = vpop.f32.mrf.mxu1  ;;  %v1209_v0 = vadd.f32 %v1208_v38, %v5357_v44  ;;  %v1341_v60 = vmax.f32 %v1014_v49, 0.0  ;;  %v1343_v21 = vmax.f32 %v1207_v55, 0.0 }
 0x1de   : > { %6602 = vst [vmem:[#allocation27_spill] sm:$0xff] %v5597_v39  ;;  %v1018_v35 = vadd.f32 %v1017_v61, %v5361_v45  ;;  %v1211_v3 = vadd.f32 %v1210_v36, %v5365_v46  ;;  %2369 = vmatprep.mubr.bf16.mxu0 %v5595_v47  ;;  %2562 = vmatprep.mubr.bf16.mxu1 %v5597_v39  ;;  %v1342_v51 = vmax.f32 %v1016_v50, 0.0 }
 0x1df   : > { %v1019_v1 = vpop.f32.mrf.mxu0  ;;  %v1212_v56 = vpop.f32.mrf.mxu1  ;;  %2370 = vmatmul.mubr.bf16.gmra.mxu0 %v5599_v31  ;;  %2563 = vmatmul.mubr.bf16.gmra.mxu1 %v5601_v48  ;;  %v1344_v37 = vmax.f32 %v1209_v0, 0.0 }
 0x1e0   : > { %v1020_v17 = vadd.f32 %v1019_v1, %v5353_v43  ;;  %v1213_v38 = vadd.f32 %v1212_v56, %v5357_v44  ;;  %v1345_v52 = vmax.f32 %v1018_v35, 0.0  ;;  %v1347_v62 = vmax.f32 %v1211_v3, 0.0 }
 0x1e1   : > { %v1023_v27 = vpop.f32.mrf.mxu0  ;;  %v1216_v63 = vpop.f32.mrf.mxu1 }
 0x1e2   : > { %v1346_v41 = vmax.f32 %v1020_v17, 0.0  ;;  %v1348_v2 = vmax.f32 %v1213_v38, 0.0  ;;  %v5619_v48 = vpack.c.bf16 %v1345_v52, %v1341_v60  ;;  %v5621_v1 = vpack.c.bf16 %v1347_v62, %v1343_v21 }
 0x1e3   : > { %v1025_v61 = vpop.f32.mrf.mxu0  ;;  %v1218_v36 = vpop.f32.mrf.mxu1  ;;  %v1024_v55 = vadd.f32 %v1023_v27, %v5361_v45  ;;  %v1217_v17 = vadd.f32 %v1216_v63, %v5365_v46 }
 0x1e4   : > { %v5615_v39 = vpack.c.bf16 %v1346_v41, %v1342_v51  ;;  %v5617_v31 = vpack.c.bf16 %v1348_v2, %v1344_v37  ;;  %6607 = vst [vmem:[#allocation32_spill] sm:$0xff] %v5619_v48  ;;  %6608 = vst [vmem:[#allocation33_spill] sm:$0xff] %v5621_v1  ;;  %v1026_v35 = vadd.f32 %v1025_v61, %v5353_v43 }
 0x1e5   : > { %v1027_v3 = vpop.f32.mrf.mxu0  ;;  %v1220_v56 = vpop.f32.mrf.mxu1  ;;  %v1219_v50 = vadd.f32 %v1218_v36, %v5357_v44  ;;  %v1351_v63 = vmax.f32 %v1217_v17, 0.0 }
 0x1e6   : > { %6605 = vst [vmem:[#allocation30_spill] sm:$0xff] %v5615_v39  ;;  %6606 = vst [vmem:[#allocation31_spill] sm:$0xff] %v5617_v31  ;;  %v1028_v0 = vadd.f32 %v1027_v3, %v5361_v45  ;;  %v1221_v49 = vadd.f32 %v1220_v56, %v5365_v46  ;;  %2379 = vmatprep.mubr.bf16.mxu0 %v5615_v39  ;;  %2572 = vmatprep.mubr.bf16.mxu1 %v5617_v31  ;;  %v1350_v21 = vmax.f32 %v1026_v35, 0.0 }
 0x1e7   : > { %v1029_v38 = vpop.f32.mrf.mxu0  ;;  %v1222_v52 = vpop.f32.mrf.mxu1  ;;  %2380 = vmatmul.mubr.bf16.gmra.mxu0 %v5619_v48  ;;  %2573 = vmatmul.mubr.bf16.gmra.mxu1 %v5621_v1  ;;  %v1352_v61 = vmax.f32 %v1219_v50, 0.0  ;;  %v1349_v3 = vmax.f32 %v1024_v55, 0.0 }
 0x1e8   : > { %v1030_v62 = vadd.f32 %v1029_v38, %v5353_v43  ;;  %v1223_v51 = vadd.f32 %v1222_v52, %v5357_v44  ;;  %v1353_v37 = vmax.f32 %v1028_v0, 0.0  ;;  %v1355_v41 = vmax.f32 %v1221_v49, 0.0 }
 0x1e9   : > { %v1033_v2 = vpop.f32.mrf.mxu0  ;;  %v1226_v60 = vpop.f32.mrf.mxu1 }
 0x1ea   : > { %v1354_v36 = vmax.f32 %v1030_v62, 0.0  ;;  %v1356_v27 = vmax.f32 %v1223_v51, 0.0  ;;  %v5639_v1 = vpack.c.bf16 %v1353_v37, %v1349_v3  ;;  %v5641_v38 = vpack.c.bf16 %v1355_v41, %v1351_v63 }
 0x1eb   : > { %v1035_v56 = vpop.f32.mrf.mxu0  ;;  %v1228_v31 = vpop.f32.mrf.mxu1  ;;  %v1034_v17 = vadd.f32 %v1033_v2, %v5361_v45  ;;  %v1227_v62 = vadd.f32 %v1226_v60, %v5365_v46 }
 0x1ec   : > { %v5635_v39 = vpack.c.bf16 %v1354_v36, %v1350_v21  ;;  %v5637_v48 = vpack.c.bf16 %v1356_v27, %v1352_v61  ;;  %6611 = vst [vmem:[#allocation36_spill] sm:$0xff] %v5639_v1  ;;  %6612 = vst [vmem:[#allocation37_spill] sm:$0xff] %v5641_v38  ;;  %v1036_v0 = vadd.f32 %v1035_v56, %v5353_v43 }
 0x1ed   : > { %v1037_v49 = vpop.f32.mrf.mxu0  ;;  %v1230_v52 = vpop.f32.mrf.mxu1  ;;  %v1229_v35 = vadd.f32 %v1228_v31, %v5357_v44  ;;  %v1359_v60 = vmax.f32 %v1227_v62, 0.0 }
 0x1ee   : > { %6609 = vst [vmem:[#allocation34_spill] sm:$0xff] %v5635_v39  ;;  %6610 = vst [vmem:[#allocation35_spill] sm:$0xff] %v5637_v48  ;;  %v1038_v50 = vadd.f32 %v1037_v49, %v5361_v45  ;;  %v1231_v55 = vadd.f32 %v1230_v52, %v5365_v46  ;;  %2389 = vmatprep.mubr.bf16.mxu0 %v5635_v39  ;;  %2582 = vmatprep.mubr.bf16.mxu1 %v5637_v48  ;;  %v1358_v3 = vmax.f32 %v1036_v0, 0.0 }
 0x1ef   : > { %v1039_v51 = vpop.f32.mrf.mxu0  ;;  %v1232_v37 = vpop.f32.mrf.mxu1  ;;  %2390 = vmatmul.mubr.bf16.gmra.mxu0 %v5639_v1  ;;  %2583 = vmatmul.mubr.bf16.gmra.mxu1 %v5641_v38  ;;  %v1360_v63 = vmax.f32 %v1229_v35, 0.0  ;;  %v1357_v49 = vmax.f32 %v1034_v17, 0.0 }
 0x1f0   : > { %v1040_v31 = vadd.f32 %v1039_v51, %v5353_v43  ;;  %v1233_v41 = vadd.f32 %v1232_v37, %v5357_v44  ;;  %v1361_v21 = vmax.f32 %v1038_v50, 0.0  ;;  %v1363_v61 = vmax.f32 %v1231_v55, 0.0 }
 0x1f1   : > { %v1043_v36 = vpop.f32.mrf.mxu0  ;;  %v1236_v27 = vpop.f32.mrf.mxu1 }
 0x1f2   : > { %v1362_v56 = vmax.f32 %v1040_v31, 0.0  ;;  %v1364_v2 = vmax.f32 %v1233_v41, 0.0  ;;  %v5659_v38 = vpack.c.bf16 %v1361_v21, %v1357_v49  ;;  %v5661_v51 = vpack.c.bf16 %v1363_v61, %v1359_v60 }
 0x1f3   : > { %v1045_v52 = vpop.f32.mrf.mxu0  ;;  %v1238_v48 = vpop.f32.mrf.mxu1  ;;  %v1044_v62 = vadd.f32 %v1043_v36, %v5361_v45  ;;  %v1237_v31 = vadd.f32 %v1236_v27, %v5365_v46 }
 0x1f4   : > { %v5655_v39 = vpack.c.bf16 %v1362_v56, %v1358_v3  ;;  %v5657_v1 = vpack.c.bf16 %v1364_v2, %v1360_v63  ;;  %v1046_v50 = vadd.f32 %v1045_v52, %v5353_v43  ;;  %v1239_v0 = vadd.f32 %v1238_v48, %v5357_v44 }
 0x1f5   : > { %v1047_v55 = vpop.f32.mrf.mxu0  ;;  %v1240_v37 = vpop.f32.mrf.mxu1  ;;  %v1365_v52 = vmax.f32 %v1044_v62, 0.0  ;;  %v4835_v62 = vld [vmem:[#allocation10 + $0xa8] sm:$0xff]  }
 0x1f6   : > { %v1048_v35 = vadd.f32 %v1047_v55, %v5361_v45  ;;  %v1241_v17 = vadd.f32 %v1240_v37, %v5365_v46  ;;  %2399 = vmatprep.mubr.bf16.mxu0 %v5655_v39  ;;  %2592 = vmatprep.mubr.bf16.mxu1 %v5657_v1  ;;  %v1366_v56 = vmax.f32 %v1046_v50, 0.0  ;;  %v1368_v2 = vmax.f32 %v1239_v0, 0.0  ;;  %v4825_v50 = vld [vmem:[#allocation10 + $0x70] sm:$0xff]  }
 0x1f7   : > { %v1049_v41 = vpop.f32.mrf.mxu0  ;;  %v1242_v21 = vpop.f32.mrf.mxu1  ;;  %2400 = vmatmul.mubr.bf16.gmra.mxu0 %v5659_v38  ;;  %2593 = vmatmul.mubr.bf16.gmra.mxu1 %v5661_v51  ;;  %v1367_v45 = vmax.f32 %v1237_v31, 0.0  ;;  %v4827_v37 = vld [vmem:[#allocation10 + $0xf0] sm:$0xff]   ;;  %v4834_v31 = vld [vmem:[#allocation10 + $0x58] sm:$0xff]  }
 0x1f8   : > { %v1050_v48 = vadd.f32 %v1049_v41, %v5353_v43  ;;  %v1243_v61 = vadd.f32 %v1242_v21, %v5357_v44  ;;  %v1369_v3 = vmax.f32 %v1048_v35, 0.0  ;;  %v1371_v63 = vmax.f32 %v1241_v17, 0.0  ;;  %v4822_v43 = vld [vmem:[#allocation10 + $0x38] sm:$0xff]   ;;  %v4826_v0 = vld [vmem:[#allocation10 + $0x30] sm:$0xff]   ;;  %v4830_v17 = vld [vmem:[#allocation10 + $0x28] sm:$0xff]  }
 0x1f9   : > { %v4824_v44 = vld [vmem:[#allocation10 + $0xb8] sm:$0xff]   ;;  %v4828_v35 = vld [vmem:[#allocation10 + $0xb0] sm:$0xff]  }
 0x1fa   : > { %v1370_v49 = vmax.f32 %v1050_v48, 0.0  ;;  %v1372_v60 = vmax.f32 %v1243_v61, 0.0  ;;  %v5679_v27 = vpack.c.bf16 %v1369_v3, %v1365_v52  ;;  %v5681_v55 = vpack.c.bf16 %v1371_v63, %v1367_v45  ;;  %v4836_v41 = vld [vmem:[#allocation10 + $0x18] sm:$0xff]   ;;  %v4837_v21 = vld [vmem:[#allocation10 + $0x50] sm:$0xff]   ;;  %v4840_v48 = vld [vmem:[#allocation10 + $0x8] sm:$0xff]  }
 0x1fb   : > { %v4841_v61 = vld [vmem:[#allocation10 + $0x40] sm:$0xff]  }
 0x1fc   : > { %v5675_v36 = vpack.c.bf16 %v1370_v49, %v1366_v56  ;;  %v5677_v46 = vpack.c.bf16 %v1372_v60, %v1368_v2  ;;  %v6620_v3 = vld [vmem:[#allocation24_spill] sm:$0xff] }
 0x1fe   : > { %2409 = vmatprep.mubr.bf16.mxu0 %v5675_v36  ;;  %2602 = vmatprep.mubr.bf16.mxu1 %v5677_v46 }
 0x1ff   : > { %2410 = vmatmul.mubr.bf16.gmra.mxu0 %v5679_v27  ;;  %2603 = vmatmul.mubr.bf16.gmra.mxu1 %v5681_v55 }
 0x200   : > { %2645 = vmatprep.mubr.bf16.mxu0 %v5375_v9  ;;  %2838 = vmatprep.mubr.bf16.mxu1 %v5377_v10  ;;  %v4829_v9 = vld [vmem:[#allocation10 + $0x68] sm:$0xff]  }
 0x201   : > { %v4833_v10 = vld [vmem:[#allocation10 + $0xe8] sm:$0xff]  }
 0x207   : > { %2646 = vmatmul.mubr.bf16.vlgmr.msra.gmra.mxu0 %v5379_v13  ;;  %2839 = vmatmul.mubr.bf16.vlgmr.msra.gmra.mxu1 %v5381_v14  ;;  %v4831_v13 = vld [vmem:[#allocation10 + $0x60] sm:$0xff]  }
 0x208   : > { %2655 = vmatprep.mubr.bf16.mxu0 %v5395_v53  ;;  %2848 = vmatprep.mubr.bf16.mxu1 %v5397_v54  ;;  %v4843_v14 = vld [vmem:[#allocation10 + $0xe0] sm:$0xff]  }
 0x209   : > { %4217 = vmatpush3.bf16.msra.mxu0 %v4822_v43  ;;  %4329 = vmatpush3.bf16.msra.mxu1 %v4824_v44  ;;  %v4832_v53 = vld [vmem:[#allocation10 + $0x20] sm:$0xff]   ;;  %v6621_v44 = vld [vmem:[#allocation25_spill] sm:$0xff] }
 0x20a   : > { %4218 = vmatprep.subr.bf16.mxu0 %v4825_v50  ;;  %4330 = vmatprep.subr.bf16.mxu1 %v4827_v37  ;;  %v4844_v54 = vld [vmem:[#allocation10 + $0xa0] sm:$0xff]   ;;  %v6622_v50 = vld [vmem:[#allocation26_spill] sm:$0xff]  ;;  %v6623_v37 = vld [vmem:[#allocation27_spill] sm:$0xff] }
 0x20d   : > { %4219 = vmatpush3.bf16.msra.mxu0 %v4826_v0  ;;  %4331 = vmatpush3.bf16.msra.mxu1 %v4828_v35 }
 0x20e   : > { %4220 = vmatprep.subr.bf16.mxu0 %v4829_v9  ;;  %4332 = vmatprep.subr.bf16.mxu1 %v4833_v10 }
 0x20f   : > { %2656 = vmatmul.mubr.bf16.gmra.mxu0 %v5399_v57  ;;  %2849 = vmatmul.mubr.bf16.gmra.mxu1 %v5401_v58  ;;  %v4838_v57 = vld [vmem:[#allocation10 + $0x10] sm:$0xff]   ;;  %v4839_v58 = vld [vmem:[#allocation10 + $0x48] sm:$0xff]  }
 0x210   : > { %2665 = vmatprep.mubr.bf16.mxu0 %v5415_v29  ;;  %2858 = vmatprep.mubr.bf16.mxu1 %v5417_v30  ;;  %v4845_v29 = vld [vmem:[#allocation10 + $0xd8] sm:$0xff]  }
 0x211   : > { %4221 = vmatpush3.bf16.msra.mxu0 %v4830_v17  ;;  %4333 = vmatpush3.bf16.msra.mxu1 %v4835_v62  ;;  %v4846_v30 = vld [vmem:[#allocation10 + $0x98] sm:$0xff]  }
 0x212   : > { %4222 = vmatprep.subr.bf16.mxu0 %v4831_v13  ;;  %4334 = vmatprep.subr.bf16.mxu1 %v4843_v14 }
 0x215   : > { %4223 = vmatpush3.bf16.msra.mxu0 %v4832_v53  ;;  %4335 = vmatpush3.bf16.msra.mxu1 %v4844_v54  ;;  %v6624_v53 = vld [vmem:[#allocation28_spill] sm:$0xff]  ;;  %v6626_v54 = vld [vmem:[#allocation30_spill] sm:$0xff] }
 0x216   : > { %4224 = vmatprep.subr.bf16.mxu0 %v4834_v31  ;;  %4336 = vmatprep.subr.bf16.mxu1 %v4845_v29  ;;  %v6627_v31 = vld [vmem:[#allocation31_spill] sm:$0xff] }
 0x217   : > { %2666 = vmatmul.mubr.bf16.gmra.mxu0 %v5419_v33  ;;  %2859 = vmatmul.mubr.bf16.gmra.mxu1 %v5421_v34  ;;  %v4842_v33 = vld [vmem:[#allocation10] sm:$0xff]   ;;  %v4847_v34 = vld [vmem:[#allocation10 + $0xd0] sm:$0xff]  }
 0x218   : > { %2675 = vmatprep.mubr.bf16.mxu0 %v5435_v18  ;;  %2868 = vmatprep.mubr.bf16.mxu1 %v5437_v19  ;;  %v4848_v18 = vld [vmem:[#allocation10 + $0x90] sm:$0xff]   ;;  %v4849_v19 = vld [vmem:[#allocation10 + $0xc8] sm:$0xff]  }
 0x219   : > { %4225 = vmatpush3.bf16.msra.mxu0 %v4836_v41  ;;  %4337 = vmatpush3.bf16.msra.mxu1 %v4846_v30 }
 0x21a   : > { %4226 = vmatprep.subr.bf16.mxu0 %v4837_v21  ;;  %4338 = vmatprep.subr.bf16.mxu1 %v4847_v34  ;;  %v6629_v34 = vld [vmem:[#allocation33_spill] sm:$0xff] }
 0x21d   : > { %4227 = vmatpush3.bf16.msra.mxu0 %v4838_v57  ;;  %4339 = vmatpush3.bf16.msra.mxu1 %v4848_v18  ;;  %v6630_v18 = vld [vmem:[#allocation34_spill] sm:$0xff] }
 0x21e   : > { %4228 = vmatprep.subr.bf16.mxu0 %v4839_v58  ;;  %4340 = vmatprep.subr.bf16.mxu1 %v4849_v19  ;;  %v6631_v19 = vld [vmem:[#allocation35_spill] sm:$0xff] }
 0x21f   : > { %2676 = vmatmul.mubr.bf16.gmra.mxu0 %v5439_v22  ;;  %2869 = vmatmul.mubr.bf16.gmra.mxu1 %v5441_v23  ;;  %v4850_v22 = vld [vmem:[#allocation10 + $0x88] sm:$0xff]  }
 0x220   : > { %2685 = vmatprep.mubr.bf16.mxu0 %v5455_v7  ;;  %2878 = vmatprep.mubr.bf16.mxu1 %v5457_v8  ;;  %v6613_v8 = vld [vmem:[#allocation17_spill] sm:$0xff] }
 0x221   : > { %4229 = vmatpush3.bf16.msra.mxu0 %v4840_v48  ;;  %4341 = vmatpush3.bf16.msra.mxu1 %v4850_v22 }
 0x222   : > { %4230 = vmatprep.subr.bf16.mxu0 %v4841_v61 }
 0x225   : > { %4231 = vmatpush3.bf16.msra.mxu0 %v4842_v33  ;;  %v6628_v33 = vld [vmem:[#allocation32_spill] sm:$0xff] }
 0x227   : > { %2686 = vmatmul.mubr.bf16.gmra.mxu0 %v5459_v15  ;;  %2879 = vmatmul.mubr.bf16.gmra.mxu1 %v5461_v16  ;;  %v6614_v15 = vld [vmem:[#allocation18_spill] sm:$0xff]  ;;  %v6615_v16 = vld [vmem:[#allocation19_spill] sm:$0xff] }
 0x228   : > { %2695 = vmatprep.mubr.bf16.mxu0 %v5475_v4  ;;  %2888 = vmatprep.mubr.bf16.mxu1 %v5477_v5  ;;  %v6616_v4 = vld [vmem:[#allocation20_spill] sm:$0xff] }
 0x22f   : > { %2696 = vmatmul.mubr.bf16.gmra.mxu0 %v5479_v12  ;;  %2889 = vmatmul.mubr.bf16.gmra.mxu1 %v5481_v20  ;;  %v4851_v20 = vld [vmem:[#allocation10 + $0xc0] sm:$0xff]  }
 0x230   : > { %2705 = vmatprep.mubr.bf16.mxu0 %v5495_v6  ;;  %2898 = vmatprep.mubr.bf16.mxu1 %v5497_v11 }
 0x231   : > { %4342 = vmatprep.subr.bf16.mxu1 %v4851_v20 }
 0x237   : > { %2706 = vmatmul.mubr.bf16.gmra.mxu0 %v5499_v25  ;;  %2899 = vmatmul.mubr.bf16.gmra.mxu1 %v5501_v26  ;;  %v4852_v25 = vld [vmem:[#allocation10 + $0x80] sm:$0xff]  }
 0x238   : > { %2715 = vmatprep.mubr.bf16.mxu0 %v5515_v24  ;;  %2908 = vmatprep.mubr.bf16.mxu1 %v5517_v28 }
 0x239   : > { %4343 = vmatpush3.bf16.msra.mxu1 %v4852_v25  ;;  %v5822_v25 = vld [vmem:[%s6534_s4] sm:$0xf] }
 0x23a   : > { %6632 = vst [vmem:[#allocation17_spill] sm:$0xff] %v5822_v25 }
 0x23f   : > { %2716 = vmatmul.mubr.bf16.gmra.mxu0 %v5519_v32  ;;  %2909 = vmatmul.mubr.bf16.gmra.mxu1 %v5521_v40  ;;  %v6617_v40 = vld [vmem:[#allocation21_spill] sm:$0xff] }
 0x240   : > { %2725 = vmatprep.mubr.bf16.mxu0 %v5535_v59  ;;  %2918 = vmatprep.mubr.bf16.mxu1 %v5537_v42  ;;  %v6618_v59 = vld [vmem:[#allocation22_spill] sm:$0xff]  ;;  %v6619_v42 = vld [vmem:[#allocation23_spill] sm:$0xff] }
 0x247   : > { %v5721_v23 = vpop.f32.mrf.mxu0  ;;  %v5723_v7 = vpop.f32.mrf.mxu1  ;;  %2726 = vmatmul.mubr.bf16.gmra.mxu0 %v6613_v8  ;;  %2919 = vmatmul.mubr.bf16.gmra.mxu1 %v6614_v15 }
 0x248   : > { %2735 = vmatprep.mubr.bf16.mxu0 %v6615_v16  ;;  %2928 = vmatprep.mubr.bf16.mxu1 %v6616_v4 }
 0x249   : > { %v5729_v5 = vpop.f32.mrf.mxu0  ;;  %v5731_v12 = vpop.f32.mrf.mxu1 }
 0x24b   : > { %v5733_v6 = vpop.f32.mrf.mxu0  ;;  %v5735_v11 = vpop.f32.mrf.mxu1 }
 0x24d   : > { %v2267_v26 = vpop.f32.mrf.mxu0  ;;  %v5737_v24 = vpop.f32.mrf.mxu1 }
 0x24f   : > { %v5739_v28 = vpop.f32.mrf.mxu0  ;;  %v5741_v32 = vpop.f32.mrf.mxu1  ;;  %2736 = vmatmul.mubr.bf16.gmra.mxu0 %v6617_v40  ;;  %2929 = vmatmul.mubr.bf16.gmra.mxu1 %v6618_v59 }
 0x250   : > { %2745 = vmatprep.mubr.bf16.mxu0 %v6619_v42  ;;  %2938 = vmatprep.mubr.bf16.mxu1 %v6620_v3  ;;  %v6633_v42 = vld [vmem:[#allocation36_spill] sm:$0xff]  ;;  %v6634_v3 = vld [vmem:[#allocation37_spill] sm:$0xff] }
 0x251   : > { %v5747_v63 = vpop.f32.mrf.mxu0  ;;  %v5749_v56 = vpop.f32.mrf.mxu1 }
 0x253   : > { %v5751_v2 = vpop.f32.mrf.mxu0  ;;  %v5753_v49 = vpop.f32.mrf.mxu1 }
 0x255   : > { %v5755_v60 = vpop.f32.mrf.mxu0  ;;  %v5757_v52 = vpop.f32.mrf.mxu1 }
 0x257   : > { %v5759_v45 = vpop.f32.mrf.mxu0  ;;  %v5761_v43 = vpop.f32.mrf.mxu1  ;;  %2746 = vmatmul.mubr.bf16.gmra.mxu0 %v6621_v44  ;;  %2939 = vmatmul.mubr.bf16.gmra.mxu1 %v6622_v50  ;;  %v6635_v44 = vld [vmem:[#allocation16_spill] sm:$0xff] }
 0x258   : > { %2755 = vmatprep.mubr.bf16.mxu0 %v5595_v47  ;;  %2948 = vmatprep.mubr.bf16.mxu1 %v6623_v37  ;;  %v6625_v47 = vld [vmem:[#allocation29_spill] sm:$0xff]  ;;  %v6636_v50 = vsub.s32 1, %v6635_v44 }
 0x259   : > { %v5767_v0 = vpop.f32.mrf.mxu0  ;;  %v5769_v35 = vpop.f32.mrf.mxu1 }
 0x25a   : > { %v5833_v37 = vrot.slane %v5822_v25, %v6636_v50 }
 0x25b   : > { %v5771_v9 = vpop.f32.mrf.mxu0  ;;  %v5773_v10 = vpop.f32.mrf.mxu1 }
 0x25d   : > { %v5775_v17 = vpop.f32.mrf.mxu0  ;;  %v5777_v62 = vpop.f32.mrf.mxu1 }
 0x25f   : > { %v5779_v13 = vpop.f32.mrf.mxu0  ;;  %v5781_v14 = vpop.f32.mrf.mxu1  ;;  %2756 = vmatmul.mubr.bf16.gmra.mxu0 %v6624_v53  ;;  %2949 = vmatmul.mubr.bf16.gmra.mxu1 %v6625_v47 }
 0x260   : > { %2765 = vmatprep.mubr.bf16.mxu0 %v6626_v54  ;;  %2958 = vmatprep.mubr.bf16.mxu1 %v6627_v31  ;;  %v2268_v54 = vadd.f32 %v2267_v26, %v5833_v37 }
 0x261   : > { %v5787_v41 = vpop.f32.mrf.mxu0  ;;  %v5789_v21 = vpop.f32.mrf.mxu1 }
 0x263   : > { %v5791_v57 = vpop.f32.mrf.mxu0  ;;  %v5793_v58 = vpop.f32.mrf.mxu1 }
 0x265   : > { %v5795_v29 = vpop.f32.mrf.mxu0  ;;  %v5797_v30 = vpop.f32.mrf.mxu1 }
 0x267   : > { %v5799_v48 = vpop.f32.mrf.mxu0  ;;  %v5801_v61 = vpop.f32.mrf.mxu1  ;;  %2766 = vmatmul.mubr.bf16.gmra.mxu0 %v6628_v33  ;;  %2959 = vmatmul.mubr.bf16.gmra.mxu1 %v6629_v34  ;;  %v2264_v34 = vadd.f32 %v5729_v5, %v5833_v37 }
 0x268   : > { %2775 = vmatprep.mubr.bf16.mxu0 %v6630_v18  ;;  %2968 = vmatprep.mubr.bf16.mxu1 %v6631_v19 }
 0x269   : > { %v5807_v22 = vpop.f32.mrf.mxu0  ;;  %v5809_v8 = vpop.f32.mrf.mxu1  ;;  %v2457_v5 = vadd.f32 %v5731_v12, %v2264_v34 }
 0x26b   : > { %v5811_v15 = vpop.f32.mrf.mxu0  ;;  %v5813_v16 = vpop.f32.mrf.mxu1 }
 0x26d   : > { %v5815_v4 = vpop.f32.mrf.mxu0  ;;  %v5817_v20 = vpop.f32.mrf.mxu1 }
 0x26f   : > { %v5824_v40 = vpop.f32.mrf.mxu0  ;;  %v5826_v59 = vpop.f32.mrf.mxu1  ;;  %2776 = vmatmul.mubr.bf16.gmra.mxu0 %v6633_v42  ;;  %2969 = vmatmul.mubr.bf16.gmra.mxu1 %v6634_v3 }
 0x270   : > { %2785 = vmatprep.mubr.bf16.mxu0 %v5655_v39  ;;  %2978 = vmatprep.mubr.bf16.mxu1 %v5657_v1  ;;  %v2461_v39 = vadd.f32 %v5737_v24, %v2268_v54  ;;  %v6637_v1 = vsub.s32 0, %v6635_v44 }
 0x271   : > { %v5837_v53 = vpop.f32.mrf.mxu0  ;;  %v5839_v47 = vpop.f32.mrf.mxu1 }
 0x272   : > { %v5856_v42 = vrot.slane %v5822_v25, %v6637_v1  ;;  %v3004_v1 = vmax.f32 %v2461_v39, 0.0  ;;  %v2278_v25 = vadd.f32 %v5755_v60, %v5833_v37 }
 0x273   : > { %v5842_v31 = vpop.f32.mrf.mxu0  ;;  %v5844_v33 = vpop.f32.mrf.mxu1 }
 0x274   : > { %v2266_v24 = vadd.f32 %v5733_v6, %v5856_v42  ;;  %v2471_v39 = vadd.f32 %v5757_v52, %v2278_v25  ;;  %v2288_v25 = vadd.f32 %v5775_v17, %v5833_v37 }
 0x275   : > { %v5848_v18 = vpop.f32.mrf.mxu0  ;;  %v5850_v19 = vpop.f32.mrf.mxu1 }
 0x276   : > { %v2459_v6 = vadd.f32 %v5735_v11, %v2266_v24  ;;  %v2481_v17 = vadd.f32 %v5777_v62, %v2288_v25  ;;  %v2282_v25 = vadd.f32 %v5759_v45, %v5856_v42 }
 0x277   : > { %v5858_v3 = vpop.f32.mrf.mxu0  ;;  %v5860_v26 = vpop.f32.mrf.mxu1  ;;  %2786 = vmatmul.mubr.bf16.gmra.mxu0 %v5659_v38  ;;  %2979 = vmatmul.mubr.bf16.gmra.mxu1 %v5661_v51  ;;  %v2262_v38 = vadd.f32 %v5721_v23, %v5856_v42 }
 0x278   : > { %6638 = vst [vmem:[#allocation18_spill] sm:$0xff] %v5858_v3  ;;  %6639 = vst [vmem:[#allocation19_spill] sm:$0xff] %v5860_v26  ;;  %2795 = vmatprep.mubr.bf16.mxu0 %v5675_v36  ;;  %2988 = vmatprep.mubr.bf16.mxu1 %v5677_v46  ;;  %v3000_v36 = vmax.f32 %v2457_v5, 0.0  ;;  %v2274_v46 = vadd.f32 %v5747_v63, %v5833_v37  ;;  %v3003_v11 = vmax.f32 %v2459_v6, 0.0  ;;  %v3020_v62 = vmax.f32 %v2481_v17, 0.0 }
 0x279   : > { %v5869_v50 = vpop.f32.mrf.mxu0  ;;  %v5871_v54 = vpop.f32.mrf.mxu1  ;;  %v2455_v26 = vadd.f32 %v5723_v7, %v2262_v38  ;;  %v2276_v5 = vadd.f32 %v5751_v2, %v5856_v42  ;;  %v3012_v7 = vmax.f32 %v2471_v39, 0.0  ;;  %v2284_v2 = vadd.f32 %v5767_v0, %v5833_v37 }
 0x27a   : > { %v3128_v60 = vpack.c.bf16 %v3004_v1, %v3000_v36  ;;  %v2467_v63 = vadd.f32 %v5749_v56, %v2274_v46  ;;  %v2475_v45 = vadd.f32 %v5761_v43, %v2282_v25  ;;  %v2308_v43 = vadd.f32 %v5815_v4, %v5833_v37 }
 0x27b   : > { %v5877_v51 = vpop.f32.mrf.mxu0  ;;  %v5879_v12 = vpop.f32.mrf.mxu1  ;;  %v2999_v1 = vmax.f32 %v2455_v26, 0.0  ;;  %v2469_v46 = vadd.f32 %v5753_v49, %v2276_v5  ;;  %v2286_v49 = vadd.f32 %v5771_v9, %v5856_v42  ;;  %v2294_v9 = vadd.f32 %v5787_v41, %v5833_v37 }
 0x27c   : > { %v3008_v38 = vmax.f32 %v2467_v63, 0.0  ;;  %v2477_v63 = vadd.f32 %v5769_v35, %v2284_v2  ;;  %v2501_v4 = vadd.f32 %v5817_v20, %v2308_v43  ;;  %v2302_v43 = vadd.f32 %v5799_v48, %v5856_v42 }
 0x27d   : > { %v5884_v34 = vpop.f32.mrf.mxu0  ;;  %v5886_v44 = vpop.f32.mrf.mxu1  ;;  %v3127_v36 = vpack.c.bf16 %v3003_v11, %v2999_v1  ;;  %v3011_v0 = vmax.f32 %v2469_v46, 0.0  ;;  %v2479_v2 = vadd.f32 %v5773_v10, %v2286_v49  ;;  %v2296_v10 = vadd.f32 %v5791_v57, %v5856_v42 }
 0x27e   : > { %v3132_v26 = vpack.c.bf16 %v3012_v7, %v3008_v38  ;;  %v2304_v57 = vadd.f32 %v5807_v22, %v5833_v37  ;;  %v3036_v20 = vmax.f32 %v2501_v4, 0.0  ;;  %v2495_v48 = vadd.f32 %v5801_v61, %v2302_v43 }
 0x27f   : > { %v5890_v23 = vpop.f32.mrf.mxu0  ;;  %v5892_v3 = vpop.f32.mrf.mxu1  ;;  %2796 = vmatmul.mubr.bf16.gmra.mxu0 %v5679_v27  ;;  %2989 = vmatmul.mubr.bf16.gmra.mxu1 %v5681_v55  ;;  %v2272_v27 = vadd.f32 %v5739_v28, %v5856_v42  ;;  %v3019_v41 = vmax.f32 %v2479_v2, 0.0  ;;  %v2328_v61 = vadd.f32 %v5884_v34, %v5833_v37 }
 0x280   : > { %6640 = vst [vmem:[#allocation20_spill] sm:$0xff] %v5892_v3  ;;  %3486 = vmatprep.mubr.bf16.mxu0 %v3128_v60 }
 0x281   : > { %v5899_v24 = vpop.f32.mrf.mxu0  ;;  %v5901_v52 = vpop.f32.mrf.mxu1  ;;  %v2465_v28 = vadd.f32 %v5741_v32, %v2272_v27  ;;  %v2298_v32 = vadd.f32 %v5795_v29, %v5833_v37  ;;  %v3016_v27 = vmax.f32 %v2477_v63, 0.0  ;;  %v2487_v63 = vadd.f32 %v5789_v21, %v2294_v9 }
 0x282   : > { %v2489_v9 = vadd.f32 %v5793_v58, %v2296_v10  ;;  %v2306_v58 = vadd.f32 %v5811_v15, %v5856_v42  ;;  %v2314_v15 = vadd.f32 %v5837_v53, %v5833_v37  ;;  %v2521_v34 = vadd.f32 %v5886_v44, %v2328_v61  ;;  %v6643_v61 = vld [vmem:[#allocation18_spill] sm:$0xff] }
 0x283   : > { %v5907_v55 = vpop.f32.mrf.mxu0  ;;  %v5909_v56 = vpop.f32.mrf.mxu1  ;;  %v3007_v7 = vmax.f32 %v2465_v28, 0.0  ;;  %v2491_v29 = vadd.f32 %v5797_v30, %v2298_v32  ;;  %v3136_v17 = vpack.c.bf16 %v3020_v62, %v3016_v27  ;;  %v3015_v62 = vmax.f32 %v2475_v45, 0.0 }
 0x284   : > { %v2292_v32 = vadd.f32 %v5779_v13, %v5856_v42  ;;  %v3024_v25 = vmax.f32 %v2487_v63, 0.0  ;;  %v2497_v63 = vadd.f32 %v5809_v8, %v2304_v57  ;;  %v3027_v22 = vmax.f32 %v2489_v9, 0.0 }
 0x285   : > { %v5914_v6 = vpop.f32.mrf.mxu0  ;;  %v5916_v39 = vpop.f32.mrf.mxu1  ;;  %v3131_v38 = vpack.c.bf16 %v3011_v0, %v3007_v7  ;;  %v3028_v30 = vmax.f32 %v2491_v29, 0.0  ;;  %v3135_v27 = vpack.c.bf16 %v3019_v41, %v3015_v62  ;;  %v2499_v57 = vadd.f32 %v5813_v16, %v2306_v58 }
 0x286   : > { %v2485_v13 = vadd.f32 %v5781_v14, %v2292_v32  ;;  %v2318_v14 = vadd.f32 %v5848_v18, %v5833_v37  ;;  %v3032_v32 = vmax.f32 %v2497_v63, 0.0  ;;  %v2507_v63 = vadd.f32 %v5839_v47, %v2314_v15 }
 0x287   : > { %v5920_v60 = vpop.f32.mrf.mxu0  ;;  %v5922_v3 = vpop.f32.mrf.mxu1  ;;  %3487 = vmatmul.mubr.bf16.vlgmr.msra.gmra.mxu0 %v3127_v36  ;;  %v3140_v29 = vpack.c.bf16 %v3028_v30, %v3024_v25  ;;  %v3035_v53 = vmax.f32 %v2499_v57, 0.0  ;;  %v2316_v16 = vadd.f32 %v5842_v31, %v5856_v42  ;;  %v2324_v31 = vadd.f32 %v5869_v50, %v5833_v37 }
 0x288   : > { %3494 = vmatprep.mubr.bf16.mxu0 %v3132_v26  ;;  %v3023_v30 = vmax.f32 %v2485_v13, 0.0  ;;  %v2511_v18 = vadd.f32 %v5850_v19, %v2318_v14  ;;  %v3144_v4 = vpack.c.bf16 %v3036_v20, %v3032_v32  ;;  %v3031_v20 = vmax.f32 %v2495_v48, 0.0 }
 0x289   : > { %v5927_v11 = vpop.f32.mrf.mxu0  ;;  %v5929_v5 = vpop.f32.mrf.mxu1  ;;  %v2312_v14 = vadd.f32 %v5824_v40, %v5856_v42  ;;  %v3040_v43 = vmax.f32 %v2507_v63, 0.0  ;;  %v2509_v15 = vadd.f32 %v5844_v33, %v2316_v16  ;;  %v2517_v63 = vadd.f32 %v5871_v54, %v2324_v31 }
 0x28a   : > { %v3139_v25 = vpack.c.bf16 %v3027_v22, %v3023_v30  ;;  %v3044_v19 = vmax.f32 %v2511_v18, 0.0  ;;  %v3143_v32 = vpack.c.bf16 %v3035_v53, %v3031_v20  ;;  %v2326_v33 = vadd.f32 %v5877_v51, %v5856_v42 }
 0x28b   : > { %v5935_v1 = vpop.f32.mrf.mxu0  ;;  %v5937_v35 = vpop.f32.mrf.mxu1  ;;  %v2505_v40 = vadd.f32 %v5826_v59, %v2312_v14  ;;  %v3043_v50 = vmax.f32 %v2509_v15, 0.0  ;;  %v3052_v44 = vmax.f32 %v2521_v34, 0.0  ;;  %v2338_v59 = vadd.f32 %v5914_v6, %v5833_v37 }
 0x28c   : > { %v3148_v18 = vpack.c.bf16 %v3044_v19, %v3040_v43  ;;  %v2322_v20 = vadd.f32 %v6643_v61, %v5856_v42  ;;  %v3048_v43 = vmax.f32 %v2517_v63, 0.0  ;;  %v2334_v51 = vadd.f32 %v5899_v24, %v5833_v37 }
 0x28d   : > { %v5942_v36 = vpop.f32.mrf.mxu0  ;;  %v5944_v46 = vpop.f32.mrf.mxu1  ;;  %v3039_v19 = vmax.f32 %v2505_v40, 0.0  ;;  %v2531_v6 = vadd.f32 %v5916_v39, %v2338_v59  ;;  %v6644_v40 = vld [vmem:[#allocation19_spill] sm:$0xff] }
 0x28e   : > { %v2515_v61 = vadd.f32 %v6644_v40, %v2322_v20  ;;  %v2527_v63 = vadd.f32 %v5901_v52, %v2334_v51  ;;  %v6646_v40 = vld [vmem:[#allocation20_spill] sm:$0xff] }
 0x28f   : > { %v5948_v26 = vpop.f32.mrf.mxu0  ;;  %v5950_v28 = vpop.f32.mrf.mxu1  ;;  %3495 = vmatmul.mubr.bf16.gmra.mxu0 %v3131_v38  ;;  %v3147_v31 = vpack.c.bf16 %v3043_v50, %v3039_v19  ;;  %v3060_v39 = vmax.f32 %v2531_v6, 0.0  ;;  %v2332_v19 = vadd.f32 %v5890_v23, %v5856_v42 }
 0x290   : > { %3502 = vmatprep.mubr.bf16.mxu0 %v3136_v17  ;;  %v3047_v59 = vmax.f32 %v2515_v61, 0.0 }
 0x291   : > { %v5955_v0 = vpop.f32.mrf.mxu0  ;;  %v5957_v49 = vpop.f32.mrf.mxu1  ;;  %v2525_v23 = vadd.f32 %v6646_v40, %v2332_v19 }
 0x293   : > { %v5963_v7 = vpop.f32.mrf.mxu0  ;;  %v5965_v21 = vpop.f32.mrf.mxu1 }
 0x295   : > { %v5970_v38 = vpop.f32.mrf.mxu0  ;;  %v5972_v2 = vpop.f32.mrf.mxu1 }
 0x297   : > { %v5976_v17 = vpop.f32.mrf.mxu0  ;;  %v5978_v45 = vpop.f32.mrf.mxu1  ;;  %3503 = vmatmul.mubr.bf16.gmra.mxu0 %v3135_v27 }
 0x298   : > { %3510 = vmatprep.mubr.bf16.mxu0 %v3140_v29 }
 0x299   : > { %v5983_v41 = vpop.f32.mrf.mxu0  ;;  %v5985_v10 = vpop.f32.mrf.mxu1 }
 0x29b   : > { %v5991_v62 = vpop.f32.mrf.mxu0  ;;  %v5993_v8 = vpop.f32.mrf.mxu1 }
 0x29d   : > { %v5998_v27 = vpop.f32.mrf.mxu0  ;;  %v6000_v9 = vpop.f32.mrf.mxu1 }
 0x29f   : > { %v6004_v29 = vpop.f32.mrf.mxu0  ;;  %v6006_v13 = vpop.f32.mrf.mxu1  ;;  %3511 = vmatmul.mubr.bf16.gmra.mxu0 %v3139_v25 }
 0x2a0   : > { %3518 = vmatprep.mubr.bf16.mxu0 %v3144_v4 }
 0x2a1   : > { %v6011_v22 = vpop.f32.mrf.mxu0  ;;  %v6013_v58 = vpop.f32.mrf.mxu1 }
 0x2a3   : > { %v6019_v30 = vpop.f32.mrf.mxu0  ;;  %v6021_v47 = vpop.f32.mrf.mxu1 }
 0x2a5   : > { %v6026_v25 = vpop.f32.mrf.mxu0  ;;  %v6028_v57 = vpop.f32.mrf.mxu1 }
 0x2a7   : > { %v6032_v4 = vpop.f32.mrf.mxu0  ;;  %v6034_v48 = vpop.f32.mrf.mxu1  ;;  %3519 = vmatmul.mubr.bf16.gmra.mxu0 %v3143_v32  ;;  %v2519_v32 = vadd.f32 %v5879_v12, %v2326_v33  ;;  %v2336_v12 = vadd.f32 %v5907_v55, %v5856_v42  ;;  %v2344_v55 = vadd.f32 %v5927_v11, %v5833_v37 }
 0x2a8   : > { %6641 = vst [vmem:[#allocation21_spill] sm:$0xff] %v6032_v4  ;;  %6642 = vst [vmem:[#allocation22_spill] sm:$0xff] %v6034_v48  ;;  %3526 = vmatprep.mubr.bf16.mxu0 %v3148_v18  ;;  %v3152_v18 = vpack.c.bf16 %v3052_v44, %v3048_v43  ;;  %v2348_v44 = vadd.f32 %v5942_v36, %v5833_v37  ;;  %v3056_v43 = vmax.f32 %v2527_v63, 0.0 }
 0x2a9   : > { %v6039_v53 = vpop.f32.mrf.mxu0  ;;  %v6041_v16 = vpop.f32.mrf.mxu1  ;;  %v3051_v24 = vmax.f32 %v2519_v32, 0.0  ;;  %v2537_v63 = vadd.f32 %v5929_v5, %v2344_v55 }
 0x2aa   : > { %v2541_v36 = vadd.f32 %v5944_v46, %v2348_v44  ;;  %v3055_v44 = vmax.f32 %v2525_v23, 0.0 }
 0x2ab   : > { %v6047_v14 = vpop.f32.mrf.mxu0  ;;  %v6049_v54 = vpop.f32.mrf.mxu1  ;;  %v3151_v51 = vpack.c.bf16 %v3051_v24, %v3047_v59  ;;  %v2342_v59 = vadd.f32 %v5920_v60, %v5856_v42 }
 0x2ac   : > { %v3068_v46 = vmax.f32 %v2541_v36, 0.0 }
 0x2ad   : > { %v6054_v15 = vpop.f32.mrf.mxu0  ;;  %v6056_v34 = vpop.f32.mrf.mxu1  ;;  %v2535_v60 = vadd.f32 %v5922_v3, %v2342_v59 }
 0x2af   : > { %v6060_v48 = vpop.f32.mrf.mxu0  ;;  %v6062_v4 = vpop.f32.mrf.mxu1  ;;  %3527 = vmatmul.mubr.bf16.gmra.mxu0 %v3147_v31  ;;  %v2529_v31 = vadd.f32 %v5909_v56, %v2336_v12  ;;  %v2346_v56 = vadd.f32 %v5935_v1, %v5856_v42  ;;  %v2354_v1 = vadd.f32 %v5955_v0, %v5833_v37 }
 0x2b0   : > { %6645 = vst [vmem:[#allocation23_spill] sm:$0xff] %v6062_v4  ;;  %3534 = vmatprep.mubr.bf16.mxu0 %v3152_v18  ;;  %v3156_v18 = vpack.c.bf16 %v3060_v39, %v3056_v43  ;;  %v2358_v39 = vadd.f32 %v5970_v38, %v5833_v37  ;;  %v3064_v43 = vmax.f32 %v2537_v63, 0.0 }
 0x2b1   : > { %v6067_v50 = vpop.f32.mrf.mxu0  ;;  %v6069_v33 = vpop.f32.mrf.mxu1  ;;  %v3059_v11 = vmax.f32 %v2529_v31, 0.0  ;;  %v2547_v63 = vadd.f32 %v5957_v49, %v2354_v1  ;;  %v2364_v49 = vadd.f32 %v5983_v41, %v5833_v37 }
 0x2b2   : > { %v2551_v38 = vadd.f32 %v5972_v2, %v2358_v39  ;;  %v2352_v39 = vadd.f32 %v5948_v26, %v5856_v42 }
 0x2b3   : > { %v6075_v20 = vpop.f32.mrf.mxu0  ;;  %v6077_v52 = vpop.f32.mrf.mxu1  ;;  %v3155_v55 = vpack.c.bf16 %v3059_v11, %v3055_v44  ;;  %v2368_v11 = vadd.f32 %v5998_v27, %v5833_v37 }
 0x2b4   : > { %v3076_v3 = vmax.f32 %v2551_v38, 0.0  ;;  %v2545_v41 = vadd.f32 %v5950_v28, %v2352_v39  ;;  %v2378_v28 = vadd.f32 %v6026_v25, %v5833_v37 }
 0x2b5   : > { %v6082_v32 = vpop.f32.mrf.mxu0  ;;  %v6084_v6 = vpop.f32.mrf.mxu1  ;;  %v2561_v1 = vadd.f32 %v6000_v9, %v2368_v11  ;;  %v2366_v11 = vadd.f32 %v5991_v62, %v5856_v42  ;;  %v2374_v62 = vadd.f32 %v6011_v22, %v5833_v37  ;;  %v2372_v22 = vadd.f32 %v6004_v29, %v5856_v42 }
 0x2b6   : > { %v3071_v39 = vmax.f32 %v2545_v41, 0.0  ;;  %v2571_v41 = vadd.f32 %v6028_v57, %v2378_v28  ;;  %v2376_v57 = vadd.f32 %v6019_v30, %v5856_v42 }
 0x2b7   : > { %v6088_v61 = vpop.f32.mrf.mxu0  ;;  %v6090_v4 = vpop.f32.mrf.mxu1  ;;  %3535 = vmatmul.mubr.bf16.gmra.mxu0 %v3151_v51  ;;  %v2539_v51 = vadd.f32 %v5937_v35, %v2346_v56  ;;  %v2356_v35 = vadd.f32 %v5963_v7, %v5856_v42  ;;  %v3072_v7 = vmax.f32 %v2547_v63, 0.0 }
 0x2b8   : > { %6647 = vst [vmem:[#allocation24_spill] sm:$0xff] %v6090_v4  ;;  %3542 = vmatprep.mubr.bf16.mxu0 %v3156_v18  ;;  %v3160_v18 = vpack.c.bf16 %v3068_v46, %v3064_v43  ;;  %v3063_v46 = vmax.f32 %v2535_v60, 0.0  ;;  %v6655_v60 = vld [vmem:[#allocation17_spill] sm:$0xff]  ;;  %v3092_v28 = vmax.f32 %v2571_v41, 0.0 }
 0x2b9   : > { %v6095_v24 = vpop.f32.mrf.mxu0  ;;  %v6097_v12 = vpop.f32.mrf.mxu1  ;;  %v3067_v0 = vmax.f32 %v2539_v51, 0.0  ;;  %v2549_v27 = vadd.f32 %v5965_v21, %v2356_v35  ;;  %v3164_v38 = vpack.c.bf16 %v3076_v3, %v3072_v7  ;;  %v3084_v3 = vmax.f32 %v2561_v1, 0.0 }
 0x2bb   : > { %v6103_v19 = vpop.f32.mrf.mxu0  ;;  %v6105_v5 = vpop.f32.mrf.mxu1  ;;  %v3159_v43 = vpack.c.bf16 %v3067_v0, %v3063_v46  ;;  %v3075_v35 = vmax.f32 %v2549_v27, 0.0 }
 0x2bd   : > { %v6110_v31 = vpop.f32.mrf.mxu0  ;;  %v6112_v36 = vpop.f32.mrf.mxu1 }
 0x2bf   : > { %v6116_v40 = vpop.f32.mrf.mxu0  ;;  %v6118_v23 = vpop.f32.mrf.mxu1  ;;  %3543 = vmatmul.mubr.bf16.gmra.mxu0 %v3155_v55 }
 0x2c0   : > { %6648 = vst [vmem:[#allocation25_spill] sm:$0xff] %v6116_v40  ;;  %6649 = vst [vmem:[#allocation26_spill] sm:$0xff] %v6118_v23  ;;  %3550 = vmatprep.mubr.bf16.mxu0 %v3160_v18  ;;  %v6653_v18 = vld [vmem:[#allocation16_spill] sm:$0xff] }
 0x2c1   : > { %v6125_v56 = vpop.f32.mrf.mxu0  ;;  %v6127_v2 = vpop.f32.mrf.mxu1  ;;  %v6654_v26 = vsub.s32 3, %v6653_v18  ;;  %v6656_v63 = vsub.s32 2, %v6653_v18 }
 0x2c2   : > { %6650 = vst [vmem:[#allocation27_spill] sm:$0xff] %v6127_v2 }
 0x2c3   : > { %v6133_v44 = vpop.f32.mrf.mxu0  ;;  %v6135_v59 = vpop.f32.mrf.mxu1  ;;  %v6146_v23 = vrot.slane %v6655_v60, %v6654_v26  ;;  %v6153_v21 = vrot.slane %v6655_v60, %v6656_v63  ;;  %v3163_v26 = vpack.c.bf16 %v3075_v35, %v3071_v39  ;;  %v2559_v60 = vadd.f32 %v5993_v8, %v2366_v11 }
 0x2c4   : > { %6651 = vst [vmem:[#allocation28_spill] sm:$0xff] %v6133_v44  ;;  %6652 = vst [vmem:[#allocation29_spill] sm:$0xff] %v6135_v59  ;;  %v2557_v59 = vadd.f32 %v5985_v10, %v2364_v49  ;;  %v2362_v49 = vadd.f32 %v5976_v17, %v5856_v42  ;;  %v2567_v8 = vadd.f32 %v6013_v58, %v2374_v62 }
 0x2c5   : > { %v6139_v55 = vpop.f32.mrf.mxu0  ;;  %v6141_v51 = vpop.f32.mrf.mxu1  ;;  %v3083_v11 = vmax.f32 %v2559_v60, 0.0  ;;  %v2384_v58 = vadd.f32 %v6039_v53, %v5833_v37 }
 0x2c6   : > { %v3080_v18 = vmax.f32 %v2557_v59, 0.0 }
 0x2c7   : > { %v2647_v9 = vpop.f32.mrf.mxu0  ;;  %v2840_v0 = vpop.f32.mrf.mxu1  ;;  %3551 = vmatmul.mubr.bf16.gmra.mxu0 %v3159_v43 }
 0x2c8   : > { %3558 = vmatprep.mubr.bf16.mxu0 %v3164_v38  ;;  %v2648_v43 = vadd.f32 %v2647_v9, %v6153_v21  ;;  %v2555_v9 = vadd.f32 %v5978_v45, %v2362_v49 }
 0x2c9   : > { %v2649_v46 = vpop.f32.mrf.mxu0  ;;  %v2842_v7 = vpop.f32.mrf.mxu1 }
 0x2ca   : > { %v2650_v10 = vadd.f32 %v2649_v46, %v6146_v23  ;;  %v3168_v46 = vpack.c.bf16 %v3084_v3, %v3080_v18  ;;  %v2841_v44 = vadd.f32 %v2840_v0, %v2648_v43  ;;  %v2388_v3 = vadd.f32 %v6054_v15, %v5833_v37 }
 0x2cb   : > { %v2651_v38 = vpop.f32.mrf.mxu0  ;;  %v2844_v27 = vpop.f32.mrf.mxu1  ;;  %v3079_v29 = vmax.f32 %v2555_v9, 0.0  ;;  %v3088_v15 = vmax.f32 %v2567_v8, 0.0  ;;  %v2386_v8 = vadd.f32 %v6047_v14, %v5856_v42 }
 0x2cc   : > { %v2652_v1 = vadd.f32 %v2651_v38, %v6153_v21  ;;  %v2843_v40 = vadd.f32 %v2842_v7, %v2650_v10  ;;  %v3001_v18 = vmax.f32 %v2841_v44, 0.0  ;;  %v2581_v60 = vadd.f32 %v6056_v34, %v2388_v3 }
 0x2cd   : > { %v2653_v25 = vpop.f32.mrf.mxu0  ;;  %v2846_v63 = vpop.f32.mrf.mxu1  ;;  %v3172_v41 = vpack.c.bf16 %v3092_v28, %v3088_v15 }
 0x2ce   : > { %v2845_v17 = vadd.f32 %v2844_v27, %v2652_v1  ;;  %v2654_v59 = vadd.f32 %v2653_v25, %v6146_v23  ;;  %v3002_v10 = vmax.f32 %v2843_v40, 0.0  ;;  %v2565_v27 = vadd.f32 %v6006_v13, %v2372_v22 }
 0x2cf   : > { %v2657_v2 = vpop.f32.mrf.mxu0  ;;  %v2850_v4 = vpop.f32.mrf.mxu1  ;;  %3559 = vmatmul.mubr.bf16.gmra.mxu0 %v3163_v26  ;;  %v3167_v26 = vpack.c.bf16 %v3083_v11, %v3079_v29  ;;  %v2569_v40 = vadd.f32 %v6021_v47, %v2376_v57  ;;  %v2577_v13 = vadd.f32 %v6041_v16, %v2384_v58  ;;  %v2394_v58 = vadd.f32 %v6067_v50, %v5833_v37 }
 0x2d0   : > { %v2847_v35 = vadd.f32 %v2846_v63, %v2654_v59  ;;  %3566 = vmatprep.mubr.bf16.mxu0 %v3168_v46  ;;  %v3005_v7 = vmax.f32 %v2845_v17, 0.0  ;;  %v2658_v43 = vadd.f32 %v2657_v2, %v6153_v21  ;;  %v3087_v22 = vmax.f32 %v2565_v27, 0.0 }
 0x2d1   : > { %v2659_v45 = vpop.f32.mrf.mxu0  ;;  %v2852_v0 = vpop.f32.mrf.mxu1  ;;  %v3091_v34 = vmax.f32 %v2569_v40, 0.0 }
 0x2d2   : > { %v3006_v39 = vmax.f32 %v2847_v35, 0.0  ;;  %v2660_v49 = vadd.f32 %v2659_v45, %v6146_v23  ;;  %v3129_v25 = vpack.c.bf16 %v3005_v7, %v3001_v18  ;;  %v2851_v17 = vadd.f32 %v2850_v4, %v2658_v43 }
 0x2d3   : > { %v2661_v38 = vpop.f32.mrf.mxu0  ;;  %v2854_v30 = vpop.f32.mrf.mxu1  ;;  %v3100_v35 = vmax.f32 %v2581_v60, 0.0  ;;  %v2398_v7 = vadd.f32 %v6082_v32, %v5833_v37  ;;  %v3171_v32 = vpack.c.bf16 %v3091_v34, %v3087_v22 }
 0x2d4   : > { %v2662_v62 = vadd.f32 %v2661_v38, %v6153_v21  ;;  %v3130_v1 = vpack.c.bf16 %v3006_v39, %v3002_v10  ;;  %v2853_v53 = vadd.f32 %v2852_v0, %v2660_v49  ;;  %v6657_v0 = vld [vmem:[#allocation21_spill] sm:$0xff]  ;;  %v3096_v10 = vmax.f32 %v2577_v13, 0.0 }
 0x2d5   : > { %v2663_v63 = vpop.f32.mrf.mxu0  ;;  %v2856_v46 = vpop.f32.mrf.mxu1  ;;  %v2382_v28 = vadd.f32 %v6657_v0, %v5856_v42  ;;  %v3009_v39 = vmax.f32 %v2851_v17, 0.0  ;;  %v2579_v38 = vadd.f32 %v6049_v54, %v2386_v8  ;;  %v2392_v54 = vadd.f32 %v6060_v48, %v5856_v42 }
 0x2d6   : > { %v2855_v44 = vadd.f32 %v2854_v30, %v2662_v62  ;;  %v2664_v2 = vadd.f32 %v2663_v63, %v6146_v23  ;;  %3647 = vmatprep.mubr.bf16.mxu1 %v3130_v1  ;;  %v3010_v16 = vmax.f32 %v2853_v53, 0.0  ;;  %v3176_v62 = vpack.c.bf16 %v3100_v35, %v3096_v10 }
 0x2d7   : > { %v2667_v59 = vpop.f32.mrf.mxu0  ;;  %v2860_v9 = vpop.f32.mrf.mxu1  ;;  %3567 = vmatmul.mubr.bf16.gmra.mxu0 %v3167_v26  ;;  %3648 = vmatmul.mubr.bf16.vlgmr.msra.gmra.mxu1 %v3129_v25  ;;  %v2591_v1 = vadd.f32 %v6084_v6, %v2398_v7  ;;  %v6658_v25 = vld [vmem:[#allocation22_spill] sm:$0xff]  ;;  %v3099_v6 = vmax.f32 %v2579_v38, 0.0  ;;  %v2408_v13 = vadd.f32 %v6110_v31, %v5833_v37 }
 0x2d8   : > { %v2857_v47 = vadd.f32 %v2856_v46, %v2664_v2  ;;  %3574 = vmatprep.mubr.bf16.mxu0 %v3172_v41  ;;  %v3013_v11 = vmax.f32 %v2855_v44, 0.0  ;;  %v2668_v49 = vadd.f32 %v2667_v59, %v6153_v21  ;;  %v2575_v63 = vadd.f32 %v6658_v25, %v2382_v28 }
 0x2d9   : > { %v2669_v57 = vpop.f32.mrf.mxu0  ;;  %v2862_v3 = vpop.f32.mrf.mxu1  ;;  %v2587_v44 = vadd.f32 %v6069_v33, %v2394_v58  ;;  %v2396_v41 = vadd.f32 %v6075_v20, %v5856_v42  ;;  %v3108_v22 = vmax.f32 %v2591_v1, 0.0  ;;  %v2404_v33 = vadd.f32 %v6095_v24, %v5833_v37 }
 0x2da   : > { %v3014_v4 = vmax.f32 %v2857_v47, 0.0  ;;  %v2670_v45 = vadd.f32 %v2669_v57, %v6146_v23  ;;  %v3133_v30 = vpack.c.bf16 %v3013_v11, %v3009_v39  ;;  %v2861_v50 = vadd.f32 %v2860_v9, %v2668_v49 }
 0x2db   : > { %v2671_v29 = vpop.f32.mrf.mxu0  ;;  %v2864_v14 = vpop.f32.mrf.mxu1  ;;  %v3095_v48 = vmax.f32 %v2575_v63, 0.0  ;;  %v3104_v31 = vmax.f32 %v2587_v44, 0.0  ;;  %v2589_v0 = vadd.f32 %v6077_v52, %v2396_v41  ;;  %v2601_v28 = vadd.f32 %v6112_v36, %v2408_v13 }
 0x2dc   : > { %v2672_v18 = vadd.f32 %v2671_v29, %v6153_v21  ;;  %v3134_v43 = vpack.c.bf16 %v3014_v4, %v3010_v16  ;;  %v2863_v26 = vadd.f32 %v2862_v3, %v2670_v45  ;;  %v3017_v35 = vmax.f32 %v2861_v50, 0.0  ;;  %v6659_v3 = vld [vmem:[#allocation23_spill] sm:$0xff] }
 0x2dd   : > { %v2673_v27 = vpop.f32.mrf.mxu0  ;;  %v2866_v15 = vpop.f32.mrf.mxu1  ;;  %v2585_v7 = vadd.f32 %v6659_v3, %v2392_v54  ;;  %v3175_v45 = vpack.c.bf16 %v3099_v6, %v3095_v48  ;;  %v3180_v58 = vpack.c.bf16 %v3108_v22, %v3104_v31  ;;  %v3107_v36 = vmax.f32 %v2589_v0, 0.0 }
 0x2de   : > { %v2865_v40 = vadd.f32 %v2864_v14, %v2672_v18  ;;  %v2674_v60 = vadd.f32 %v2673_v27, %v6146_v23  ;;  %3655 = vmatprep.mubr.bf16.mxu1 %v3134_v43  ;;  %v3018_v47 = vmax.f32 %v2863_v26, 0.0  ;;  %v2597_v18 = vadd.f32 %v6097_v12, %v2404_v33 }
 0x2df   : > { %v2677_v46 = vpop.f32.mrf.mxu0  ;;  %v2870_v53 = vpop.f32.mrf.mxu1  ;;  %3575 = vmatmul.mubr.bf16.gmra.mxu0 %v3171_v32  ;;  %3656 = vmatmul.mubr.bf16.gmra.mxu1 %v3133_v30  ;;  %v3103_v30 = vmax.f32 %v2585_v7, 0.0  ;;  %v2406_v27 = vadd.f32 %v6103_v19, %v5856_v42  ;;  %v2402_v63 = vadd.f32 %v6088_v61, %v5856_v42  ;;  %v2414_v44 = vadd.f32 %v6125_v56, %v5833_v37 }
 0x2e0   : > { %v2867_v2 = vadd.f32 %v2866_v15, %v2674_v60  ;;  %3582 = vmatprep.mubr.bf16.mxu0 %v3176_v62  ;;  %v3021_v17 = vmax.f32 %v2865_v40, 0.0  ;;  %v2678_v11 = vadd.f32 %v2677_v46, %v6153_v21  ;;  %v3116_v15 = vmax.f32 %v2601_v28, 0.0 }
 0x2e1   : > { %v2679_v59 = vpop.f32.mrf.mxu0  ;;  %v2872_v9 = vpop.f32.mrf.mxu1  ;;  %v2418_v40 = vadd.f32 %v6139_v55, %v5833_v37  ;;  %v3112_v50 = vmax.f32 %v2597_v18, 0.0  ;;  %v3179_v55 = vpack.c.bf16 %v3107_v36, %v3103_v30  ;;  %v2599_v41 = vadd.f32 %v6105_v5, %v2406_v27 }
 0x2e2   : > { %v3022_v34 = vmax.f32 %v2867_v2, 0.0  ;;  %v2680_v8 = vadd.f32 %v2679_v59, %v6146_v23  ;;  %v3137_v10 = vpack.c.bf16 %v3021_v17, %v3017_v35  ;;  %v2871_v43 = vadd.f32 %v2870_v53, %v2678_v11  ;;  %v6661_v35 = vld [vmem:[#allocation27_spill] sm:$0xff] }
 0x2e3   : > { %v2681_v57 = vpop.f32.mrf.mxu0  ;;  %v2874_v20 = vpop.f32.mrf.mxu1  ;;  %v2611_v61 = vadd.f32 %v6141_v51, %v2418_v40  ;;  %v2607_v5 = vadd.f32 %v6661_v35, %v2414_v44 }
 0x2e4   : > { %v2682_v16 = vadd.f32 %v2681_v57, %v6153_v21  ;;  %v3138_v4 = vpack.c.bf16 %v3022_v34, %v3018_v47  ;;  %v2873_v24 = vadd.f32 %v2872_v9, %v2680_v8  ;;  %v3025_v46 = vmax.f32 %v2871_v43, 0.0  ;;  %v6660_v8 = vld [vmem:[#allocation24_spill] sm:$0xff] }
 0x2e5   : > { %v2683_v39 = vpop.f32.mrf.mxu0  ;;  %v2876_v49 = vpop.f32.mrf.mxu1  ;;  %v3184_v9 = vpack.c.bf16 %v3116_v15, %v3112_v50  ;;  %v2595_v48 = vadd.f32 %v6660_v8, %v2402_v63  ;;  %v3115_v57 = vmax.f32 %v2599_v41, 0.0 }
 0x2e6   : > { %v2875_v29 = vadd.f32 %v2874_v20, %v2682_v16  ;;  %v2684_v14 = vadd.f32 %v2683_v39, %v6146_v23  ;;  %3663 = vmatprep.mubr.bf16.mxu1 %v3138_v4  ;;  %v3026_v12 = vmax.f32 %v2873_v24, 0.0  ;;  %v6662_v20 = vld [vmem:[#allocation28_spill] sm:$0xff]  ;;  %v3124_v16 = vmax.f32 %v2611_v61, 0.0 }
 0x2e7   : > { %v2687_v32 = vpop.f32.mrf.mxu0  ;;  %v2880_v38 = vpop.f32.mrf.mxu1  ;;  %3583 = vmatmul.mubr.bf16.gmra.mxu0 %v3175_v45  ;;  %3664 = vmatmul.mubr.bf16.gmra.mxu1 %v3137_v10  ;;  %v2416_v51 = vadd.f32 %v6662_v20, %v5856_v42  ;;  %v3111_v28 = vmax.f32 %v2595_v48, 0.0  ;;  %v6663_v10 = vld [vmem:[#allocation25_spill] sm:$0xff] }
 0x2e8   : > { %v2877_v52 = vadd.f32 %v2876_v49, %v2684_v14  ;;  %3590 = vmatprep.mubr.bf16.mxu0 %v3180_v58  ;;  %v3029_v62 = vmax.f32 %v2875_v29, 0.0  ;;  %v2688_v53 = vadd.f32 %v2687_v32, %v6153_v21  ;;  %v2412_v39 = vadd.f32 %v6663_v10, %v5856_v42 }
 0x2e9   : > { %v2689_v1 = vpop.f32.mrf.mxu0  ;;  %v2882_v26 = vpop.f32.mrf.mxu1  ;;  %v3120_v58 = vmax.f32 %v2607_v5, 0.0  ;;  %v3183_v32 = vpack.c.bf16 %v3115_v57, %v3111_v28 }
 0x2ea   : > { %v3030_v60 = vmax.f32 %v2877_v52, 0.0  ;;  %v2690_v25 = vadd.f32 %v2689_v1, %v6146_v23  ;;  %v3141_v13 = vpack.c.bf16 %v3029_v62, %v3025_v46  ;;  %v2881_v37 = vadd.f32 %v2880_v38, %v2688_v53  ;;  %v6664_v38 = vld [vmem:[#allocation29_spill] sm:$0xff] }
 0x2eb   : > { %v2691_v54 = vpop.f32.mrf.mxu0  ;;  %v2884_v19 = vpop.f32.mrf.mxu1  ;;  %v2609_v30 = vadd.f32 %v6664_v38, %v2416_v51  ;;  %v3188_v42 = vpack.c.bf16 %v3124_v16, %v3120_v58 }
 0x2ec   : > { %v2692_v2 = vadd.f32 %v2691_v54, %v6153_v21  ;;  %v3142_v6 = vpack.c.bf16 %v3030_v60, %v3026_v12  ;;  %v2883_v22 = vadd.f32 %v2882_v26, %v2690_v25  ;;  %v3033_v49 = vmax.f32 %v2881_v37, 0.0  ;;  %v6665_v26 = vld [vmem:[#allocation26_spill] sm:$0xff] }
 0x2ed   : > { %v2693_v17 = vpop.f32.mrf.mxu0  ;;  %v2886_v59 = vpop.f32.mrf.mxu1  ;;  %v2605_v40 = vadd.f32 %v6665_v26, %v2412_v39  ;;  %v3123_v50 = vmax.f32 %v2609_v30, 0.0 }
 0x2ee   : > { %v2885_v47 = vadd.f32 %v2884_v19, %v2692_v2  ;;  %v2694_v34 = vadd.f32 %v2693_v17, %v6146_v23  ;;  %3671 = vmatprep.mubr.bf16.mxu1 %v3142_v6  ;;  %v3034_v4 = vmax.f32 %v2883_v22, 0.0 }
 0x2ef   : > { %v2697_v56 = vpop.f32.mrf.mxu0  ;;  %v2890_v33 = vpop.f32.mrf.mxu1  ;;  %3591 = vmatmul.mubr.bf16.gmra.mxu0 %v3179_v55  ;;  %3672 = vmatmul.mubr.bf16.gmra.mxu1 %v3141_v13  ;;  %v3119_v6 = vmax.f32 %v2605_v40, 0.0 }
 0x2f0   : > { %v2887_v11 = vadd.f32 %v2886_v59, %v2694_v34  ;;  %3598 = vmatprep.mubr.bf16.mxu0 %v3184_v9  ;;  %v3037_v3 = vmax.f32 %v2885_v47, 0.0  ;;  %v2698_v24 = vadd.f32 %v2697_v56, %v6153_v21 }
 0x2f1   : > { %v2699_v7 = vpop.f32.mrf.mxu0  ;;  %v2892_v31 = vpop.f32.mrf.mxu1  ;;  %v3187_v61 = vpack.c.bf16 %v3123_v50, %v3119_v6 }
 0x2f2   : > { %v3038_v45 = vmax.f32 %v2887_v11, 0.0  ;;  %v2700_v0 = vadd.f32 %v2699_v7, %v6146_v23  ;;  %v3145_v52 = vpack.c.bf16 %v3037_v3, %v3033_v49  ;;  %v2891_v12 = vadd.f32 %v2890_v33, %v2698_v24 }
 0x2f3   : > { %v2701_v29 = vpop.f32.mrf.mxu0  ;;  %v2894_v14 = vpop.f32.mrf.mxu1 }
 0x2f4   : > { %v3146_v18 = vpack.c.bf16 %v3038_v45, %v3034_v4  ;;  %v2702_v43 = vadd.f32 %v2701_v29, %v6153_v21  ;;  %v2893_v15 = vadd.f32 %v2892_v31, %v2700_v0  ;;  %v3041_v55 = vmax.f32 %v2891_v12, 0.0 }
 0x2f5   : > { %v2703_v36 = vpop.f32.mrf.mxu0  ;;  %v2896_v27 = vpop.f32.mrf.mxu1 }
 0x2f6   : > { %v2895_v62 = vadd.f32 %v2894_v14, %v2702_v43  ;;  %v2704_v1 = vadd.f32 %v2703_v36, %v6146_v23  ;;  %3679 = vmatprep.mubr.bf16.mxu1 %v3146_v18  ;;  %v3042_v19 = vmax.f32 %v2893_v15, 0.0 }
 0x2f7   : > { %v2707_v60 = vpop.f32.mrf.mxu0  ;;  %v2900_v25 = vpop.f32.mrf.mxu1  ;;  %3599 = vmatmul.mubr.bf16.gmra.mxu0 %v3183_v32  ;;  %3680 = vmatmul.mubr.bf16.gmra.mxu1 %v3145_v52 }
 0x2f8   : > { %v2897_v63 = vadd.f32 %v2896_v27, %v2704_v1  ;;  %3606 = vmatprep.mubr.bf16.mxu0 %v3188_v42  ;;  %v3045_v46 = vmax.f32 %v2895_v62, 0.0  ;;  %v2708_v41 = vadd.f32 %v2707_v60, %v6153_v21 }
 0x2f9   : > { %v2709_v53 = vpop.f32.mrf.mxu0  ;;  %v2902_v54 = vpop.f32.mrf.mxu1 }
 0x2fa   : > { %v3046_v44 = vmax.f32 %v2897_v63, 0.0  ;;  %v2710_v2 = vadd.f32 %v2709_v53, %v6146_v23  ;;  %v3149_v22 = vpack.c.bf16 %v3045_v46, %v3041_v55  ;;  %v2901_v56 = vadd.f32 %v2900_v25, %v2708_v41 }
 0x2fb   : > { %v2711_v13 = vpop.f32.mrf.mxu0  ;;  %v2904_v17 = vpop.f32.mrf.mxu1 }
 0x2fc   : > { %v3150_v59 = vpack.c.bf16 %v3046_v44, %v3042_v19  ;;  %v2712_v9 = vadd.f32 %v2711_v13, %v6153_v21  ;;  %v2903_v8 = vadd.f32 %v2902_v54, %v2710_v2  ;;  %v3049_v31 = vmax.f32 %v2901_v56, 0.0 }
 0x2fd   : > { %v2713_v47 = vpop.f32.mrf.mxu0  ;;  %v2906_v34 = vpop.f32.mrf.mxu1 }
 0x2fe   : > { %v2905_v48 = vadd.f32 %v2904_v17, %v2712_v9  ;;  %v2714_v37 = vadd.f32 %v2713_v47, %v6146_v23  ;;  %3687 = vmatprep.mubr.bf16.mxu1 %v3150_v59  ;;  %v3050_v51 = vmax.f32 %v2903_v8, 0.0 }
 0x2ff   : > { %v2717_v33 = vpop.f32.mrf.mxu0  ;;  %v2910_v35 = vpop.f32.mrf.mxu1  ;;  %3607 = vmatmul.mubr.bf16.gmra.mxu0 %v3187_v61  ;;  %3688 = vmatmul.mubr.bf16.gmra.mxu1 %v3149_v22 }
 0x300   : > { %v2907_v5 = vadd.f32 %v2906_v34, %v2714_v37  ;;  %v3053_v11 = vmax.f32 %v2905_v48, 0.0  ;;  %v2718_v16 = vadd.f32 %v2717_v33, %v6153_v21 }
 0x301   : > { %v2719_v57 = vpop.f32.mrf.mxu0  ;;  %v2912_v20 = vpop.f32.mrf.mxu1 }
 0x302   : > { %v3054_v3 = vmax.f32 %v2907_v5, 0.0  ;;  %v2720_v7 = vadd.f32 %v2719_v57, %v6146_v23  ;;  %v3153_v10 = vpack.c.bf16 %v3053_v11, %v3049_v31  ;;  %v2911_v58 = vadd.f32 %v2910_v35, %v2718_v16 }
 0x303   : > { %v2721_v4 = vpop.f32.mrf.mxu0  ;;  %v2914_v45 = vpop.f32.mrf.mxu1 }
 0x304   : > { %v3154_v0 = vpack.c.bf16 %v3054_v3, %v3050_v51  ;;  %v2722_v28 = vadd.f32 %v2721_v4, %v6153_v21  ;;  %v2913_v24 = vadd.f32 %v2912_v20, %v2720_v7  ;;  %v3057_v62 = vmax.f32 %v2911_v58, 0.0 }
 0x305   : > { %v2723_v39 = vpop.f32.mrf.mxu0  ;;  %v2916_v49 = vpop.f32.mrf.mxu1 }
 0x306   : > { %v2915_v29 = vadd.f32 %v2914_v45, %v2722_v28  ;;  %v2724_v14 = vadd.f32 %v2723_v39, %v6146_v23  ;;  %3695 = vmatprep.mubr.bf16.mxu1 %v3154_v0  ;;  %v3058_v36 = vmax.f32 %v2913_v24, 0.0 }
 0x307   : > { %v2727_v18 = vpop.f32.mrf.mxu0  ;;  %v2920_v43 = vpop.f32.mrf.mxu1  ;;  %3696 = vmatmul.mubr.bf16.gmra.mxu1 %v3153_v10 }
 0x308   : > { %v2917_v32 = vadd.f32 %v2916_v49, %v2724_v14  ;;  %v3061_v38 = vmax.f32 %v2915_v29, 0.0  ;;  %v2728_v1 = vadd.f32 %v2727_v18, %v6153_v21 }
 0x309   : > { %v2729_v30 = vpop.f32.mrf.mxu0  ;;  %v2922_v52 = vpop.f32.mrf.mxu1 }
 0x30a   : > { %v3062_v27 = vmax.f32 %v2917_v32, 0.0  ;;  %v2730_v15 = vadd.f32 %v2729_v30, %v6146_v23  ;;  %v3157_v60 = vpack.c.bf16 %v3061_v38, %v3057_v62  ;;  %v2921_v54 = vadd.f32 %v2920_v43, %v2728_v1 }
 0x30b   : > { %v2731_v42 = vpop.f32.mrf.mxu0  ;;  %v2924_v26 = vpop.f32.mrf.mxu1 }
 0x30c   : > { %v3158_v40 = vpack.c.bf16 %v3062_v27, %v3058_v36  ;;  %v2732_v12 = vadd.f32 %v2731_v42, %v6153_v21  ;;  %v2923_v50 = vadd.f32 %v2922_v52, %v2730_v15  ;;  %v3065_v9 = vmax.f32 %v2921_v54, 0.0 }
 0x30d   : > { %v2733_v25 = vpop.f32.mrf.mxu0  ;;  %v2926_v63 = vpop.f32.mrf.mxu1 }
 0x30e   : > { %v2925_v46 = vadd.f32 %v2924_v26, %v2732_v12  ;;  %v2734_v53 = vadd.f32 %v2733_v25, %v6146_v23  ;;  %3703 = vmatprep.mubr.bf16.mxu1 %v3158_v40  ;;  %v3066_v13 = vmax.f32 %v2923_v50, 0.0 }
 0x30f   : > { %v2737_v19 = vpop.f32.mrf.mxu0  ;;  %v2930_v44 = vpop.f32.mrf.mxu1  ;;  %3704 = vmatmul.mubr.bf16.gmra.mxu1 %v3157_v60 }
 0x310   : > { %v2927_v2 = vadd.f32 %v2926_v63, %v2734_v53  ;;  %v3069_v6 = vmax.f32 %v2925_v46, 0.0  ;;  %v2738_v61 = vadd.f32 %v2737_v19, %v6153_v21 }
 0x311   : > { %v2739_v55 = vpop.f32.mrf.mxu0  ;;  %v2932_v41 = vpop.f32.mrf.mxu1 }
 0x312   : > { %v3070_v17 = vmax.f32 %v2927_v2, 0.0  ;;  %v2740_v59 = vadd.f32 %v2739_v55, %v6146_v23  ;;  %v3161_v48 = vpack.c.bf16 %v3069_v6, %v3065_v9  ;;  %v2931_v11 = vadd.f32 %v2930_v44, %v2738_v61 }
 0x313   : > { %v2741_v22 = vpop.f32.mrf.mxu0  ;;  %v2934_v47 = vpop.f32.mrf.mxu1 }
 0x314   : > { %v3162_v34 = vpack.c.bf16 %v3070_v17, %v3066_v13  ;;  %v2742_v8 = vadd.f32 %v2741_v22, %v6153_v21  ;;  %v2933_v33 = vadd.f32 %v2932_v41, %v2740_v59  ;;  %v3073_v0 = vmax.f32 %v2931_v11, 0.0 }
 0x315   : > { %v2743_v37 = vpop.f32.mrf.mxu0  ;;  %v2936_v56 = vpop.f32.mrf.mxu1 }
 0x316   : > { %v2935_v35 = vadd.f32 %v2934_v47, %v2742_v8  ;;  %v2744_v5 = vadd.f32 %v2743_v37, %v6146_v23  ;;  %3711 = vmatprep.mubr.bf16.mxu1 %v3162_v34  ;;  %v3074_v16 = vmax.f32 %v2933_v33, 0.0 }
 0x317   : > { %v2747_v57 = vpop.f32.mrf.mxu0  ;;  %v2940_v20 = vpop.f32.mrf.mxu1  ;;  %3712 = vmatmul.mubr.bf16.gmra.mxu1 %v3161_v48 }
 0x318   : > { %v2937_v51 = vadd.f32 %v2936_v56, %v2744_v5  ;;  %v3077_v3 = vmax.f32 %v2935_v35, 0.0  ;;  %v2748_v28 = vadd.f32 %v2747_v57, %v6153_v21 }
 0x319   : > { %v2749_v7 = vpop.f32.mrf.mxu0  ;;  %v2942_v31 = vpop.f32.mrf.mxu1 }
 0x31a   : > { %v3078_v4 = vmax.f32 %v2937_v51, 0.0  ;;  %v2750_v45 = vadd.f32 %v2749_v7, %v6146_v23  ;;  %v3165_v29 = vpack.c.bf16 %v3077_v3, %v3073_v0  ;;  %v2941_v38 = vadd.f32 %v2940_v20, %v2748_v28 }
 0x31b   : > { %v2751_v10 = vpop.f32.mrf.mxu0  ;;  %v2944_v39 = vpop.f32.mrf.mxu1 }
 0x31c   : > { %v3166_v49 = vpack.c.bf16 %v3078_v4, %v3074_v16  ;;  %v2752_v24 = vadd.f32 %v2751_v10, %v6153_v21  ;;  %v2943_v18 = vadd.f32 %v2942_v31, %v2750_v45  ;;  %v3081_v40 = vmax.f32 %v2941_v38, 0.0 }
 0x31d   : > { %v2753_v14 = vpop.f32.mrf.mxu0  ;;  %v2946_v58 = vpop.f32.mrf.mxu1 }
 0x31e   : > { %v2945_v43 = vadd.f32 %v2944_v39, %v2752_v24  ;;  %v2754_v32 = vadd.f32 %v2753_v14, %v6146_v23  ;;  %3719 = vmatprep.mubr.bf16.mxu1 %v3166_v49  ;;  %v3082_v1 = vmax.f32 %v2943_v18, 0.0 }
 0x31f   : > { %v2757_v30 = vpop.f32.mrf.mxu0  ;;  %v2950_v52 = vpop.f32.mrf.mxu1  ;;  %3720 = vmatmul.mubr.bf16.gmra.mxu1 %v3165_v29 }
 0x320   : > { %v2947_v36 = vadd.f32 %v2946_v58, %v2754_v32  ;;  %v3085_v27 = vmax.f32 %v2945_v43, 0.0  ;;  %v2758_v12 = vadd.f32 %v2757_v30, %v6153_v21 }
 0x321   : > { %v2759_v15 = vpop.f32.mrf.mxu0  ;;  %v2952_v62 = vpop.f32.mrf.mxu1 }
 0x322   : > { %v3086_v42 = vmax.f32 %v2947_v36, 0.0  ;;  %v2760_v26 = vadd.f32 %v2759_v15, %v6146_v23  ;;  %v3169_v46 = vpack.c.bf16 %v3085_v27, %v3081_v40  ;;  %v2951_v6 = vadd.f32 %v2950_v52, %v2758_v12 }
 0x323   : > { %v2761_v60 = vpop.f32.mrf.mxu0  ;;  %v2954_v25 = vpop.f32.mrf.mxu1 }
 0x324   : > { %v3170_v63 = vpack.c.bf16 %v3086_v42, %v3082_v1  ;;  %v2762_v50 = vadd.f32 %v2761_v60, %v6153_v21  ;;  %v2953_v19 = vadd.f32 %v2952_v62, %v2760_v26  ;;  %v3089_v34 = vmax.f32 %v2951_v6, 0.0 }
 0x325   : > { %v2763_v53 = vpop.f32.mrf.mxu0  ;;  %v2956_v54 = vpop.f32.mrf.mxu1 }
 0x326   : > { %v2955_v44 = vadd.f32 %v2954_v25, %v2762_v50  ;;  %v2764_v2 = vadd.f32 %v2763_v53, %v6146_v23  ;;  %3727 = vmatprep.mubr.bf16.mxu1 %v3170_v63  ;;  %v3090_v61 = vmax.f32 %v2953_v19, 0.0 }
 0x327   : > { %v2767_v55 = vpop.f32.mrf.mxu0  ;;  %v2960_v41 = vpop.f32.mrf.mxu1  ;;  %3728 = vmatmul.mubr.bf16.gmra.mxu1 %v3169_v46 }
 0x328   : > { %v2957_v13 = vadd.f32 %v2956_v54, %v2764_v2  ;;  %v3093_v17 = vmax.f32 %v2955_v44, 0.0  ;;  %v2768_v8 = vadd.f32 %v2767_v55, %v6153_v21 }
 0x329   : > { %v2769_v59 = vpop.f32.mrf.mxu0  ;;  %v2962_v9 = vpop.f32.mrf.mxu1 }
 0x32a   : > { %v3094_v22 = vmax.f32 %v2957_v13, 0.0  ;;  %v2770_v47 = vadd.f32 %v2769_v59, %v6146_v23  ;;  %v3173_v35 = vpack.c.bf16 %v3093_v17, %v3089_v34  ;;  %v2961_v3 = vadd.f32 %v2960_v41, %v2768_v8 }
 0x32b   : > { %v2771_v48 = vpop.f32.mrf.mxu0  ;;  %v2964_v37 = vpop.f32.mrf.mxu1 }
 0x32c   : > { %v3174_v56 = vpack.c.bf16 %v3094_v22, %v3090_v61  ;;  %v2772_v33 = vadd.f32 %v2771_v48, %v6153_v21  ;;  %v2963_v57 = vadd.f32 %v2962_v9, %v2770_v47  ;;  %v3097_v49 = vmax.f32 %v2961_v3, 0.0 }
 0x32d   : > { %v2773_v5 = vpop.f32.mrf.mxu0  ;;  %v2966_v11 = vpop.f32.mrf.mxu1 }
 0x32e   : > { %v2965_v20 = vadd.f32 %v2964_v37, %v2772_v33  ;;  %v2774_v51 = vadd.f32 %v2773_v5, %v6146_v23  ;;  %3735 = vmatprep.mubr.bf16.mxu1 %v3174_v56  ;;  %v3098_v28 = vmax.f32 %v2963_v57, 0.0 }
 0x32f   : > { %v2777_v7 = vpop.f32.mrf.mxu0  ;;  %v2970_v31 = vpop.f32.mrf.mxu1  ;;  %3736 = vmatmul.mubr.bf16.gmra.mxu1 %v3173_v35 }
 0x330   : > { %v2967_v16 = vadd.f32 %v2966_v11, %v2774_v51  ;;  %v3101_v4 = vmax.f32 %v2965_v20, 0.0  ;;  %v2778_v24 = vadd.f32 %v2777_v7, %v6153_v21 }
 0x331   : > { %v2779_v45 = vpop.f32.mrf.mxu0  ;;  %v2972_v0 = vpop.f32.mrf.mxu1 }
 0x332   : > { %v3102_v10 = vmax.f32 %v2967_v16, 0.0  ;;  %v2780_v39 = vadd.f32 %v2779_v45, %v6146_v23  ;;  %v3177_v43 = vpack.c.bf16 %v3101_v4, %v3097_v49  ;;  %v2971_v27 = vadd.f32 %v2970_v31, %v2778_v24 }
 0x333   : > { %v2781_v29 = vpop.f32.mrf.mxu0  ;;  %v2974_v14 = vpop.f32.mrf.mxu1 }
 0x334   : > { %v3178_v58 = vpack.c.bf16 %v3102_v10, %v3098_v28  ;;  %v2782_v18 = vadd.f32 %v2781_v29, %v6153_v21  ;;  %v2973_v30 = vadd.f32 %v2972_v0, %v2780_v39  ;;  %v3105_v63 = vmax.f32 %v2971_v27, 0.0 }
 0x335   : > { %v2783_v32 = vpop.f32.mrf.mxu0  ;;  %v2976_v38 = vpop.f32.mrf.mxu1 }
 0x336   : > { %v2975_v52 = vadd.f32 %v2974_v14, %v2782_v18  ;;  %v2784_v36 = vadd.f32 %v2783_v32, %v6146_v23  ;;  %3743 = vmatprep.mubr.bf16.mxu1 %v3178_v58  ;;  %v3106_v12 = vmax.f32 %v2973_v30, 0.0 }
 0x337   : > { %v2787_v15 = vpop.f32.mrf.mxu0  ;;  %v2980_v62 = vpop.f32.mrf.mxu1  ;;  %3744 = vmatmul.mubr.bf16.gmra.mxu1 %v3177_v43 }
 0x338   : > { %v2977_v1 = vadd.f32 %v2976_v38, %v2784_v36  ;;  %v3109_v42 = vmax.f32 %v2975_v52, 0.0  ;;  %v2788_v50 = vadd.f32 %v2787_v15, %v6153_v21 }
 0x339   : > { %v2789_v26 = vpop.f32.mrf.mxu0  ;;  %v2982_v40 = vpop.f32.mrf.mxu1 }
 0x33a   : > { %v3110_v60 = vmax.f32 %v2977_v1, 0.0  ;;  %v2790_v25 = vadd.f32 %v2789_v26, %v6146_v23  ;;  %v3181_v44 = vpack.c.bf16 %v3109_v42, %v3105_v63  ;;  %v2981_v17 = vadd.f32 %v2980_v62, %v2788_v50 }
 0x33b   : > { %v2791_v46 = vpop.f32.mrf.mxu0  ;;  %v2984_v53 = vpop.f32.mrf.mxu1 }
 0x33c   : > { %v3182_v54 = vpack.c.bf16 %v3110_v60, %v3106_v12  ;;  %v2792_v19 = vadd.f32 %v2791_v46, %v6153_v21  ;;  %v2983_v55 = vadd.f32 %v2982_v40, %v2790_v25  ;;  %v3113_v56 = vmax.f32 %v2981_v17, 0.0  ;;  %v6334_v17 = vld [vmem:[%s6536_s6] ss:$0 sm:$0xff] }
 0x33d   : > { %v2793_v2 = vpop.f32.mrf.mxu0  ;;  %v2986_v6 = vpop.f32.mrf.mxu1 }
 0x33e   : > { %v2985_v41 = vadd.f32 %v2984_v53, %v2792_v19  ;;  %v2794_v13 = vadd.f32 %v2793_v2, %v6146_v23  ;;  %3751 = vmatprep.mubr.bf16.mxu1 %v3182_v54  ;;  %v3114_v8 = vmax.f32 %v2983_v55, 0.0 }
 0x33f   : > { %v2797_v59 = vpop.f32.mrf.mxu0  ;;  %v2990_v9 = vpop.f32.mrf.mxu1  ;;  %3752 = vmatmul.mubr.bf16.gmra.mxu1 %v3181_v44 }
 0x340   : > { %v2987_v61 = vadd.f32 %v2986_v6, %v2794_v13  ;;  %v3117_v22 = vmax.f32 %v2985_v41, 0.0  ;;  %v2798_v33 = vadd.f32 %v2797_v59, %v6153_v21 }
 0x341   : > { %v2799_v47 = vpop.f32.mrf.mxu0  ;;  %v2992_v34 = vpop.f32.mrf.mxu1 }
 0x342   : > { %v3118_v48 = vmax.f32 %v2987_v61, 0.0  ;;  %v2800_v37 = vadd.f32 %v2799_v47, %v6146_v23  ;;  %v3185_v20 = vpack.c.bf16 %v3117_v22, %v3113_v56  ;;  %v2991_v16 = vadd.f32 %v2990_v9, %v2798_v33 }
 0x343   : > { %v2801_v35 = vpop.f32.mrf.mxu0  ;;  %v2994_v5 = vpop.f32.mrf.mxu1 }
 0x344   : > { %v3186_v11 = vpack.c.bf16 %v3118_v48, %v3114_v8  ;;  %v2802_v57 = vadd.f32 %v2801_v35, %v6153_v21  ;;  %v2993_v3 = vadd.f32 %v2992_v34, %v2800_v37  ;;  %v3121_v24 = vmax.f32 %v2991_v16, 0.0 }
 0x345   : > { %v2803_v51 = vpop.f32.mrf.mxu0  ;;  %v2996_v4 = vpop.f32.mrf.mxu1 }
 0x346   : > { %v2995_v7 = vadd.f32 %v2994_v5, %v2802_v57  ;;  %v2804_v31 = vadd.f32 %v2803_v51, %v6146_v23  ;;  %3759 = vmatprep.mubr.bf16.mxu1 %v3186_v11  ;;  %v3122_v39 = vmax.f32 %v2993_v3, 0.0 }
 0x347   : > { %v4232_v45 = vpop.f32.mrf.mxu0  ;;  %3760 = vmatmul.mubr.bf16.gmra.mxu1 %v3185_v20 }
 0x348   : > { %v2997_v0 = vadd.f32 %v2996_v4, %v2804_v31  ;;  %v3125_v28 = vmax.f32 %v2995_v7, 0.0 }
 0x349   : > { %v4233_v10 = vpop.f32.mrf.mxu0 }
 0x34a   : > { %v3126_v49 = vmax.f32 %v2997_v0, 0.0  ;;  %v3189_v21 = vpack.c.bf16 %v3125_v28, %v3121_v24  ;;  %v4234_v13 = vadd.f32 %v4233_v10, %v4232_v45 }
 0x34b   : > { %v4235_v29 = vpop.f32.mrf.mxu0 }
 0x34c   : > { %v3190_v14 = vpack.c.bf16 %v3126_v49, %v3122_v39  ;;  %v3489_v22 = vadd.f32 %v4234_v13, %v6334_v17 }
 0x34d   : > { %v4236_v58 = vpop.f32.mrf.mxu0 }
 0x34e   : > { %3767 = vmatprep.mubr.bf16.mxu1 %v3190_v14  ;;  %v4237_v47 = vadd.f32 %v4236_v58, %v4235_v29 }
 0x34f   : > { %v4238_v18 = vpop.f32.mrf.mxu0  ;;  %3768 = vmatmul.mubr.bf16.gmra.mxu1 %v3189_v21 }
 0x350   : > { %v3492_v33 = vadd.f32 %v4237_v47, %v6334_v17 }
 0x351   : > { %v4239_v43 = vpop.f32.mrf.mxu0 }
 0x352   : > { %v4240_v35 = vadd.f32 %v4239_v43, %v4238_v18 }
 0x353   : > { %v4241_v23 = vpop.f32.mrf.mxu0 }
 0x354   : > { %v3497_v7 = vadd.f32 %v4240_v35, %v6334_v17 }
 0x355   : > { %v4242_v32 = vpop.f32.mrf.mxu0 }
 0x356   : > { %v4243_v31 = vadd.f32 %v4242_v32, %v4241_v23 }
 0x357   : > { %v4244_v38 = vpop.f32.mrf.mxu0 }
 0x358   : > { %v3500_v39 = vadd.f32 %v4243_v31, %v6334_v17 }
 0x359   : > { %v4245_v30 = vpop.f32.mrf.mxu0 }
 0x35a   : > { %v4246_v49 = vadd.f32 %v4245_v30, %v4244_v38 }
 0x35b   : > { %v6285_v52 = vpop.f32.mrf.mxu0 }
 0x35c   : > { %v3505_v43 = vadd.f32 %v4246_v49, %v6334_v17 }
 0x35d   : > { %v6287_v36 = vpop.f32.mrf.mxu0 }
 0x35e   : > { %v4249_v23 = vadd.f32 %v6287_v36, %v6285_v52 }
 0x35f   : > { %v6289_v27 = vpop.f32.mrf.mxu0 }
 0x361   : > { %v6291_v15 = vpop.f32.mrf.mxu0 }
 0x362   : > { %v4252_v47 = vadd.f32 %v6291_v15, %v6289_v27 }
 0x363   : > { %v6293_v62 = vpop.f32.mrf.mxu0 }
 0x365   : > { %v6295_v1 = vpop.f32.mrf.mxu0 }
 0x366   : > { %v4255_v35 = vadd.f32 %v6295_v1, %v6293_v62 }
 0x367   : > { %v6297_v42 = vpop.f32.mrf.mxu0 }
 0x369   : > { %v6299_v26 = vpop.f32.mrf.mxu0 }
 0x36b   : > { %v6301_v40 = vpop.f32.mrf.mxu0 }
 0x36d   : > { %v6303_v12 = vpop.f32.mrf.mxu0 }
 0x36f   : > { %v6305_v60 = vpop.f32.mrf.mxu0 }
 0x371   : > { %v6307_v25 = vpop.f32.mrf.mxu0 }
 0x373   : > { %v6309_v63 = vpop.f32.mrf.mxu0 }
 0x375   : > { %v6311_v50 = vpop.f32.mrf.mxu0 }
 0x377   : > { %v6313_v46 = vpop.f32.mrf.mxu0 }
 0x379   : > { %v6315_v53 = vpop.f32.mrf.mxu0 }
 0x37b   : > { %v6317_v54 = vpop.f32.mrf.mxu0 }
 0x37d   : > { %v6319_v19 = vpop.f32.mrf.mxu0 }
 0x37f   : > { %v6321_v44 = vpop.f32.mrf.mxu0 }
 0x381   : > { %v6323_v2 = vpop.f32.mrf.mxu0 }
 0x383   : > { %v6325_v6 = vpop.f32.mrf.mxu0 }
 0x385   : > { %v6327_v55 = vpop.f32.mrf.mxu0 }
 0x387   : > { %v6329_v41 = vpop.f32.mrf.mxu0 }
 0x389   : > { %v6336_v59 = vpop.f32.mrf.mxu0 }
 0x38b   : > { %v6340_v8 = vpop.f32.mrf.mxu0 }
 0x38d   : > { %v6343_v57 = vpop.f32.mrf.mxu0 }
 0x38f   : > { %v6349_v45 = vpop.f32.mrf.mxu0 }
 0x391   : > { %v6353_v14 = vpop.f32.mrf.mxu0 }
 0x397   : > { %v4344_v9 = vpop.f32.mrf.mxu1 }
 0x399   : > { %v4345_v61 = vpop.f32.mrf.mxu1 }
 0x39a   : > { %v4346_v34 = vadd.f32 %v4345_v61, %v4344_v9  ;;  %v6359_v9 = vpop.f32.mrf.mxu0 }
 0x39b   : > { %v4347_v48 = vpop.f32.mrf.mxu1 }
 0x39c   : > { %v3650_v37 = vadd.f32 %v4346_v34, %v3489_v22  ;;  %v3508_v22 = vadd.f32 %v4249_v23, %v6334_v17 }
 0x39d   : > { %v4348_v56 = vpop.f32.mrf.mxu1 }
 0x39e   : > { %v3776_v5 = vmax.f32 %v3650_v37, 0.0  ;;  %v4349_v11 = vadd.f32 %v4348_v56, %v4347_v48  ;;  %v6365_v37 = vpop.f32.mrf.mxu0 }
 0x39f   : > { %v4350_v20 = vpop.f32.mrf.mxu1 }
 0x3a0   : > { %3808 = vst [vmem:[%s6345_s10] sm:$0xff] %v3776_v5  ;;  %v3653_v51 = vadd.f32 %v4349_v11, %v3492_v33  ;;  %v3513_v33 = vadd.f32 %v4252_v47, %v6334_v17 }
 0x3a1   : > { %v4351_v3 = vpop.f32.mrf.mxu1 }
 0x3a2   : > { %v3777_v16 = vmax.f32 %v3653_v51, 0.0  ;;  %v4352_v4 = vadd.f32 %v4351_v3, %v4350_v20  ;;  %v6371_v20 = vpop.f32.mrf.mxu0  ;;  %v3516_v3 = vadd.f32 %v4255_v35, %v6334_v17 }
 0x3a3   : > { %v4353_v0 = vpop.f32.mrf.mxu1 }
 0x3a4   : > { %3809 = vst [vmem:[%s6345_s10 + $0x8] sm:$0xff] %v3777_v16  ;;  %v3658_v28 = vadd.f32 %v4352_v4, %v3497_v7  ;;  %v4258_v7 = vadd.f32 %v6299_v26, %v6297_v42  ;;  %v6377_v4 = vpop.f32.mrf.mxu0 }
 0x3a5   : > { %v4354_v10 = vpop.f32.mrf.mxu1 }
 0x3a6   : > { %v3778_v24 = vmax.f32 %v3658_v28, 0.0  ;;  %v4355_v29 = vadd.f32 %v4354_v10, %v4353_v0  ;;  %v3521_v28 = vadd.f32 %v4258_v7, %v6334_v17  ;;  %v4261_v10 = vadd.f32 %v6303_v12, %v6301_v40 }
 0x3a7   : > { %v4356_v21 = vpop.f32.mrf.mxu1  ;;  %v4276_v7 = vadd.f32 %v6323_v2, %v6321_v44 }
 0x3a8   : > { %3810 = vst [vmem:[%s6345_s10 + $0x10] sm:$0xff] %v3778_v24  ;;  %v3661_v58 = vadd.f32 %v4355_v29, %v3500_v39  ;;  %v6383_v24 = vpop.f32.mrf.mxu0 }
 0x3a9   : > { %v4357_v18 = vpop.f32.mrf.mxu1 }
 0x3aa   : > { %v3779_v32 = vmax.f32 %v3661_v58, 0.0  ;;  %v4358_v13 = vadd.f32 %v4357_v18, %v4356_v21  ;;  %v3524_v21 = vadd.f32 %v4261_v10, %v6334_v17  ;;  %v4264_v58 = vadd.f32 %v6307_v25, %v6305_v60  ;;  %v6389_v23 = vpop.f32.mrf.mxu0 }
 0x3ab   : > { %v4359_v61 = vpop.f32.mrf.mxu1 }
 0x3ac   : > { %3811 = vst [vmem:[%s6345_s10 + $0x18] sm:$0xff] %v3779_v32  ;;  %v3666_v38 = vadd.f32 %v4358_v13, %v3505_v43  ;;  %v3529_v13 = vadd.f32 %v4264_v58, %v6334_v17 }
 0x3ad   : > { %v4360_v30 = vpop.f32.mrf.mxu1 }
 0x3ae   : > { %v3780_v34 = vmax.f32 %v3666_v38, 0.0  ;;  %v4361_v48 = vadd.f32 %v4360_v30, %v4359_v61  ;;  %v4267_v61 = vadd.f32 %v6311_v50, %v6309_v63 }
 0x3af   : > { %v4362_v56 = vpop.f32.mrf.mxu1 }
 0x3b0   : > { %3812 = vst [vmem:[%s6345_s10 + $0x20] sm:$0xff] %v3780_v34  ;;  %v3669_v52 = vadd.f32 %v4361_v48, %v3508_v22  ;;  %v6395_v22 = vpop.f32.mrf.mxu0  ;;  %v3532_v34 = vadd.f32 %v4267_v61, %v6334_v17  ;;  %v4270_v48 = vadd.f32 %v6315_v53, %v6313_v46 }
 0x3b1   : > { %v4363_v36 = vpop.f32.mrf.mxu1 }
 0x3b2   : > { %v3781_v5 = vmax.f32 %v3669_v52, 0.0  ;;  %v4364_v11 = vadd.f32 %v4363_v36, %v4362_v56  ;;  %v6401_v36 = vpop.f32.mrf.mxu0  ;;  %v3537_v35 = vadd.f32 %v4270_v48, %v6334_v17 }
 0x3b3   : > { %v4365_v51 = vpop.f32.mrf.mxu1 }
 0x3b4   : > { %3813 = vst [vmem:[%s6345_s10 + $0x28] sm:$0xff] %v3781_v5  ;;  %v3674_v27 = vadd.f32 %v4364_v11, %v3513_v33  ;;  %v4273_v5 = vadd.f32 %v6319_v19, %v6317_v54 }
 0x3b5   : > { %v4366_v15 = vpop.f32.mrf.mxu1 }
 0x3b6   : > { %v3782_v31 = vmax.f32 %v3674_v27, 0.0  ;;  %v4367_v16 = vadd.f32 %v4366_v15, %v4365_v51  ;;  %v6407_v27 = vpop.f32.mrf.mxu0 }
 0x3b7   : > { %v4368_v0 = vpop.f32.mrf.mxu1 }
 0x3b8   : > { %3814 = vst [vmem:[%s6345_s10 + $0x30] sm:$0xff] %v3782_v31  ;;  %v3677_v62 = vadd.f32 %v4367_v16, %v3516_v3  ;;  %v3540_v3 = vadd.f32 %v4273_v5, %v6334_v17 }
 0x3b9   : > { %v4369_v1 = vpop.f32.mrf.mxu1 }
 0x3ba   : > { %v3783_v39 = vmax.f32 %v3677_v62, 0.0  ;;  %v4370_v49 = vadd.f32 %v4369_v1, %v4368_v0  ;;  %v6413_v0 = vpop.f32.mrf.mxu0  ;;  %v3545_v1 = vadd.f32 %v4276_v7, %v6334_v17  ;;  %v4297_v7 = vadd.f32 %v6389_v23, %v6383_v24 }
 0x3bb   : > { %v4371_v29 = vpop.f32.mrf.mxu1 }
 0x3bc   : > { %3815 = vst [vmem:[%s6345_s10 + $0x38] sm:$0xff] %v3783_v39  ;;  %v3682_v42 = vadd.f32 %v4370_v49, %v3521_v28  ;;  %v4279_v28 = vadd.f32 %v6327_v55, %v6325_v6  ;;  %v6419_v49 = vpop.f32.mrf.mxu0 }
 0x3bd   : > { %v4372_v26 = vpop.f32.mrf.mxu1 }
 0x3be   : > { %v3784_v18 = vmax.f32 %v3682_v42, 0.0  ;;  %v4373_v43 = vadd.f32 %v4372_v26, %v4371_v29  ;;  %v3548_v42 = vadd.f32 %v4279_v28, %v6334_v17  ;;  %v4282_v26 = vadd.f32 %v6336_v59, %v6329_v41 }
 0x3bf   : > { %v4374_v32 = vpop.f32.mrf.mxu1 }
 0x3c0   : > { %3816 = vst [vmem:[%s6345_s10 + $0x40] sm:$0xff] %v3784_v18  ;;  %v3685_v40 = vadd.f32 %v4373_v43, %v3524_v21  ;;  %v6425_v18 = vpop.f32.mrf.mxu0 }
 0x3c1   : > { %v4375_v12 = vpop.f32.mrf.mxu1 }
 0x3c2   : > { %v3785_v38 = vmax.f32 %v3685_v40, 0.0  ;;  %v4376_v30 = vadd.f32 %v4375_v12, %v4374_v32  ;;  %v3553_v32 = vadd.f32 %v4282_v26, %v6334_v17  ;;  %v4285_v40 = vadd.f32 %v6343_v57, %v6340_v8  ;;  %v6431_v61 = vpop.f32.mrf.mxu0 }
 0x3c3   : > { %v4377_v47 = vpop.f32.mrf.mxu1 }
 0x3c4   : > { %3817 = vst [vmem:[%s6345_s10 + $0x48] sm:$0xff] %v3785_v38  ;;  %v3690_v60 = vadd.f32 %v4376_v30, %v3529_v13  ;;  %v3556_v30 = vadd.f32 %v4285_v40, %v6334_v17 }
 0x3c5   : > { %v4378_v25 = vpop.f32.mrf.mxu1 }
 0x3c6   : > { %v3786_v56 = vmax.f32 %v3690_v60, 0.0  ;;  %v4379_v52 = vadd.f32 %v4378_v25, %v4377_v47  ;;  %v4288_v47 = vadd.f32 %v6353_v14, %v6349_v45 }
 0x3c7   : > { %v4380_v33 = vpop.f32.mrf.mxu1 }
 0x3c8   : > { %3818 = vst [vmem:[%s6345_s10 + $0x50] sm:$0xff] %v3786_v56  ;;  %v3693_v63 = vadd.f32 %v4379_v52, %v3532_v34  ;;  %v4308_v34 = vpop.f32.mrf.mxu0  ;;  %v3561_v56 = vadd.f32 %v4288_v47, %v6334_v17  ;;  %v4291_v52 = vadd.f32 %v6365_v37, %v6359_v9 }
 0x3c9   : > { %v4381_v50 = vpop.f32.mrf.mxu1 }
 0x3ca   : > { %v3787_v11 = vmax.f32 %v3693_v63, 0.0  ;;  %v4382_v51 = vadd.f32 %v4381_v50, %v4380_v33  ;;  %v4310_v50 = vpop.f32.mrf.mxu0  ;;  %v3564_v14 = vadd.f32 %v4291_v52, %v6334_v17 }
 0x3cb   : > { %v4383_v15 = vpop.f32.mrf.mxu1 }
 0x3cc   : > { %3819 = vst [vmem:[%s6345_s10 + $0x58] sm:$0xff] %v3787_v11  ;;  %v3698_v46 = vadd.f32 %v4382_v51, %v3537_v35  ;;  %v4294_v11 = vadd.f32 %v6377_v4, %v6371_v20  ;;  %v3572_v4 = vadd.f32 %v4297_v7, %v6334_v17 }
 0x3cd   : > { %v4384_v53 = vpop.f32.mrf.mxu1 }
 0x3ce   : > { %v3788_v31 = vmax.f32 %v3698_v46, 0.0  ;;  %v4385_v16 = vadd.f32 %v4384_v53, %v4383_v15  ;;  %v4311_v46 = vpop.f32.mrf.mxu0  ;;  %v3569_v37 = vadd.f32 %v4294_v11, %v6334_v17 }
 0x3cf   : > { %v4386_v62 = vpop.f32.mrf.mxu1 }
 0x3d0   : > { %3820 = vst [vmem:[%s6345_s10 + $0x60] sm:$0xff] %v3788_v31  ;;  %v3701_v54 = vadd.f32 %v4385_v16, %v3540_v3 }
 0x3d1   : > { %v4387_v19 = vpop.f32.mrf.mxu1 }
 0x3d2   : > { %v3789_v10 = vmax.f32 %v3701_v54, 0.0  ;;  %v4388_v39 = vadd.f32 %v4387_v19, %v4386_v62  ;;  %v4313_v62 = vpop.f32.mrf.mxu0 }
 0x3d3   : > { %v4389_v29 = vpop.f32.mrf.mxu1 }
 0x3d4   : > { %3821 = vst [vmem:[%s6345_s10 + $0x68] sm:$0xff] %v3789_v10  ;;  %v3706_v44 = vadd.f32 %v4388_v39, %v3545_v1  ;;  %v4300_v1 = vadd.f32 %v6401_v36, %v6395_v22  ;;  %v4314_v39 = vpop.f32.mrf.mxu0 }
 0x3d5   : > { %v4390_v2 = vpop.f32.mrf.mxu1 }
 0x3d6   : > { %v3790_v21 = vmax.f32 %v3706_v44, 0.0  ;;  %v4391_v58 = vadd.f32 %v4390_v2, %v4389_v29  ;;  %v3577_v23 = vadd.f32 %v4300_v1, %v6334_v17  ;;  %v4303_v2 = vadd.f32 %v6413_v0, %v6407_v27 }
 0x3d7   : > { %v4392_v43 = vpop.f32.mrf.mxu1 }
 0x3d8   : > { %3822 = vst [vmem:[%s6345_s10 + $0x70] sm:$0xff] %v3790_v21  ;;  %v3709_v6 = vadd.f32 %v4391_v58, %v3548_v42  ;;  %v4316_v21 = vpop.f32.mrf.mxu0  ;;  %v3580_v36 = vadd.f32 %v4303_v2, %v6334_v17 }
 0x3d9   : > { %v4393_v55 = vpop.f32.mrf.mxu1 }
 0x3da   : > { %v3791_v12 = vmax.f32 %v3709_v6, 0.0  ;;  %v4394_v13 = vadd.f32 %v4393_v55, %v4392_v43  ;;  %v4306_v6 = vadd.f32 %v6425_v18, %v6419_v49  ;;  %v4317_v40 = vpop.f32.mrf.mxu0  ;;  %v4312_v18 = vadd.f32 %v4311_v46, %v4310_v50 }
 0x3db   : > { %v4395_v38 = vpop.f32.mrf.mxu1 }
 0x3dc   : > { %3823 = vst [vmem:[%s6345_s10 + $0x78] sm:$0xff] %v3791_v12  ;;  %v3714_v41 = vadd.f32 %v4394_v13, %v3553_v32  ;;  %v3585_v0 = vadd.f32 %v4306_v6, %v6334_v17 }
 0x3dd   : > { %v4396_v59 = vpop.f32.mrf.mxu1 }
 0x3de   : > { %v3792_v60 = vmax.f32 %v3714_v41, 0.0  ;;  %v4397_v25 = vadd.f32 %v4396_v59, %v4395_v38  ;;  %v4309_v38 = vadd.f32 %v4308_v34, %v6431_v61  ;;  %v3593_v61 = vadd.f32 %v4312_v18, %v6334_v17 }
 0x3df   : > { %v4398_v48 = vpop.f32.mrf.mxu1  ;;  %v4315_v34 = vadd.f32 %v4314_v39, %v4313_v62 }
 0x3e0   : > { %3824 = vst [vmem:[%s6345_s10 + $0x80] sm:$0xff] %v3792_v60  ;;  %v3717_v8 = vadd.f32 %v4397_v25, %v3556_v30  ;;  %v4319_v30 = vpop.f32.mrf.mxu0  ;;  %v3588_v49 = vadd.f32 %v4309_v38, %v6334_v17 }
 0x3e1   : > { %v4399_v57 = vpop.f32.mrf.mxu1  ;;  %v3596_v50 = vadd.f32 %v4315_v34, %v6334_v17 }
 0x3e2   : > { %v3793_v33 = vmax.f32 %v3717_v8, 0.0  ;;  %v4400_v63 = vadd.f32 %v4399_v57, %v4398_v48  ;;  %v4320_v57 = vpop.f32.mrf.mxu0 }
 0x3e3   : > { %v4401_v35 = vpop.f32.mrf.mxu1 }
 0x3e4   : > { %3825 = vst [vmem:[%s6345_s10 + $0x88] sm:$0xff] %v3793_v33  ;;  %v3722_v5 = vadd.f32 %v4400_v63, %v3561_v56 }
 0x3e5   : > { %v4402_v45 = vpop.f32.mrf.mxu1 }
 0x3e6   : > { %v3794_v51 = vmax.f32 %v3722_v5, 0.0  ;;  %v4403_v15 = vadd.f32 %v4402_v45, %v4401_v35  ;;  %v4322_v5 = vpop.f32.mrf.mxu0 }
 0x3e7   : > { %v4404_v53 = vpop.f32.mrf.mxu1 }
 0x3e8   : > { %3826 = vst [vmem:[%s6345_s10 + $0x90] sm:$0xff] %v3794_v51  ;;  %v3725_v3 = vadd.f32 %v4403_v15, %v3564_v14  ;;  %v4318_v51 = vadd.f32 %v4317_v40, %v4316_v21 }
 0x3e9   : > { %v4405_v9 = vpop.f32.mrf.mxu1 }
 0x3ea   : > { %v3795_v31 = vmax.f32 %v3725_v3, 0.0  ;;  %v4406_v16 = vadd.f32 %v4405_v9, %v4404_v53  ;;  %v4323_v53 = vpop.f32.mrf.mxu0  ;;  %v3601_v7 = vadd.f32 %v4318_v51, %v6334_v17 }
 0x3eb   : > { %v4407_v54 = vpop.f32.mrf.mxu1 }
 0x3ec   : > { %3827 = vst [vmem:[%s6345_s10 + $0x98] sm:$0xff] %v3795_v31  ;;  %v3730_v19 = vadd.f32 %v4406_v16, %v3569_v37  ;;  %v4321_v31 = vadd.f32 %v4320_v57, %v4319_v30 }
 0x3ed   : > { %v4408_v20 = vpop.f32.mrf.mxu1 }
 0x3ee   : > { %v3796_v28 = vmax.f32 %v3730_v19, 0.0  ;;  %v4409_v10 = vadd.f32 %v4408_v20, %v4407_v54  ;;  %v4325_v54 = vpop.f32.mrf.mxu0  ;;  %v3604_v1 = vadd.f32 %v4321_v31, %v6334_v17 }
 0x3ef   : > { %v4410_v29 = vpop.f32.mrf.mxu1 }
 0x3f0   : > { %3828 = vst [vmem:[%s6345_s10 + $0xa0] sm:$0xff] %v3796_v28  ;;  %v3733_v44 = vadd.f32 %v4409_v10, %v3572_v4  ;;  %v4324_v28 = vadd.f32 %v4323_v53, %v4322_v5 }
 0x3f1   : > { %v4411_v24 = vpop.f32.mrf.mxu1 }
 0x3f2   : > { %v3797_v42 = vmax.f32 %v3733_v44, 0.0  ;;  %v4412_v26 = vadd.f32 %v4411_v24, %v4410_v29  ;;  %v4326_v29 = vpop.f32.mrf.mxu0  ;;  %v3609_v2 = vadd.f32 %v4324_v28, %v6334_v17 }
 0x3f3   : > { %v4413_v58 = vpop.f32.mrf.mxu1 }
 0x3f4   : > { %3829 = vst [vmem:[%s6345_s10 + $0xa8] sm:$0xff] %v3797_v42  ;;  %v3738_v43 = vadd.f32 %v4412_v26, %v3577_v23  ;;  %v4327_v42 = vadd.f32 %v4326_v29, %v4325_v54 }
 0x3f5   : > { %v4414_v22 = vpop.f32.mrf.mxu1 }
 0x3f6   : > { %v3798_v55 = vmax.f32 %v3738_v43, 0.0  ;;  %v4415_v32 = vadd.f32 %v4414_v22, %v4413_v58 }
 0x3f7   : > { %v4416_v12 = vpop.f32.mrf.mxu1 }
 0x3f8   : > { %3830 = vst [vmem:[%s6345_s10 + $0xb0] sm:$0xff] %v3798_v55  ;;  %v3741_v13 = vadd.f32 %v4415_v32, %v3580_v36  ;;  %v3612_v36 = vadd.f32 %v4327_v42, %v6334_v17 }
 0x3f9   : > { %v4417_v27 = vpop.f32.mrf.mxu1 }
 0x3fa   : > { %v3799_v41 = vmax.f32 %v3741_v13, 0.0  ;;  %v4418_v59 = vadd.f32 %v4417_v27, %v4416_v12 }
 0x3fb   : > { %v4419_v47 = vpop.f32.mrf.mxu1 }
 0x3fc   : > { %3831 = vst [vmem:[%s6345_s10 + $0xb8] sm:$0xff] %v3799_v41  ;;  %v3746_v60 = vadd.f32 %v4418_v59, %v3585_v0 }
 0x3fd   : > { %v4420_v25 = vpop.f32.mrf.mxu1 }
 0x3fe   : > { %v3800_v48 = vmax.f32 %v3746_v60, 0.0  ;;  %v4421_v8 = vadd.f32 %v4420_v25, %v4419_v47 }
 0x3ff   : > { %v4422_v56 = vpop.f32.mrf.mxu1 }
 0x400   : > { %3832 = vst [vmem:[%s6345_s10 + $0xc0] sm:$0xff] %v3800_v48  ;;  %v3749_v52 = vadd.f32 %v4421_v8, %v3588_v49 }
 0x401   : > { %v4423_v33 = vpop.f32.mrf.mxu1 }
 0x402   : > { %v3801_v63 = vmax.f32 %v3749_v52, 0.0  ;;  %v4424_v35 = vadd.f32 %v4423_v33, %v4422_v56 }
 0x403   : > { %v4425_v45 = vpop.f32.mrf.mxu1 }
 0x404   : > { %3833 = vst [vmem:[%s6345_s10 + $0xc8] sm:$0xff] %v3801_v63  ;;  %v3754_v14 = vadd.f32 %v4424_v35, %v3593_v61 }
 0x405   : > { %v4426_v11 = vpop.f32.mrf.mxu1 }
 0x406   : > { %v3802_v15 = vmax.f32 %v3754_v14, 0.0  ;;  %v4427_v46 = vadd.f32 %v4426_v11, %v4425_v45 }
 0x407   : > { %v4428_v3 = vpop.f32.mrf.mxu1 }
 0x408   : > { %3834 = vst [vmem:[%s6345_s10 + $0xd0] sm:$0xff] %v3802_v15  ;;  %v3757_v9 = vadd.f32 %v4427_v46, %v3596_v50 }
 0x409   : > { %v4429_v37 = vpop.f32.mrf.mxu1 }
 0x40a   : > { %v3803_v16 = vmax.f32 %v3757_v9, 0.0  ;;  %v4430_v62 = vadd.f32 %v4429_v37, %v4428_v3 }
 0x40b   : > { %v4431_v19 = vpop.f32.mrf.mxu1 }
 0x40c   : > { %3835 = vst [vmem:[%s6345_s10 + $0xd8] sm:$0xff] %v3803_v16  ;;  %v3762_v20 = vadd.f32 %v4430_v62, %v3601_v7 }
 0x40d   : > { %v4432_v4 = vpop.f32.mrf.mxu1 }
 0x40e   : > { %v3804_v10 = vmax.f32 %v3762_v20, 0.0  ;;  %v4433_v39 = vadd.f32 %v4432_v4, %v4431_v19 }
 0x40f   : > { %v4434_v44 = vpop.f32.mrf.mxu1 }
 0x410   : > { %3836 = vst [vmem:[%s6345_s10 + $0xe0] sm:$0xff] %v3804_v10  ;;  %v3765_v24 = vadd.f32 %v4433_v39, %v3604_v1 }
 0x411   : > { %v4435_v23 = vpop.f32.mrf.mxu1 }
 0x412   : > { %v3805_v26 = vmax.f32 %v3765_v24, 0.0  ;;  %v4436_v21 = vadd.f32 %v4435_v23, %v4434_v44 }
 0x413   : > { %v4437_v58 = vpop.f32.mrf.mxu1 }
 0x414   : > { %3837 = vst [vmem:[%s6345_s10 + $0xe8] sm:$0xff] %v3805_v26  ;;  %v3770_v43 = vadd.f32 %v4436_v21, %v3609_v2 }
 0x415   : > { %v4438_v22 = vpop.f32.mrf.mxu1 }
 0x416   : > { %v3806_v6 = vmax.f32 %v3770_v43, 0.0  ;;  %v4439_v55 = vadd.f32 %v4438_v22, %v4437_v58 }
 0x418   : > { %3838 = vst [vmem:[%s6345_s10 + $0xf0] sm:$0xff] %v3806_v6  ;;  %v3773_v32 = vadd.f32 %v4439_v55, %v3612_v36 }
 0x41a   : > { %v3807_v40 = vmax.f32 %v3773_v32, 0.0 }
 0x41c   : > { %3839 = vst [vmem:[%s6345_s10 + $0xf8] sm:$0xff] %v3807_v40 }
 0x41d   : > { %4998 = shalt.err (!%p4995_p5)
}
 0x41e   : > { %s4999_s9 = scalar_lea.hbm %s6484_s17, 4096  ;;  %s5003_s29 = scalar_lea.hbm %s6537_s7, 8192 }
 0x41f   : > { %p5000_p6 = scmp.ne.s32.totalorder %s6484_s17, %s4999_s9  ;;  %p5004_p1 = scmp.lt.s32.totalorder %s6484_s17, %s6537_s7 }
 0x420   : > { %p5005_p11 = scmp.lt.s32.totalorder %s5003_s29, %s4999_s9 }
 0x421   : > { %p5001_p4 = pnand %p5000_p6, %p6666_p12 }
 0x422   : > { %p5006_p0 = por %p5005_p11, %p5004_p1 }
 0x423   : > { %p5002_p8 = pneg %p5001_p4 }
 0x425   : > { %p5007_p2 = pnand %p5006_p0, %p5002_p8 }
 0x427   : > { %5010 = shalt.err (!%p5007_p2)
}
 0x428   : > { %s5069_s15 = smov 128   ;;  %s5070_s18 = smov 8  }
 0x429   : > { %4458 = dma.vmem_to_hbm [thread:$0]  (%p6666_p12), %s6486_s12, 4096, %s6484_s17, %s3841_s1, %s5069_s15, %s5069_s15, %s5070_s18  }
 0x42a PF: > { %s3869_s14 = sand.u32 1, %s5045_s24   ;;  %p6667_p10 = scmp.ne.s32.totalorder %s6576_s8, 0 }
 0x42b   : > { %p6668_p7 = scmp.ge.s32.totalorder %s5057_s27, 2  ;;  %s3870_s28 = scalar_lea.sflag [#allocation4], %s3869_s14 }
 0x42d   : > { %p4478_p9 = pnand %p6668_p7, %p6667_p10 }
 0x42f   : > { %p4479_p13 = pneg %p4478_p9 }
 0x431   : > { %5040 = dma.done.wait (%p4479_p13), %s3870_s28, 4096  }
 0x432   : > { %5042 = vsyncadd (%p4479_p13), %s3870_s28, 4294963200  ;;  %p22_p3 = scmp.ge.s32.totalorder %s5205_s23, 4   ;;  %s6669_s24 = smov %s5049_s25 }
 0x433   : > { %s6670_s25 = smov %s5053_s26  ;;  %s6671_s26 = smov %s5214_s11 }
 0x434   : > { %s6672_s27 = smov %s5205_s23  ;;  %24 = sbr.rel (!%p22_p3) target bundleno = 9 (0x9), region = 109 }
 0x439   :  { %3875 = vsyncpa [#allocation3], 1 }
 0x43a   :  { %3877 = vsyncpa [#allocation3 + $0x1], 1 }
 0x43b   :  { %3878 = vsyncpa [#allocation6], 1 }
 0x43c   :  { %3879 = vsyncpa [#allocation9], 1 }
 0x43d   :  { %3880 = vsyncpa [#allocation4], 1 }
 0x43e   :  { %3882 = vsyncpa [#allocation4 + $0x1], 1 }

</bundles_post_ra>
